<compile_context>
chip_gen: v7x
topology: tpu7x:2x2x1
jax: 0.10.0
libtpu: 0.0.40
codegen_flags: <defaults>
</compile_context>

<pallas_src>
import jax
import jax.numpy as jnp
from jax import lax
from jax.experimental import pallas as pl
from jax.experimental.pallas import tpu as pltpu

LANE = 128


def _round_up(n, m=LANE):
    return ((n + m - 1) // m) * m


def _vmem_limit_bytes():
    # Don't request v7x's entire 64 MiB; target ~75% of physical VMEM (48 MiB on v7x,
    # ~96 MiB on v5e/v6e), leaving headroom for compiler temporaries.
    try:
        phys = pltpu.get_tpu_info().vmem_capacity_bytes
        return int(min(phys * 3 // 4, 100 << 20))
    except Exception:
        return 48 << 20


def prepare_params(w1_t, g1, b1, w3_t, g3, b3, w4_t, g4, b4,
                   *, matmul_dtype=jnp.bfloat16):
    """Fold Affine scales into conv weights, lane-pad channels. Do once, reuse per call."""
    P, Cin = w1_t.shape[0], w1_t.shape[1]
    Cout = w4_t.shape[0]
    Cin_p, P_p, Cout_p = _round_up(Cin), _round_up(P), _round_up(Cout)

    g1f, b1f = g1.reshape(-1), b1.reshape(-1)
    g3f, b3f = g3.reshape(-1), b3.reshape(-1)
    g4f, b4f = g4.reshape(-1), b4.reshape(-1)

    w1 = (w1_t[:, :, 0, 0, 0] * g1f[:, None]).T                  # (Cin, P)
    w3 = jnp.transpose(w3_t[:, 0], (1, 2, 3, 0)) * g3f           # (3, 3, 3, P)
    w4 = (w4_t[:, :, 0, 0, 0] * g4f[:, None]).T                  # (P, Cout)

    w1 = jnp.pad(w1, ((0, Cin_p - Cin), (0, P_p - P))).astype(matmul_dtype)
    w4 = jnp.pad(w4, ((0, P_p - P), (0, Cout_p - Cout))).astype(matmul_dtype)
    w3 = jnp.pad(w3, ((0, 0),) * 3 + ((0, P_p - P),)).astype(jnp.float32)
    b1p = jnp.pad(b1f, (0, P_p - P)).reshape(1, P_p).astype(jnp.float32)
    b3p = jnp.pad(b3f, (0, P_p - P)).reshape(1, P_p).astype(jnp.float32)
    b4p = jnp.pad(b4f, (0, Cout_p - Cout)).reshape(1, Cout_p).astype(jnp.float32)
    return (w1, b1p, w3, b3p, w4, b4p)


def bottleneck_ircsnv2_nthwc(x, params, *, t_tile=4, stencil_dtype=jnp.float32):
    """Channels-last, lane-padded entry point.

    x      : (N, T, H, W, Cin_p) float32, Cin_p a multiple of 128 (pad lanes must be 0).
    params : output of prepare_params (matmul dtype is taken from the weights).
    Returns (N, T, H, W, Cout_p) float32 with zero pad lanes -> chainable across blocks.
    """
    w1, b1p, w3, b3p, w4, b4p = params
    N, T, H, W, Cin_p = x.shape
    P_p, Cout_p = w1.shape[1], w4.shape[1]
    matmul_dtype = w1.dtype
    assert Cin_p == Cout_p, "identity residual needs in_planes == planes * expansion"

    # Largest T tile <= t_tile that divides T (keeps blocks rectangular; no masking).
    TT = max(1, min(int(t_tile), T))
    while T % TT:
        TT -= 1
    NT = T // TT

    def kernel(x_ref, x_hbm, w1_ref, b1_ref, w3_ref, b3_ref, w4_ref, b4_ref,
               out_ref, slab_ref, xhalo_ref, sem):
        n = pl.program_id(0)
        t = pl.program_id(1)
        nt = pl.num_programs(1)
        t0 = t * TT

        # --- kick off the temporal-halo x-frame DMAs early (hidden under central conv1) ---
        @pl.when(t > 0)
        def _():
            pltpu.make_async_copy(x_hbm.at[n, t0 - 1], xhalo_ref.at[0], sem.at[0]).start()

        @pl.when(t < nt - 1)
        def _():
            pltpu.make_async_copy(x_hbm.at[n, t0 + TT], xhalo_ref.at[1], sem.at[1]).start()

        # Thin halo ring: only the two H-face rows need per-step zeroing (W halo is baked
        # into the shifted slab copies; T faces are filled with real data below).
        zrow = jnp.zeros((3, TT + 2, 1, W, P_p), stencil_dtype)
        slab_ref[:, :, 0:1, :, :] = zrow
        slab_ref[:, :, H + 1:H + 2, :, :] = zrow

        w1v = w1_ref[...]
        b1v = b1_ref[...]
        zcol = jnp.zeros((H, 1, P_p), jnp.float32)

        def conv1_frame(xf):                    # (H, W, Cin_p) f32 -> (H, W, P_p) f32
            o = jnp.dot(xf.reshape(H * W, Cin_p).astype(matmul_dtype), w1v,
                        preferred_element_type=jnp.float32)
            return jnp.maximum(o + b1v, 0.0).reshape(H, W, P_p)

        def store_slabs(ts, o1):
            # Three W-shifted copies of the zero-padded o1 frame at T slot `ts`, all at the
            # same aligned W offset -> the 27-tap loop only does aligned leading-dim-offset
            # reads (2 shift materialisations per frame instead of 18 misaligned slices).
            # (pltpu.roll on the XLU could replace the concatenates to free VPU slots.)
            slab_ref[1:2, ts:ts + 1, 1:H + 1, :, :] = (
                o1.astype(stencil_dtype).reshape(1, 1, H, W, P_p))
            left = jnp.concatenate([zcol, o1[:, :W - 1, :]], axis=1)   # o1_pad[.., w]
            slab_ref[0:1, ts:ts + 1, 1:H + 1, :, :] = (
                left.astype(stencil_dtype).reshape(1, 1, H, W, P_p))
            right = jnp.concatenate([o1[:, 1:, :], zcol], axis=1)      # o1_pad[.., w+2]
            slab_ref[2:3, ts:ts + 1, 1:H + 1, :, :] = (
                right.astype(stencil_dtype).reshape(1, 1, H, W, P_p))

        # conv1 + ReLU for the TT central frames (fully unrolled, static indices).
        for tc in range(TT):
            store_slabs(tc + 1, conv1_frame(x_ref[0, tc]))

        # Temporal halo faces: conv1 of the neighbouring tile's edge frame (recomputed from
        # the DMA'd x frame) at interior tile boundaries; zeros only at the sequence ends.
        @pl.when(t > 0)
        def _():
            pltpu.make_async_copy(x_hbm.at[n, t0 - 1], xhalo_ref.at[0], sem.at[0]).wait()
            store_slabs(0, conv1_frame(xhalo_ref[0]))

        @pl.when(t == 0)
        def _():
            slab_ref[:, 0:1, 1:H + 1, :, :] = jnp.zeros((3, 1, H, W, P_p), stencil_dtype)

        @pl.when(t < nt - 1)
        def _():
            pltpu.make_async_copy(x_hbm.at[n, t0 + TT], xhalo_ref.at[1], sem.at[1]).wait()
            store_slabs(TT + 1, conv1_frame(xhalo_ref[1]))

        @pl.when(t == nt - 1)
        def _():
            slab_ref[:, TT + 1:TT + 2, 1:H + 1, :, :] = jnp.zeros(
                (3, 1, H, W, P_p), stencil_dtype)

        # conv3 (depthwise 3x3x3) + conv4 (1x1x1) + residual + ReLU, fused per output frame
        # so the stencil accumulator is one (H, W, P_p) slab, not a full-volume value, and
        # the residual is read per frame from the pipelined input block.
        w3v = w3_ref[...]
        b3v = b3_ref[...]
        w4v = w4_ref[...]
        b4v = b4_ref[...]
        for tc in range(TT):
            acc = slab_ref[1, tc + 1, 1:H + 1, :, :].astype(jnp.float32) * w3v[1, 1, 1]
            for dt in range(3):
                for dh in range(3):
                    for dw in range(3):
                        if (dt, dh, dw) == (1, 1, 1):
                            continue
                        tap = slab_ref[dw, tc + dt, dh:dh + H, :, :]
                        acc = acc + tap.astype(jnp.float32) * w3v[dt, dh, dw]
            o3 = jnp.maximum(acc + b3v, 0.0)
            o4 = jnp.dot(o3.reshape(H * W, P_p).astype(matmul_dtype), w4v,
                         preferred_element_type=jnp.float32)
            res = x_ref[0, tc].reshape(H * W, Cin_p)
            outf = jnp.maximum(o4 + b4v + res, 0.0)
            out_ref[0:1, tc:tc + 1, :, :, :] = outf.reshape(1, 1, H, W, Cout_p)

    def _const_spec(shape):
        nd = len(shape)
        return pl.BlockSpec(shape, lambda n, t, _nd=nd: (0,) * _nd)

    grid_spec = pltpu.PrefetchScalarGridSpec(
        num_scalar_prefetch=0,
        grid=(N, NT),
        in_specs=[
            pl.BlockSpec((1, TT, H, W, Cin_p), lambda n, t: (n, t, 0, 0, 0)),
            pl.BlockSpec(memory_space=pl.ANY),        # same x, raw HBM ref for halo DMA
            _const_spec((Cin_p, P_p)), _const_spec((1, P_p)),
            _const_spec((3, 3, 3, P_p)), _const_spec((1, P_p)),
            _const_spec((P_p, Cout_p)), _const_spec((1, Cout_p)),
        ],
        out_specs=pl.BlockSpec((1, TT, H, W, Cout_p), lambda n, t: (n, t, 0, 0, 0)),
        scratch_shapes=[
            pltpu.VMEM((3, TT + 2, H + 2, W, P_p), stencil_dtype),  # shifted o1 slabs
            pltpu.VMEM((2, H, W, Cin_p), jnp.float32),              # halo x frames
            pltpu.SemaphoreType.DMA((2,)),
        ],
    )

    return pl.pallas_call(
        kernel,
        out_shape=jax.ShapeDtypeStruct((N, T, H, W, Cout_p), jnp.float32),
        grid_spec=grid_spec,
        compiler_params=pltpu.CompilerParams(
            dimension_semantics=("parallel", "parallel"),
            vmem_limit_bytes=_vmem_limit_bytes(),
        ),
    )(x, x, w1, b1p, w3, b3p, w4, b4p)


def bottleneck_ircsnv2(x_ncthw, w1_t, g1, b1, w3_t, g3, b3, w4_t, g4, b4, *,
                       matmul_dtype=jnp.bfloat16, stencil_dtype=jnp.float32, t_tile=4):
    """PyTorch-convention (NCTHW) wrapper, used for the reference check only.

    Production use should keep activations in the channels-last lane-padded layout and
    call bottleneck_ircsnv2_nthwc directly to avoid the transpose/pad HBM round trips.
    """
    N, Cin, T, H, W = x_ncthw.shape
    Cout = w4_t.shape[0]
    assert Cin == Cout, "identity residual requires in_planes == planes * expansion"
    # TODO(synk): stride>1 / temporal_stride>1 and the down_sample residual branch are not
    # implemented; this covers the down_sample is None configuration of the module.
    params = prepare_params(w1_t, g1, b1, w3_t, g3, b3, w4_t, g4, b4,
                            matmul_dtype=matmul_dtype)
    Cin_p = _round_up(Cin)
    x = jnp.transpose(x_ncthw, (0, 2, 3, 4, 1))
    x = jnp.pad(x, ((0, 0),) * 4 + ((0, Cin_p - Cin),))
    out = bottleneck_ircsnv2_nthwc(x, params, t_tile=t_tile, stencil_dtype=stencil_dtype)
    return jnp.transpose(out[..., :Cout], (0, 4, 1, 2, 3))


def ref_forward(x, w1_t, g1, b1, w3_t, g3, b3, w4_t, g4, b4):
    """Pure-JAX f32 reference in PyTorch NCTHW / OIDHW conventions."""
    dn = ('NCDHW', 'OIDHW', 'NCDHW')

    def aff(y, g, bb):
        return y * g.reshape(1, -1, 1, 1, 1) + bb.reshape(1, -1, 1, 1, 1)

    out = lax.conv_general_dilated(x, w1_t, (1, 1, 1), 'VALID', dimension_numbers=dn)
    out = jnp.maximum(aff(out, g1, b1), 0.0)
    out = lax.conv_general_dilated(out, w3_t, (1, 1, 1), [(1, 1), (1, 1), (1, 1)],
                                   dimension_numbers=dn,
                                   feature_group_count=w3_t.shape[0])
    out = jnp.maximum(aff(out, g3, b3), 0.0)
    out = lax.conv_general_dilated(out, w4_t, (1, 1, 1), 'VALID', dimension_numbers=dn)
    out = aff(out, g4, b4)
    return jnp.maximum(out + x, 0.0)


if __name__ == "__main__":
    # Small shapes consistent with the module: identity residual requires
    # in_planes == planes * expansion, stride = temporal_stride = 1.
    N, in_planes, planes, expansion = 2, 8, 4, 2
    T, H, W = 4, 8, 8
    out_planes = planes * expansion            # == in_planes -> down_sample is None

    key = jax.random.PRNGKey(0)
    ks = jax.random.split(key, 10)

    x = jax.random.normal(ks[0], (N, in_planes, T, H, W), jnp.float32)
    w1_t = jax.random.normal(ks[1], (planes, in_planes, 1, 1, 1), jnp.float32) * 0.2
    w3_t = jax.random.normal(ks[2], (planes, 1, 3, 3, 3), jnp.float32) * 0.2
    w4_t = jax.random.normal(ks[3], (out_planes, planes, 1, 1, 1), jnp.float32) * 0.2
    g1 = jax.random.normal(ks[4], (planes, 1, 1, 1), jnp.float32)
    b1 = jax.random.normal(ks[5], (planes, 1, 1, 1), jnp.float32)
    g3 = jax.random.normal(ks[6], (planes, 1, 1, 1), jnp.float32)
    b3 = jax.random.normal(ks[7], (planes, 1, 1, 1), jnp.float32)
    g4 = jax.random.normal(ks[8], (out_planes, 1, 1, 1), jnp.float32)
    b4 = jax.random.normal(ks[9], (out_planes, 1, 1, 1), jnp.float32)

    ref = jax.block_until_ready(
        ref_forward(x, w1_t, g1, b1, w3_t, g3, b3, w4_t, g4, b4))

    # (a) f32 operands + f32 stencil, 2-frame T tiles -> exercises the inter-tile halo DMA.
    out_a = jax.block_until_ready(
        bottleneck_ircsnv2(x, w1_t, g1, b1, w3_t, g3, b3, w4_t, g4, b4,
                           matmul_dtype=jnp.float32, stencil_dtype=jnp.float32, t_tile=2))
    assert out_a.shape == (N, out_planes, T, H, W), out_a.shape
    assert jnp.allclose(out_a, ref, rtol=1e-3, atol=1e-3), \
        float(jnp.max(jnp.abs(out_a - ref)))

    # (b) 1-frame T tiles -> both halo DMAs active on interior tiles.
    out_b = jax.block_until_ready(
        bottleneck_ircsnv2(x, w1_t, g1, b1, w3_t, g3, b3, w4_t, g4, b4,
                           matmul_dtype=jnp.float32, stencil_dtype=jnp.float32, t_tile=1))
    assert jnp.allclose(out_b, ref, rtol=1e-3, atol=1e-3), \
        float(jnp.max(jnp.abs(out_b - ref)))

    # (c) single T tile (no halo DMA path).
    out_c = jax.block_until_ready(
        bottleneck_ircsnv2(x, w1_t, g1, b1, w3_t, g3, b3, w4_t, g4, b4,
                           matmul_dtype=jnp.float32, stencil_dtype=jnp.float32, t_tile=4))
    assert jnp.allclose(out_c, ref, rtol=1e-3, atol=1e-3), \
        float(jnp.max(jnp.abs(out_c - ref)))

    # (d) recommended perf config on v6e/v7x: bf16 MXU operands + bf16 stencil storage
    #     (f32 accumulation everywhere); tolerance reflects bf16 rounding.
    out_d = jax.block_until_ready(
        bottleneck_ircsnv2(x, w1_t, g1, b1, w3_t, g3, b3, w4_t, g4, b4,
                           matmul_dtype=jnp.bfloat16, stencil_dtype=jnp.bfloat16,
                           t_tile=2))
    assert jnp.allclose(out_d, ref, rtol=1e-1, atol=2.5e-1), \
        float(jnp.max(jnp.abs(out_d - ref)))

    print("KERNEL_OK")
</pallas_src>

<mosaic_0001>
module attributes {stable_mosaic.version = 11 : i64} {
  func.func @kernel(%arg0: i32, %arg1: i32, %arg2: memref<1x2x8x8x128xf32, #tpu.memory_space<vmem>>, %arg3: memref<2x4x8x8x128xf32, #tpu.memory_space<any>>, %arg4: memref<128x128xf32, #tpu.memory_space<vmem>>, %arg5: memref<1x128xf32, #tpu.memory_space<vmem>>, %arg6: memref<3x3x3x128xf32, #tpu.memory_space<vmem>>, %arg7: memref<1x128xf32, #tpu.memory_space<vmem>>, %arg8: memref<128x128xf32, #tpu.memory_space<vmem>>, %arg9: memref<1x128xf32, #tpu.memory_space<vmem>>, %arg10: memref<1x2x8x8x128xf32, #tpu.memory_space<vmem>>, %arg11: memref<3x4x10x8x128xf32, #tpu.memory_space<vmem>>, %arg12: memref<2x8x8x128xf32, #tpu.memory_space<vmem>>, %arg13: memref<2x!tpu.dma_semaphore, #tpu.memory_space<semaphore_mem>>) attributes {dimension_semantics = [#tpu.dimension_semantics<parallel>, #tpu.dimension_semantics<parallel>], iteration_bounds = array<i64: 2, 2>, scalar_prefetch = 0 : i64, scratch_operands = 3 : i64, tpu.core_type = #tpu.core_type<tc>, window_params = [{transform_indices = @transform_0, window_bounds = array<i64: 1, 2, 8, 8, 128>}, {}, {pipeline_mode = #tpu.pipeline_mode<synchronous>, transform_indices = @transform_2, window_bounds = array<i64: 128, 128>}, {pipeline_mode = #tpu.pipeline_mode<synchronous>, transform_indices = @transform_3, window_bounds = array<i64: 1, 128>}, {pipeline_mode = #tpu.pipeline_mode<synchronous>, transform_indices = @transform_4, window_bounds = array<i64: 3, 3, 3, 128>}, {pipeline_mode = #tpu.pipeline_mode<synchronous>, transform_indices = @transform_5, window_bounds = array<i64: 1, 128>}, {pipeline_mode = #tpu.pipeline_mode<synchronous>, transform_indices = @transform_6, window_bounds = array<i64: 128, 128>}, {pipeline_mode = #tpu.pipeline_mode<synchronous>, transform_indices = @transform_7, window_bounds = array<i64: 1, 128>}, {transform_indices = @transform_8, window_bounds = array<i64: 1, 2, 8, 8, 128>}]} {
    %c2_i32 = arith.constant 2 : i32
    %0 = arith.muli %arg1, %c2_i32 : i32
    %c0_i32 = arith.constant 0 : i32
    %1 = arith.cmpi sgt, %arg1, %c0_i32 : i32
    %2 = arith.extui %1 : i1 to i32
    %c0_i32_0 = arith.constant 0 : i32
    %3 = arith.cmpi ne, %2, %c0_i32_0 : i32
    scf.if %3 {
      %c1_i32_370 = arith.constant 1 : i32
      %531 = arith.subi %0, %c1_i32_370 : i32
      %c0_i32_371 = arith.constant 0 : i32
      %c0_i32_372 = arith.constant 0 : i32
      %c0_i32_373 = arith.constant 0 : i32
      %c0_i32_374 = arith.constant 0 : i32
      %c0_i32_375 = arith.constant 0 : i32
      %532 = tpu.memref_slice %arg3[%arg0, %531, %c0_i32_373, %c0_i32_374, %c0_i32_375] : memref<2x4x8x8x128xf32, #tpu.memory_space<any>> -> memref<1x1x8x8x128xf32, #tpu.memory_space<any>>
      %533 = tpu.memref_squeeze %532 : memref<1x1x8x8x128xf32, #tpu.memory_space<any>> -> memref<8x8x128xf32, #tpu.memory_space<any>>
      %c0_i32_376 = arith.constant 0 : i32
      %c0_i32_377 = arith.constant 0 : i32
      %c0_i32_378 = arith.constant 0 : i32
      %534 = tpu.memref_slice %arg12[%c0_i32_371, %c0_i32_376, %c0_i32_377, %c0_i32_378] : memref<2x8x8x128xf32, #tpu.memory_space<vmem>> -> memref<1x8x8x128xf32, #tpu.memory_space<vmem>>
      %535 = tpu.memref_squeeze %534 : memref<1x8x8x128xf32, #tpu.memory_space<vmem>> -> memref<8x8x128xf32, #tpu.memory_space<vmem>>
      %536 = tpu.memref_slice %arg13[%c0_i32_372] : memref<2x!tpu.dma_semaphore, #tpu.memory_space<semaphore_mem>> -> memref<1x!tpu.dma_semaphore, #tpu.memory_space<semaphore_mem>>
      %537 = tpu.memref_squeeze %536 : memref<1x!tpu.dma_semaphore, #tpu.memory_space<semaphore_mem>> -> memref<!tpu.dma_semaphore, #tpu.memory_space<semaphore_mem>>
      tpu.enqueue_dma source(%533 : memref<8x8x128xf32, #tpu.memory_space<any>>) target(%535 : memref<8x8x128xf32, #tpu.memory_space<vmem>>) target_semaphore(%537 : memref<!tpu.dma_semaphore, #tpu.memory_space<semaphore_mem>>)
    } else {
    }
    %c1_i32 = arith.constant 1 : i32
    %4 = arith.cmpi slt, %arg1, %c1_i32 : i32
    %5 = arith.extui %4 : i1 to i32
    %c0_i32_1 = arith.constant 0 : i32
    %6 = arith.cmpi ne, %5, %c0_i32_1 : i32
    scf.if %6 {
      %c2_i32_370 = arith.constant 2 : i32
      %531 = arith.addi %0, %c2_i32_370 : i32
      %c1_i32_371 = arith.constant 1 : i32
      %c1_i32_372 = arith.constant 1 : i32
      %c0_i32_373 = arith.constant 0 : i32
      %c0_i32_374 = arith.constant 0 : i32
      %c0_i32_375 = arith.constant 0 : i32
      %532 = tpu.memref_slice %arg3[%arg0, %531, %c0_i32_373, %c0_i32_374, %c0_i32_375] : memref<2x4x8x8x128xf32, #tpu.memory_space<any>> -> memref<1x1x8x8x128xf32, #tpu.memory_space<any>>
      %533 = tpu.memref_squeeze %532 : memref<1x1x8x8x128xf32, #tpu.memory_space<any>> -> memref<8x8x128xf32, #tpu.memory_space<any>>
      %c0_i32_376 = arith.constant 0 : i32
      %c0_i32_377 = arith.constant 0 : i32
      %c0_i32_378 = arith.constant 0 : i32
      %534 = tpu.memref_slice %arg12[%c1_i32_371, %c0_i32_376, %c0_i32_377, %c0_i32_378] : memref<2x8x8x128xf32, #tpu.memory_space<vmem>> -> memref<1x8x8x128xf32, #tpu.memory_space<vmem>>
      %535 = tpu.memref_squeeze %534 : memref<1x8x8x128xf32, #tpu.memory_space<vmem>> -> memref<8x8x128xf32, #tpu.memory_space<vmem>>
      %536 = tpu.memref_slice %arg13[%c1_i32_372] : memref<2x!tpu.dma_semaphore, #tpu.memory_space<semaphore_mem>> -> memref<1x!tpu.dma_semaphore, #tpu.memory_space<semaphore_mem>>
      %537 = tpu.memref_squeeze %536 : memref<1x!tpu.dma_semaphore, #tpu.memory_space<semaphore_mem>> -> memref<!tpu.dma_semaphore, #tpu.memory_space<semaphore_mem>>
      tpu.enqueue_dma source(%533 : memref<8x8x128xf32, #tpu.memory_space<any>>) target(%535 : memref<8x8x128xf32, #tpu.memory_space<vmem>>) target_semaphore(%537 : memref<!tpu.dma_semaphore, #tpu.memory_space<semaphore_mem>>)
    } else {
    }
    %cst = arith.constant 0.000000e+00 : f32
    %7 = vector.broadcast %cst : f32 to vector<3x4x1x8x128xf32>
    %c0 = arith.constant 0 : index
    %c0_2 = arith.constant 0 : index
    %c0_3 = arith.constant 0 : index
    %c0_4 = arith.constant 0 : index
    %c0_5 = arith.constant 0 : index
    %8 = vector.load %arg11[%c0, %c0_2, %c0_3, %c0_4, %c0_5] : memref<3x4x10x8x128xf32, #tpu.memory_space<vmem>>, vector<3x4x1x8x128xf32>
    tpu.vector_store %arg11[%c0, %c0_2, %c0_3, %c0_4, %c0_5], %7 {strides = array<i32>} : memref<3x4x10x8x128xf32, #tpu.memory_space<vmem>>, vector<3x4x1x8x128xf32>,
    %c0_6 = arith.constant 0 : index
    %c0_7 = arith.constant 0 : index
    %c9 = arith.constant 9 : index
    %c0_8 = arith.constant 0 : index
    %c0_9 = arith.constant 0 : index
    %9 = vector.load %arg11[%c0_6, %c0_7, %c9, %c0_8, %c0_9] : memref<3x4x10x8x128xf32, #tpu.memory_space<vmem>>, vector<3x4x1x8x128xf32>
    tpu.vector_store %arg11[%c0_6, %c0_7, %c9, %c0_8, %c0_9], %7 {strides = array<i32>} : memref<3x4x10x8x128xf32, #tpu.memory_space<vmem>>, vector<3x4x1x8x128xf32>,
    %c0_10 = arith.constant 0 : index
    %c0_11 = arith.constant 0 : index
    %10 = vector.load %arg4[%c0_10, %c0_11] : memref<128x128xf32, #tpu.memory_space<vmem>>, vector<128x128xf32>
    %c0_12 = arith.constant 0 : index
    %c0_13 = arith.constant 0 : index
    %11 = vector.load %arg5[%c0_12, %c0_13] : memref<1x128xf32, #tpu.memory_space<vmem>>, vector<1x128xf32>
    %cst_14 = arith.constant 0.000000e+00 : f32
    %12 = vector.broadcast %cst_14 : f32 to vector<8x1x128xf32>
    %c0_15 = arith.constant 0 : index
    %c0_16 = arith.constant 0 : index
    %c0_17 = arith.constant 0 : index
    %c0_18 = arith.constant 0 : index
    %c0_19 = arith.constant 0 : index
    %13 = vector.load %arg2[%c0_15, %c0_16, %c0_17, %c0_18, %c0_19] : memref<1x2x8x8x128xf32, #tpu.memory_space<vmem>>, vector<1x1x8x8x128xf32>
    %14 = vector.shape_cast %13 : vector<1x1x8x8x128xf32> to vector<8x8x128xf32>
    %15 = vector.shape_cast %14 : vector<8x8x128xf32> to vector<64x128xf32>
    %cst_20 = arith.constant dense<0.000000e+00> : vector<64x128xf32>
    %16 = tpu.matmul %15, %10, %cst_20 {dimension_numbers = #tpu.dot_dimension_numbers<[1], [0], [0], [1], [0, 0, 1, 1], [], []>} : vector<64x128xf32>, vector<128x128xf32>, vector<64x128xf32> -> vector<64x128xf32>
    %17 = vector.broadcast %11 : vector<1x128xf32> to vector<64x128xf32>
    %18 = arith.addf %16, %17 : vector<64x128xf32>
    %cst_21 = arith.constant 0.000000e+00 : f32
    %19 = vector.broadcast %cst_21 : f32 to vector<64x128xf32>
    %20 = arith.maximumf %18, %19 : vector<64x128xf32>
    %21 = vector.shape_cast %20 : vector<64x128xf32> to vector<8x8x128xf32>
    %22 = vector.shape_cast %21 : vector<8x8x128xf32> to vector<1x1x8x8x128xf32>
    %c1 = arith.constant 1 : index
    %c1_22 = arith.constant 1 : index
    %c1_23 = arith.constant 1 : index
    %c0_24 = arith.constant 0 : index
    %c0_25 = arith.constant 0 : index
    %23 = vector.load %arg11[%c1, %c1_22, %c1_23, %c0_24, %c0_25] : memref<3x4x10x8x128xf32, #tpu.memory_space<vmem>>, vector<1x1x8x8x128xf32>
    tpu.vector_store %arg11[%c1, %c1_22, %c1_23, %c0_24, %c0_25], %22 {strides = array<i32>} : memref<3x4x10x8x128xf32, #tpu.memory_space<vmem>>, vector<1x1x8x8x128xf32>,
    %24 = vector.extract_strided_slice %21 {offsets = [0, 0, 0], sizes = [8, 7, 128], strides = [1, 1, 1]} : vector<8x8x128xf32> to vector<8x7x128xf32>
    %25 = tpu.concatenate %12, %24 in 1 : vector<8x1x128xf32>, vector<8x7x128xf32> -> vector<8x8x128xf32>
    %26 = vector.shape_cast %25 : vector<8x8x128xf32> to vector<1x1x8x8x128xf32>
    %c0_26 = arith.constant 0 : index
    %c1_27 = arith.constant 1 : index
    %c1_28 = arith.constant 1 : index
    %c0_29 = arith.constant 0 : index
    %c0_30 = arith.constant 0 : index
    %27 = vector.load %arg11[%c0_26, %c1_27, %c1_28, %c0_29, %c0_30] : memref<3x4x10x8x128xf32, #tpu.memory_space<vmem>>, vector<1x1x8x8x128xf32>
    tpu.vector_store %arg11[%c0_26, %c1_27, %c1_28, %c0_29, %c0_30], %26 {strides = array<i32>} : memref<3x4x10x8x128xf32, #tpu.memory_space<vmem>>, vector<1x1x8x8x128xf32>,
    %28 = vector.extract_strided_slice %21 {offsets = [0, 1, 0], sizes = [8, 7, 128], strides = [1, 1, 1]} : vector<8x8x128xf32> to vector<8x7x128xf32>
    %29 = tpu.concatenate %28, %12 in 1 : vector<8x7x128xf32>, vector<8x1x128xf32> -> vector<8x8x128xf32>
    %30 = vector.shape_cast %29 : vector<8x8x128xf32> to vector<1x1x8x8x128xf32>
    %c2 = arith.constant 2 : index
    %c1_31 = arith.constant 1 : index
    %c1_32 = arith.constant 1 : index
    %c0_33 = arith.constant 0 : index
    %c0_34 = arith.constant 0 : index
    %31 = vector.load %arg11[%c2, %c1_31, %c1_32, %c0_33, %c0_34] : memref<3x4x10x8x128xf32, #tpu.memory_space<vmem>>, vector<1x1x8x8x128xf32>
    tpu.vector_store %arg11[%c2, %c1_31, %c1_32, %c0_33, %c0_34], %30 {strides = array<i32>} : memref<3x4x10x8x128xf32, #tpu.memory_space<vmem>>, vector<1x1x8x8x128xf32>,
    %c0_35 = arith.constant 0 : index
    %c1_36 = arith.constant 1 : index
    %c0_37 = arith.constant 0 : index
    %c0_38 = arith.constant 0 : index
    %c0_39 = arith.constant 0 : index
    %32 = vector.load %arg2[%c0_35, %c1_36, %c0_37, %c0_38, %c0_39] : memref<1x2x8x8x128xf32, #tpu.memory_space<vmem>>, vector<1x1x8x8x128xf32>
    %33 = vector.shape_cast %32 : vector<1x1x8x8x128xf32> to vector<8x8x128xf32>
    %34 = vector.shape_cast %33 : vector<8x8x128xf32> to vector<64x128xf32>
    %cst_40 = arith.constant dense<0.000000e+00> : vector<64x128xf32>
    %35 = tpu.matmul %34, %10, %cst_40 {dimension_numbers = #tpu.dot_dimension_numbers<[1], [0], [0], [1], [0, 0, 1, 1], [], []>} : vector<64x128xf32>, vector<128x128xf32>, vector<64x128xf32> -> vector<64x128xf32>
    %36 = vector.broadcast %11 : vector<1x128xf32> to vector<64x128xf32>
    %37 = arith.addf %35, %36 : vector<64x128xf32>
    %cst_41 = arith.constant 0.000000e+00 : f32
    %38 = vector.broadcast %cst_41 : f32 to vector<64x128xf32>
    %39 = arith.maximumf %37, %38 : vector<64x128xf32>
    %40 = vector.shape_cast %39 : vector<64x128xf32> to vector<8x8x128xf32>
    %41 = vector.shape_cast %40 : vector<8x8x128xf32> to vector<1x1x8x8x128xf32>
    %c1_42 = arith.constant 1 : index
    %c2_43 = arith.constant 2 : index
    %c1_44 = arith.constant 1 : index
    %c0_45 = arith.constant 0 : index
    %c0_46 = arith.constant 0 : index
    %42 = vector.load %arg11[%c1_42, %c2_43, %c1_44, %c0_45, %c0_46] : memref<3x4x10x8x128xf32, #tpu.memory_space<vmem>>, vector<1x1x8x8x128xf32>
    tpu.vector_store %arg11[%c1_42, %c2_43, %c1_44, %c0_45, %c0_46], %41 {strides = array<i32>} : memref<3x4x10x8x128xf32, #tpu.memory_space<vmem>>, vector<1x1x8x8x128xf32>,
    %43 = vector.extract_strided_slice %40 {offsets = [0, 0, 0], sizes = [8, 7, 128], strides = [1, 1, 1]} : vector<8x8x128xf32> to vector<8x7x128xf32>
    %44 = tpu.concatenate %12, %43 in 1 : vector<8x1x128xf32>, vector<8x7x128xf32> -> vector<8x8x128xf32>
    %45 = vector.shape_cast %44 : vector<8x8x128xf32> to vector<1x1x8x8x128xf32>
    %c0_47 = arith.constant 0 : index
    %c2_48 = arith.constant 2 : index
    %c1_49 = arith.constant 1 : index
    %c0_50 = arith.constant 0 : index
    %c0_51 = arith.constant 0 : index
    %46 = vector.load %arg11[%c0_47, %c2_48, %c1_49, %c0_50, %c0_51] : memref<3x4x10x8x128xf32, #tpu.memory_space<vmem>>, vector<1x1x8x8x128xf32>
    tpu.vector_store %arg11[%c0_47, %c2_48, %c1_49, %c0_50, %c0_51], %45 {strides = array<i32>} : memref<3x4x10x8x128xf32, #tpu.memory_space<vmem>>, vector<1x1x8x8x128xf32>,
    %47 = vector.extract_strided_slice %40 {offsets = [0, 1, 0], sizes = [8, 7, 128], strides = [1, 1, 1]} : vector<8x8x128xf32> to vector<8x7x128xf32>
    %48 = tpu.concatenate %47, %12 in 1 : vector<8x7x128xf32>, vector<8x1x128xf32> -> vector<8x8x128xf32>
    %49 = vector.shape_cast %48 : vector<8x8x128xf32> to vector<1x1x8x8x128xf32>
    %c2_52 = arith.constant 2 : index
    %c2_53 = arith.constant 2 : index
    %c1_54 = arith.constant 1 : index
    %c0_55 = arith.constant 0 : index
    %c0_56 = arith.constant 0 : index
    %50 = vector.load %arg11[%c2_52, %c2_53, %c1_54, %c0_55, %c0_56] : memref<3x4x10x8x128xf32, #tpu.memory_space<vmem>>, vector<1x1x8x8x128xf32>
    tpu.vector_store %arg11[%c2_52, %c2_53, %c1_54, %c0_55, %c0_56], %49 {strides = array<i32>} : memref<3x4x10x8x128xf32, #tpu.memory_space<vmem>>, vector<1x1x8x8x128xf32>,
    %c0_i32_57 = arith.constant 0 : i32
    %51 = arith.cmpi sgt, %arg1, %c0_i32_57 : i32
    %52 = arith.extui %51 : i1 to i32
    %c0_i32_58 = arith.constant 0 : i32
    %53 = arith.cmpi ne, %52, %c0_i32_58 : i32
    scf.if %53 {
      %c1_i32_370 = arith.constant 1 : i32
      %531 = arith.subi %0, %c1_i32_370 : i32
      %c0_i32_371 = arith.constant 0 : i32
      %c0_i32_372 = arith.constant 0 : i32
      %c0_i32_373 = arith.constant 0 : i32
      %c0_i32_374 = arith.constant 0 : i32
      %c0_i32_375 = arith.constant 0 : i32
      %532 = tpu.memref_slice %arg3[%arg0, %531, %c0_i32_373, %c0_i32_374, %c0_i32_375] : memref<2x4x8x8x128xf32, #tpu.memory_space<any>> -> memref<1x1x8x8x128xf32, #tpu.memory_space<any>>
      %533 = tpu.memref_squeeze %532 : memref<1x1x8x8x128xf32, #tpu.memory_space<any>> -> memref<8x8x128xf32, #tpu.memory_space<any>>
      %c0_i32_376 = arith.constant 0 : i32
      %c0_i32_377 = arith.constant 0 : i32
      %c0_i32_378 = arith.constant 0 : i32
      %534 = tpu.memref_slice %arg12[%c0_i32_371, %c0_i32_376, %c0_i32_377, %c0_i32_378] : memref<2x8x8x128xf32, #tpu.memory_space<vmem>> -> memref<1x8x8x128xf32, #tpu.memory_space<vmem>>
      %535 = tpu.memref_squeeze %534 : memref<1x8x8x128xf32, #tpu.memory_space<vmem>> -> memref<8x8x128xf32, #tpu.memory_space<vmem>>
      %536 = tpu.memref_slice %arg13[%c0_i32_372] : memref<2x!tpu.dma_semaphore, #tpu.memory_space<semaphore_mem>> -> memref<1x!tpu.dma_semaphore, #tpu.memory_space<semaphore_mem>>
      %537 = tpu.memref_squeeze %536 : memref<1x!tpu.dma_semaphore, #tpu.memory_space<semaphore_mem>> -> memref<!tpu.dma_semaphore, #tpu.memory_space<semaphore_mem>>
      tpu.wait_dma2 semaphore(%537 : memref<!tpu.dma_semaphore, #tpu.memory_space<semaphore_mem>>) src(%533 : memref<8x8x128xf32, #tpu.memory_space<any>>) dst(%535 : memref<8x8x128xf32, #tpu.memory_space<vmem>>)
      %c0_379 = arith.constant 0 : index
      %c0_380 = arith.constant 0 : index
      %c0_381 = arith.constant 0 : index
      %c0_382 = arith.constant 0 : index
      %538 = vector.load %arg12[%c0_379, %c0_380, %c0_381, %c0_382] : memref<2x8x8x128xf32, #tpu.memory_space<vmem>>, vector<1x8x8x128xf32>
      %539 = vector.shape_cast %538 : vector<1x8x8x128xf32> to vector<8x8x128xf32>
      %540 = vector.shape_cast %539 : vector<8x8x128xf32> to vector<64x128xf32>
      %cst_383 = arith.constant dense<0.000000e+00> : vector<64x128xf32>
      %541 = tpu.matmul %540, %10, %cst_383 {dimension_numbers = #tpu.dot_dimension_numbers<[1], [0], [0], [1], [0, 0, 1, 1], [], []>} : vector<64x128xf32>, vector<128x128xf32>, vector<64x128xf32> -> vector<64x128xf32>
      %542 = vector.broadcast %11 : vector<1x128xf32> to vector<64x128xf32>
      %543 = arith.addf %541, %542 : vector<64x128xf32>
      %cst_384 = arith.constant 0.000000e+00 : f32
      %544 = vector.broadcast %cst_384 : f32 to vector<64x128xf32>
      %545 = arith.maximumf %543, %544 : vector<64x128xf32>
      %546 = vector.shape_cast %545 : vector<64x128xf32> to vector<8x8x128xf32>
      %547 = vector.shape_cast %546 : vector<8x8x128xf32> to vector<1x1x8x8x128xf32>
      %c1_385 = arith.constant 1 : index
      %c0_386 = arith.constant 0 : index
      %c1_387 = arith.constant 1 : index
      %c0_388 = arith.constant 0 : index
      %c0_389 = arith.constant 0 : index
      %548 = vector.load %arg11[%c1_385, %c0_386, %c1_387, %c0_388, %c0_389] : memref<3x4x10x8x128xf32, #tpu.memory_space<vmem>>, vector<1x1x8x8x128xf32>
      tpu.vector_store %arg11[%c1_385, %c0_386, %c1_387, %c0_388, %c0_389], %547 {strides = array<i32>} : memref<3x4x10x8x128xf32, #tpu.memory_space<vmem>>, vector<1x1x8x8x128xf32>,
      %549 = vector.extract_strided_slice %546 {offsets = [0, 0, 0], sizes = [8, 7, 128], strides = [1, 1, 1]} : vector<8x8x128xf32> to vector<8x7x128xf32>
      %550 = tpu.concatenate %12, %549 in 1 : vector<8x1x128xf32>, vector<8x7x128xf32> -> vector<8x8x128xf32>
      %551 = vector.shape_cast %550 : vector<8x8x128xf32> to vector<1x1x8x8x128xf32>
      %c0_390 = arith.constant 0 : index
      %c0_391 = arith.constant 0 : index
      %c1_392 = arith.constant 1 : index
      %c0_393 = arith.constant 0 : index
      %c0_394 = arith.constant 0 : index
      %552 = vector.load %arg11[%c0_390, %c0_391, %c1_392, %c0_393, %c0_394] : memref<3x4x10x8x128xf32, #tpu.memory_space<vmem>>, vector<1x1x8x8x128xf32>
      tpu.vector_store %arg11[%c0_390, %c0_391, %c1_392, %c0_393, %c0_394], %551 {strides = array<i32>} : memref<3x4x10x8x128xf32, #tpu.memory_space<vmem>>, vector<1x1x8x8x128xf32>,
      %553 = vector.extract_strided_slice %546 {offsets = [0, 1, 0], sizes = [8, 7, 128], strides = [1, 1, 1]} : vector<8x8x128xf32> to vector<8x7x128xf32>
      %554 = tpu.concatenate %553, %12 in 1 : vector<8x7x128xf32>, vector<8x1x128xf32> -> vector<8x8x128xf32>
      %555 = vector.shape_cast %554 : vector<8x8x128xf32> to vector<1x1x8x8x128xf32>
      %c2_395 = arith.constant 2 : index
      %c0_396 = arith.constant 0 : index
      %c1_397 = arith.constant 1 : index
      %c0_398 = arith.constant 0 : index
      %c0_399 = arith.constant 0 : index
      %556 = vector.load %arg11[%c2_395, %c0_396, %c1_397, %c0_398, %c0_399] : memref<3x4x10x8x128xf32, #tpu.memory_space<vmem>>, vector<1x1x8x8x128xf32>
      tpu.vector_store %arg11[%c2_395, %c0_396, %c1_397, %c0_398, %c0_399], %555 {strides = array<i32>} : memref<3x4x10x8x128xf32, #tpu.memory_space<vmem>>, vector<1x1x8x8x128xf32>,
    } else {
    }
    %c0_i32_59 = arith.constant 0 : i32
    %54 = arith.cmpi eq, %arg1, %c0_i32_59 : i32
    %55 = arith.extui %54 : i1 to i32
    %c0_i32_60 = arith.constant 0 : i32
    %56 = arith.cmpi ne, %55, %c0_i32_60 : i32
    scf.if %56 {
      %cst_370 = arith.constant 0.000000e+00 : f32
      %531 = vector.broadcast %cst_370 : f32 to vector<3x1x8x8x128xf32>
      %c0_371 = arith.constant 0 : index
      %c0_372 = arith.constant 0 : index
      %c1_373 = arith.constant 1 : index
      %c0_374 = arith.constant 0 : index
      %c0_375 = arith.constant 0 : index
      %532 = vector.load %arg11[%c0_371, %c0_372, %c1_373, %c0_374, %c0_375] : memref<3x4x10x8x128xf32, #tpu.memory_space<vmem>>, vector<3x1x8x8x128xf32>
      tpu.vector_store %arg11[%c0_371, %c0_372, %c1_373, %c0_374, %c0_375], %531 {strides = array<i32>} : memref<3x4x10x8x128xf32, #tpu.memory_space<vmem>>, vector<3x1x8x8x128xf32>,
    } else {
    }
    %c1_i32_61 = arith.constant 1 : i32
    %57 = arith.cmpi slt, %arg1, %c1_i32_61 : i32
    %58 = arith.extui %57 : i1 to i32
    %c0_i32_62 = arith.constant 0 : i32
    %59 = arith.cmpi ne, %58, %c0_i32_62 : i32
    scf.if %59 {
      %c2_i32_370 = arith.constant 2 : i32
      %531 = arith.addi %0, %c2_i32_370 : i32
      %c1_i32_371 = arith.constant 1 : i32
      %c1_i32_372 = arith.constant 1 : i32
      %c0_i32_373 = arith.constant 0 : i32
      %c0_i32_374 = arith.constant 0 : i32
      %c0_i32_375 = arith.constant 0 : i32
      %532 = tpu.memref_slice %arg3[%arg0, %531, %c0_i32_373, %c0_i32_374, %c0_i32_375] : memref<2x4x8x8x128xf32, #tpu.memory_space<any>> -> memref<1x1x8x8x128xf32, #tpu.memory_space<any>>
      %533 = tpu.memref_squeeze %532 : memref<1x1x8x8x128xf32, #tpu.memory_space<any>> -> memref<8x8x128xf32, #tpu.memory_space<any>>
      %c0_i32_376 = arith.constant 0 : i32
      %c0_i32_377 = arith.constant 0 : i32
      %c0_i32_378 = arith.constant 0 : i32
      %534 = tpu.memref_slice %arg12[%c1_i32_371, %c0_i32_376, %c0_i32_377, %c0_i32_378] : memref<2x8x8x128xf32, #tpu.memory_space<vmem>> -> memref<1x8x8x128xf32, #tpu.memory_space<vmem>>
      %535 = tpu.memref_squeeze %534 : memref<1x8x8x128xf32, #tpu.memory_space<vmem>> -> memref<8x8x128xf32, #tpu.memory_space<vmem>>
      %536 = tpu.memref_slice %arg13[%c1_i32_372] : memref<2x!tpu.dma_semaphore, #tpu.memory_space<semaphore_mem>> -> memref<1x!tpu.dma_semaphore, #tpu.memory_space<semaphore_mem>>
      %537 = tpu.memref_squeeze %536 : memref<1x!tpu.dma_semaphore, #tpu.memory_space<semaphore_mem>> -> memref<!tpu.dma_semaphore, #tpu.memory_space<semaphore_mem>>
      tpu.wait_dma2 semaphore(%537 : memref<!tpu.dma_semaphore, #tpu.memory_space<semaphore_mem>>) src(%533 : memref<8x8x128xf32, #tpu.memory_space<any>>) dst(%535 : memref<8x8x128xf32, #tpu.memory_space<vmem>>)
      %c1_379 = arith.constant 1 : index
      %c0_380 = arith.constant 0 : index
      %c0_381 = arith.constant 0 : index
      %c0_382 = arith.constant 0 : index
      %538 = vector.load %arg12[%c1_379, %c0_380, %c0_381, %c0_382] : memref<2x8x8x128xf32, #tpu.memory_space<vmem>>, vector<1x8x8x128xf32>
      %539 = vector.shape_cast %538 : vector<1x8x8x128xf32> to vector<8x8x128xf32>
      %540 = vector.shape_cast %539 : vector<8x8x128xf32> to vector<64x128xf32>
      %cst_383 = arith.constant dense<0.000000e+00> : vector<64x128xf32>
      %541 = tpu.matmul %540, %10, %cst_383 {dimension_numbers = #tpu.dot_dimension_numbers<[1], [0], [0], [1], [0, 0, 1, 1], [], []>} : vector<64x128xf32>, vector<128x128xf32>, vector<64x128xf32> -> vector<64x128xf32>
      %542 = vector.broadcast %11 : vector<1x128xf32> to vector<64x128xf32>
      %543 = arith.addf %541, %542 : vector<64x128xf32>
      %cst_384 = arith.constant 0.000000e+00 : f32
      %544 = vector.broadcast %cst_384 : f32 to vector<64x128xf32>
      %545 = arith.maximumf %543, %544 : vector<64x128xf32>
      %546 = vector.shape_cast %545 : vector<64x128xf32> to vector<8x8x128xf32>
      %547 = vector.shape_cast %546 : vector<8x8x128xf32> to vector<1x1x8x8x128xf32>
      %c1_385 = arith.constant 1 : index
      %c3_386 = arith.constant 3 : index
      %c1_387 = arith.constant 1 : index
      %c0_388 = arith.constant 0 : index
      %c0_389 = arith.constant 0 : index
      %548 = vector.load %arg11[%c1_385, %c3_386, %c1_387, %c0_388, %c0_389] : memref<3x4x10x8x128xf32, #tpu.memory_space<vmem>>, vector<1x1x8x8x128xf32>
      tpu.vector_store %arg11[%c1_385, %c3_386, %c1_387, %c0_388, %c0_389], %547 {strides = array<i32>} : memref<3x4x10x8x128xf32, #tpu.memory_space<vmem>>, vector<1x1x8x8x128xf32>,
      %549 = vector.extract_strided_slice %546 {offsets = [0, 0, 0], sizes = [8, 7, 128], strides = [1, 1, 1]} : vector<8x8x128xf32> to vector<8x7x128xf32>
      %550 = tpu.concatenate %12, %549 in 1 : vector<8x1x128xf32>, vector<8x7x128xf32> -> vector<8x8x128xf32>
      %551 = vector.shape_cast %550 : vector<8x8x128xf32> to vector<1x1x8x8x128xf32>
      %c0_390 = arith.constant 0 : index
      %c3_391 = arith.constant 3 : index
      %c1_392 = arith.constant 1 : index
      %c0_393 = arith.constant 0 : index
      %c0_394 = arith.constant 0 : index
      %552 = vector.load %arg11[%c0_390, %c3_391, %c1_392, %c0_393, %c0_394] : memref<3x4x10x8x128xf32, #tpu.memory_space<vmem>>, vector<1x1x8x8x128xf32>
      tpu.vector_store %arg11[%c0_390, %c3_391, %c1_392, %c0_393, %c0_394], %551 {strides = array<i32>} : memref<3x4x10x8x128xf32, #tpu.memory_space<vmem>>, vector<1x1x8x8x128xf32>,
      %553 = vector.extract_strided_slice %546 {offsets = [0, 1, 0], sizes = [8, 7, 128], strides = [1, 1, 1]} : vector<8x8x128xf32> to vector<8x7x128xf32>
      %554 = tpu.concatenate %553, %12 in 1 : vector<8x7x128xf32>, vector<8x1x128xf32> -> vector<8x8x128xf32>
      %555 = vector.shape_cast %554 : vector<8x8x128xf32> to vector<1x1x8x8x128xf32>
      %c2_395 = arith.constant 2 : index
      %c3_396 = arith.constant 3 : index
      %c1_397 = arith.constant 1 : index
      %c0_398 = arith.constant 0 : index
      %c0_399 = arith.constant 0 : index
      %556 = vector.load %arg11[%c2_395, %c3_396, %c1_397, %c0_398, %c0_399] : memref<3x4x10x8x128xf32, #tpu.memory_space<vmem>>, vector<1x1x8x8x128xf32>
      tpu.vector_store %arg11[%c2_395, %c3_396, %c1_397, %c0_398, %c0_399], %555 {strides = array<i32>} : memref<3x4x10x8x128xf32, #tpu.memory_space<vmem>>, vector<1x1x8x8x128xf32>,
    } else {
    }
    %c1_i32_63 = arith.constant 1 : i32
    %60 = arith.cmpi eq, %arg1, %c1_i32_63 : i32
    %61 = arith.extui %60 : i1 to i32
    %c0_i32_64 = arith.constant 0 : i32
    %62 = arith.cmpi ne, %61, %c0_i32_64 : i32
    scf.if %62 {
      %cst_370 = arith.constant 0.000000e+00 : f32
      %531 = vector.broadcast %cst_370 : f32 to vector<3x1x8x8x128xf32>
      %c0_371 = arith.constant 0 : index
      %c3_372 = arith.constant 3 : index
      %c1_373 = arith.constant 1 : index
      %c0_374 = arith.constant 0 : index
      %c0_375 = arith.constant 0 : index
      %532 = vector.load %arg11[%c0_371, %c3_372, %c1_373, %c0_374, %c0_375] : memref<3x4x10x8x128xf32, #tpu.memory_space<vmem>>, vector<3x1x8x8x128xf32>
      tpu.vector_store %arg11[%c0_371, %c3_372, %c1_373, %c0_374, %c0_375], %531 {strides = array<i32>} : memref<3x4x10x8x128xf32, #tpu.memory_space<vmem>>, vector<3x1x8x8x128xf32>,
    } else {
    }
    %c0_65 = arith.constant 0 : index
    %c0_66 = arith.constant 0 : index
    %c0_67 = arith.constant 0 : index
    %c0_68 = arith.constant 0 : index
    %63 = vector.load %arg6[%c0_65, %c0_66, %c0_67, %c0_68] : memref<3x3x3x128xf32, #tpu.memory_space<vmem>>, vector<3x3x3x128xf32>
    %c0_69 = arith.constant 0 : index
    %c0_70 = arith.constant 0 : index
    %64 = vector.load %arg7[%c0_69, %c0_70] : memref<1x128xf32, #tpu.memory_space<vmem>>, vector<1x128xf32>
    %c0_71 = arith.constant 0 : index
    %c0_72 = arith.constant 0 : index
    %65 = vector.load %arg8[%c0_71, %c0_72] : memref<128x128xf32, #tpu.memory_space<vmem>>, vector<128x128xf32>
    %c0_73 = arith.constant 0 : index
    %c0_74 = arith.constant 0 : index
    %66 = vector.load %arg9[%c0_73, %c0_74] : memref<1x128xf32, #tpu.memory_space<vmem>>, vector<1x128xf32>
    %c1_75 = arith.constant 1 : index
    %c1_76 = arith.constant 1 : index
    %c1_77 = arith.constant 1 : index
    %c0_78 = arith.constant 0 : index
    %c0_79 = arith.constant 0 : index
    %67 = vector.load %arg11[%c1_75, %c1_76, %c1_77, %c0_78, %c0_79] : memref<3x4x10x8x128xf32, #tpu.memory_space<vmem>>, vector<1x1x8x8x128xf32>
    %68 = vector.shape_cast %67 : vector<1x1x8x8x128xf32> to vector<8x8x128xf32>
    %69 = vector.extract_strided_slice %63 {offsets = [1, 1, 1, 0], sizes = [1, 1, 1, 128], strides = [1, 1, 1, 1]} : vector<3x3x3x128xf32> to vector<1x1x1x128xf32>
    %70 = vector.shape_cast %69 : vector<1x1x1x128xf32> to vector<128xf32>
    %71 = vector.shape_cast %70 : vector<128xf32> to vector<1x1x128xf32>
    %72 = vector.broadcast %71 : vector<1x1x128xf32> to vector<8x8x128xf32>
    %73 = arith.mulf %68, %72 : vector<8x8x128xf32>
    %c0_80 = arith.constant 0 : index
    %c0_81 = arith.constant 0 : index
    %c0_82 = arith.constant 0 : index
    %c0_83 = arith.constant 0 : index
    %c0_84 = arith.constant 0 : index
    %74 = vector.load %arg11[%c0_80, %c0_81, %c0_82, %c0_83, %c0_84] : memref<3x4x10x8x128xf32, #tpu.memory_space<vmem>>, vector<1x1x8x8x128xf32>
    %75 = vector.shape_cast %74 : vector<1x1x8x8x128xf32> to vector<8x8x128xf32>
    %76 = vector.extract_strided_slice %63 {offsets = [0, 0, 0, 0], sizes = [1, 1, 1, 128], strides = [1, 1, 1, 1]} : vector<3x3x3x128xf32> to vector<1x1x1x128xf32>
    %77 = vector.shape_cast %76 : vector<1x1x1x128xf32> to vector<128xf32>
    %78 = vector.shape_cast %77 : vector<128xf32> to vector<1x1x128xf32>
    %79 = vector.broadcast %78 : vector<1x1x128xf32> to vector<8x8x128xf32>
    %80 = arith.mulf %75, %79 : vector<8x8x128xf32>
    %81 = arith.addf %73, %80 : vector<8x8x128xf32>
    %c1_85 = arith.constant 1 : index
    %c0_86 = arith.constant 0 : index
    %c0_87 = arith.constant 0 : index
    %c0_88 = arith.constant 0 : index
    %c0_89 = arith.constant 0 : index
    %82 = vector.load %arg11[%c1_85, %c0_86, %c0_87, %c0_88, %c0_89] : memref<3x4x10x8x128xf32, #tpu.memory_space<vmem>>, vector<1x1x8x8x128xf32>
    %83 = vector.shape_cast %82 : vector<1x1x8x8x128xf32> to vector<8x8x128xf32>
    %84 = vector.extract_strided_slice %63 {offsets = [0, 0, 1, 0], sizes = [1, 1, 1, 128], strides = [1, 1, 1, 1]} : vector<3x3x3x128xf32> to vector<1x1x1x128xf32>
    %85 = vector.shape_cast %84 : vector<1x1x1x128xf32> to vector<128xf32>
    %86 = vector.shape_cast %85 : vector<128xf32> to vector<1x1x128xf32>
    %87 = vector.broadcast %86 : vector<1x1x128xf32> to vector<8x8x128xf32>
    %88 = arith.mulf %83, %87 : vector<8x8x128xf32>
    %89 = arith.addf %81, %88 : vector<8x8x128xf32>
    %c2_90 = arith.constant 2 : index
    %c0_91 = arith.constant 0 : index
    %c0_92 = arith.constant 0 : index
    %c0_93 = arith.constant 0 : index
    %c0_94 = arith.constant 0 : index
    %90 = vector.load %arg11[%c2_90, %c0_91, %c0_92, %c0_93, %c0_94] : memref<3x4x10x8x128xf32, #tpu.memory_space<vmem>>, vector<1x1x8x8x128xf32>
    %91 = vector.shape_cast %90 : vector<1x1x8x8x128xf32> to vector<8x8x128xf32>
    %92 = vector.extract_strided_slice %63 {offsets = [0, 0, 2, 0], sizes = [1, 1, 1, 128], strides = [1, 1, 1, 1]} : vector<3x3x3x128xf32> to vector<1x1x1x128xf32>
    %93 = vector.shape_cast %92 : vector<1x1x1x128xf32> to vector<128xf32>
    %94 = vector.shape_cast %93 : vector<128xf32> to vector<1x1x128xf32>
    %95 = vector.broadcast %94 : vector<1x1x128xf32> to vector<8x8x128xf32>
    %96 = arith.mulf %91, %95 : vector<8x8x128xf32>
    %97 = arith.addf %89, %96 : vector<8x8x128xf32>
    %c0_95 = arith.constant 0 : index
    %c0_96 = arith.constant 0 : index
    %c1_97 = arith.constant 1 : index
    %c0_98 = arith.constant 0 : index
    %c0_99 = arith.constant 0 : index
    %98 = vector.load %arg11[%c0_95, %c0_96, %c1_97, %c0_98, %c0_99] : memref<3x4x10x8x128xf32, #tpu.memory_space<vmem>>, vector<1x1x8x8x128xf32>
    %99 = vector.shape_cast %98 : vector<1x1x8x8x128xf32> to vector<8x8x128xf32>
    %100 = vector.extract_strided_slice %63 {offsets = [0, 1, 0, 0], sizes = [1, 1, 1, 128], strides = [1, 1, 1, 1]} : vector<3x3x3x128xf32> to vector<1x1x1x128xf32>
    %101 = vector.shape_cast %100 : vector<1x1x1x128xf32> to vector<128xf32>
    %102 = vector.shape_cast %101 : vector<128xf32> to vector<1x1x128xf32>
    %103 = vector.broadcast %102 : vector<1x1x128xf32> to vector<8x8x128xf32>
    %104 = arith.mulf %99, %103 : vector<8x8x128xf32>
    %105 = arith.addf %97, %104 : vector<8x8x128xf32>
    %c1_100 = arith.constant 1 : index
    %c0_101 = arith.constant 0 : index
    %c1_102 = arith.constant 1 : index
    %c0_103 = arith.constant 0 : index
    %c0_104 = arith.constant 0 : index
    %106 = vector.load %arg11[%c1_100, %c0_101, %c1_102, %c0_103, %c0_104] : memref<3x4x10x8x128xf32, #tpu.memory_space<vmem>>, vector<1x1x8x8x128xf32>
    %107 = vector.shape_cast %106 : vector<1x1x8x8x128xf32> to vector<8x8x128xf32>
    %108 = vector.extract_strided_slice %63 {offsets = [0, 1, 1, 0], sizes = [1, 1, 1, 128], strides = [1, 1, 1, 1]} : vector<3x3x3x128xf32> to vector<1x1x1x128xf32>
    %109 = vector.shape_cast %108 : vector<1x1x1x128xf32> to vector<128xf32>
    %110 = vector.shape_cast %109 : vector<128xf32> to vector<1x1x128xf32>
    %111 = vector.broadcast %110 : vector<1x1x128xf32> to vector<8x8x128xf32>
    %112 = arith.mulf %107, %111 : vector<8x8x128xf32>
    %113 = arith.addf %105, %112 : vector<8x8x128xf32>
    %c2_105 = arith.constant 2 : index
    %c0_106 = arith.constant 0 : index
    %c1_107 = arith.constant 1 : index
    %c0_108 = arith.constant 0 : index
    %c0_109 = arith.constant 0 : index
    %114 = vector.load %arg11[%c2_105, %c0_106, %c1_107, %c0_108, %c0_109] : memref<3x4x10x8x128xf32, #tpu.memory_space<vmem>>, vector<1x1x8x8x128xf32>
    %115 = vector.shape_cast %114 : vector<1x1x8x8x128xf32> to vector<8x8x128xf32>
    %116 = vector.extract_strided_slice %63 {offsets = [0, 1, 2, 0], sizes = [1, 1, 1, 128], strides = [1, 1, 1, 1]} : vector<3x3x3x128xf32> to vector<1x1x1x128xf32>
    %117 = vector.shape_cast %116 : vector<1x1x1x128xf32> to vector<128xf32>
    %118 = vector.shape_cast %117 : vector<128xf32> to vector<1x1x128xf32>
    %119 = vector.broadcast %118 : vector<1x1x128xf32> to vector<8x8x128xf32>
    %120 = arith.mulf %115, %119 : vector<8x8x128xf32>
    %121 = arith.addf %113, %120 : vector<8x8x128xf32>
    %c0_110 = arith.constant 0 : index
    %c0_111 = arith.constant 0 : index
    %c2_112 = arith.constant 2 : index
    %c0_113 = arith.constant 0 : index
    %c0_114 = arith.constant 0 : index
    %122 = vector.load %arg11[%c0_110, %c0_111, %c2_112, %c0_113, %c0_114] : memref<3x4x10x8x128xf32, #tpu.memory_space<vmem>>, vector<1x1x8x8x128xf32>
    %123 = vector.shape_cast %122 : vector<1x1x8x8x128xf32> to vector<8x8x128xf32>
    %124 = vector.extract_strided_slice %63 {offsets = [0, 2, 0, 0], sizes = [1, 1, 1, 128], strides = [1, 1, 1, 1]} : vector<3x3x3x128xf32> to vector<1x1x1x128xf32>
    %125 = vector.shape_cast %124 : vector<1x1x1x128xf32> to vector<128xf32>
    %126 = vector.shape_cast %125 : vector<128xf32> to vector<1x1x128xf32>
    %127 = vector.broadcast %126 : vector<1x1x128xf32> to vector<8x8x128xf32>
    %128 = arith.mulf %123, %127 : vector<8x8x128xf32>
    %129 = arith.addf %121, %128 : vector<8x8x128xf32>
    %c1_115 = arith.constant 1 : index
    %c0_116 = arith.constant 0 : index
    %c2_117 = arith.constant 2 : index
    %c0_118 = arith.constant 0 : index
    %c0_119 = arith.constant 0 : index
    %130 = vector.load %arg11[%c1_115, %c0_116, %c2_117, %c0_118, %c0_119] : memref<3x4x10x8x128xf32, #tpu.memory_space<vmem>>, vector<1x1x8x8x128xf32>
    %131 = vector.shape_cast %130 : vector<1x1x8x8x128xf32> to vector<8x8x128xf32>
    %132 = vector.extract_strided_slice %63 {offsets = [0, 2, 1, 0], sizes = [1, 1, 1, 128], strides = [1, 1, 1, 1]} : vector<3x3x3x128xf32> to vector<1x1x1x128xf32>
    %133 = vector.shape_cast %132 : vector<1x1x1x128xf32> to vector<128xf32>
    %134 = vector.shape_cast %133 : vector<128xf32> to vector<1x1x128xf32>
    %135 = vector.broadcast %134 : vector<1x1x128xf32> to vector<8x8x128xf32>
    %136 = arith.mulf %131, %135 : vector<8x8x128xf32>
    %137 = arith.addf %129, %136 : vector<8x8x128xf32>
    %c2_120 = arith.constant 2 : index
    %c0_121 = arith.constant 0 : index
    %c2_122 = arith.constant 2 : index
    %c0_123 = arith.constant 0 : index
    %c0_124 = arith.constant 0 : index
    %138 = vector.load %arg11[%c2_120, %c0_121, %c2_122, %c0_123, %c0_124] : memref<3x4x10x8x128xf32, #tpu.memory_space<vmem>>, vector<1x1x8x8x128xf32>
    %139 = vector.shape_cast %138 : vector<1x1x8x8x128xf32> to vector<8x8x128xf32>
    %140 = vector.extract_strided_slice %63 {offsets = [0, 2, 2, 0], sizes = [1, 1, 1, 128], strides = [1, 1, 1, 1]} : vector<3x3x3x128xf32> to vector<1x1x1x128xf32>
    %141 = vector.shape_cast %140 : vector<1x1x1x128xf32> to vector<128xf32>
    %142 = vector.shape_cast %141 : vector<128xf32> to vector<1x1x128xf32>
    %143 = vector.broadcast %142 : vector<1x1x128xf32> to vector<8x8x128xf32>
    %144 = arith.mulf %139, %143 : vector<8x8x128xf32>
    %145 = arith.addf %137, %144 : vector<8x8x128xf32>
    %c0_125 = arith.constant 0 : index
    %c1_126 = arith.constant 1 : index
    %c0_127 = arith.constant 0 : index
    %c0_128 = arith.constant 0 : index
    %c0_129 = arith.constant 0 : index
    %146 = vector.load %arg11[%c0_125, %c1_126, %c0_127, %c0_128, %c0_129] : memref<3x4x10x8x128xf32, #tpu.memory_space<vmem>>, vector<1x1x8x8x128xf32>
    %147 = vector.shape_cast %146 : vector<1x1x8x8x128xf32> to vector<8x8x128xf32>
    %148 = vector.extract_strided_slice %63 {offsets = [1, 0, 0, 0], sizes = [1, 1, 1, 128], strides = [1, 1, 1, 1]} : vector<3x3x3x128xf32> to vector<1x1x1x128xf32>
    %149 = vector.shape_cast %148 : vector<1x1x1x128xf32> to vector<128xf32>
    %150 = vector.shape_cast %149 : vector<128xf32> to vector<1x1x128xf32>
    %151 = vector.broadcast %150 : vector<1x1x128xf32> to vector<8x8x128xf32>
    %152 = arith.mulf %147, %151 : vector<8x8x128xf32>
    %153 = arith.addf %145, %152 : vector<8x8x128xf32>
    %c1_130 = arith.constant 1 : index
    %c1_131 = arith.constant 1 : index
    %c0_132 = arith.constant 0 : index
    %c0_133 = arith.constant 0 : index
    %c0_134 = arith.constant 0 : index
    %154 = vector.load %arg11[%c1_130, %c1_131, %c0_132, %c0_133, %c0_134] : memref<3x4x10x8x128xf32, #tpu.memory_space<vmem>>, vector<1x1x8x8x128xf32>
    %155 = vector.shape_cast %154 : vector<1x1x8x8x128xf32> to vector<8x8x128xf32>
    %156 = vector.extract_strided_slice %63 {offsets = [1, 0, 1, 0], sizes = [1, 1, 1, 128], strides = [1, 1, 1, 1]} : vector<3x3x3x128xf32> to vector<1x1x1x128xf32>
    %157 = vector.shape_cast %156 : vector<1x1x1x128xf32> to vector<128xf32>
    %158 = vector.shape_cast %157 : vector<128xf32> to vector<1x1x128xf32>
    %159 = vector.broadcast %158 : vector<1x1x128xf32> to vector<8x8x128xf32>
    %160 = arith.mulf %155, %159 : vector<8x8x128xf32>
    %161 = arith.addf %153, %160 : vector<8x8x128xf32>
    %c2_135 = arith.constant 2 : index
    %c1_136 = arith.constant 1 : index
    %c0_137 = arith.constant 0 : index
    %c0_138 = arith.constant 0 : index
    %c0_139 = arith.constant 0 : index
    %162 = vector.load %arg11[%c2_135, %c1_136, %c0_137, %c0_138, %c0_139] : memref<3x4x10x8x128xf32, #tpu.memory_space<vmem>>, vector<1x1x8x8x128xf32>
    %163 = vector.shape_cast %162 : vector<1x1x8x8x128xf32> to vector<8x8x128xf32>
    %164 = vector.extract_strided_slice %63 {offsets = [1, 0, 2, 0], sizes = [1, 1, 1, 128], strides = [1, 1, 1, 1]} : vector<3x3x3x128xf32> to vector<1x1x1x128xf32>
    %165 = vector.shape_cast %164 : vector<1x1x1x128xf32> to vector<128xf32>
    %166 = vector.shape_cast %165 : vector<128xf32> to vector<1x1x128xf32>
    %167 = vector.broadcast %166 : vector<1x1x128xf32> to vector<8x8x128xf32>
    %168 = arith.mulf %163, %167 : vector<8x8x128xf32>
    %169 = arith.addf %161, %168 : vector<8x8x128xf32>
    %c0_140 = arith.constant 0 : index
    %c1_141 = arith.constant 1 : index
    %c1_142 = arith.constant 1 : index
    %c0_143 = arith.constant 0 : index
    %c0_144 = arith.constant 0 : index
    %170 = vector.load %arg11[%c0_140, %c1_141, %c1_142, %c0_143, %c0_144] : memref<3x4x10x8x128xf32, #tpu.memory_space<vmem>>, vector<1x1x8x8x128xf32>
    %171 = vector.shape_cast %170 : vector<1x1x8x8x128xf32> to vector<8x8x128xf32>
    %172 = vector.extract_strided_slice %63 {offsets = [1, 1, 0, 0], sizes = [1, 1, 1, 128], strides = [1, 1, 1, 1]} : vector<3x3x3x128xf32> to vector<1x1x1x128xf32>
    %173 = vector.shape_cast %172 : vector<1x1x1x128xf32> to vector<128xf32>
    %174 = vector.shape_cast %173 : vector<128xf32> to vector<1x1x128xf32>
    %175 = vector.broadcast %174 : vector<1x1x128xf32> to vector<8x8x128xf32>
    %176 = arith.mulf %171, %175 : vector<8x8x128xf32>
    %177 = arith.addf %169, %176 : vector<8x8x128xf32>
    %c2_145 = arith.constant 2 : index
    %c1_146 = arith.constant 1 : index
    %c1_147 = arith.constant 1 : index
    %c0_148 = arith.constant 0 : index
    %c0_149 = arith.constant 0 : index
    %178 = vector.load %arg11[%c2_145, %c1_146, %c1_147, %c0_148, %c0_149] : memref<3x4x10x8x128xf32, #tpu.memory_space<vmem>>, vector<1x1x8x8x128xf32>
    %179 = vector.shape_cast %178 : vector<1x1x8x8x128xf32> to vector<8x8x128xf32>
    %180 = vector.extract_strided_slice %63 {offsets = [1, 1, 2, 0], sizes = [1, 1, 1, 128], strides = [1, 1, 1, 1]} : vector<3x3x3x128xf32> to vector<1x1x1x128xf32>
    %181 = vector.shape_cast %180 : vector<1x1x1x128xf32> to vector<128xf32>
    %182 = vector.shape_cast %181 : vector<128xf32> to vector<1x1x128xf32>
    %183 = vector.broadcast %182 : vector<1x1x128xf32> to vector<8x8x128xf32>
    %184 = arith.mulf %179, %183 : vector<8x8x128xf32>
    %185 = arith.addf %177, %184 : vector<8x8x128xf32>
    %c0_150 = arith.constant 0 : index
    %c1_151 = arith.constant 1 : index
    %c2_152 = arith.constant 2 : index
    %c0_153 = arith.constant 0 : index
    %c0_154 = arith.constant 0 : index
    %186 = vector.load %arg11[%c0_150, %c1_151, %c2_152, %c0_153, %c0_154] : memref<3x4x10x8x128xf32, #tpu.memory_space<vmem>>, vector<1x1x8x8x128xf32>
    %187 = vector.shape_cast %186 : vector<1x1x8x8x128xf32> to vector<8x8x128xf32>
    %188 = vector.extract_strided_slice %63 {offsets = [1, 2, 0, 0], sizes = [1, 1, 1, 128], strides = [1, 1, 1, 1]} : vector<3x3x3x128xf32> to vector<1x1x1x128xf32>
    %189 = vector.shape_cast %188 : vector<1x1x1x128xf32> to vector<128xf32>
    %190 = vector.shape_cast %189 : vector<128xf32> to vector<1x1x128xf32>
    %191 = vector.broadcast %190 : vector<1x1x128xf32> to vector<8x8x128xf32>
    %192 = arith.mulf %187, %191 : vector<8x8x128xf32>
    %193 = arith.addf %185, %192 : vector<8x8x128xf32>
    %c1_155 = arith.constant 1 : index
    %c1_156 = arith.constant 1 : index
    %c2_157 = arith.constant 2 : index
    %c0_158 = arith.constant 0 : index
    %c0_159 = arith.constant 0 : index
    %194 = vector.load %arg11[%c1_155, %c1_156, %c2_157, %c0_158, %c0_159] : memref<3x4x10x8x128xf32, #tpu.memory_space<vmem>>, vector<1x1x8x8x128xf32>
    %195 = vector.shape_cast %194 : vector<1x1x8x8x128xf32> to vector<8x8x128xf32>
    %196 = vector.extract_strided_slice %63 {offsets = [1, 2, 1, 0], sizes = [1, 1, 1, 128], strides = [1, 1, 1, 1]} : vector<3x3x3x128xf32> to vector<1x1x1x128xf32>
    %197 = vector.shape_cast %196 : vector<1x1x1x128xf32> to vector<128xf32>
    %198 = vector.shape_cast %197 : vector<128xf32> to vector<1x1x128xf32>
    %199 = vector.broadcast %198 : vector<1x1x128xf32> to vector<8x8x128xf32>
    %200 = arith.mulf %195, %199 : vector<8x8x128xf32>
    %201 = arith.addf %193, %200 : vector<8x8x128xf32>
    %c2_160 = arith.constant 2 : index
    %c1_161 = arith.constant 1 : index
    %c2_162 = arith.constant 2 : index
    %c0_163 = arith.constant 0 : index
    %c0_164 = arith.constant 0 : index
    %202 = vector.load %arg11[%c2_160, %c1_161, %c2_162, %c0_163, %c0_164] : memref<3x4x10x8x128xf32, #tpu.memory_space<vmem>>, vector<1x1x8x8x128xf32>
    %203 = vector.shape_cast %202 : vector<1x1x8x8x128xf32> to vector<8x8x128xf32>
    %204 = vector.extract_strided_slice %63 {offsets = [1, 2, 2, 0], sizes = [1, 1, 1, 128], strides = [1, 1, 1, 1]} : vector<3x3x3x128xf32> to vector<1x1x1x128xf32>
    %205 = vector.shape_cast %204 : vector<1x1x1x128xf32> to vector<128xf32>
    %206 = vector.shape_cast %205 : vector<128xf32> to vector<1x1x128xf32>
    %207 = vector.broadcast %206 : vector<1x1x128xf32> to vector<8x8x128xf32>
    %208 = arith.mulf %203, %207 : vector<8x8x128xf32>
    %209 = arith.addf %201, %208 : vector<8x8x128xf32>
    %c0_165 = arith.constant 0 : index
    %c2_166 = arith.constant 2 : index
    %c0_167 = arith.constant 0 : index
    %c0_168 = arith.constant 0 : index
    %c0_169 = arith.constant 0 : index
    %210 = vector.load %arg11[%c0_165, %c2_166, %c0_167, %c0_168, %c0_169] : memref<3x4x10x8x128xf32, #tpu.memory_space<vmem>>, vector<1x1x8x8x128xf32>
    %211 = vector.shape_cast %210 : vector<1x1x8x8x128xf32> to vector<8x8x128xf32>
    %212 = vector.extract_strided_slice %63 {offsets = [2, 0, 0, 0], sizes = [1, 1, 1, 128], strides = [1, 1, 1, 1]} : vector<3x3x3x128xf32> to vector<1x1x1x128xf32>
    %213 = vector.shape_cast %212 : vector<1x1x1x128xf32> to vector<128xf32>
    %214 = vector.shape_cast %213 : vector<128xf32> to vector<1x1x128xf32>
    %215 = vector.broadcast %214 : vector<1x1x128xf32> to vector<8x8x128xf32>
    %216 = arith.mulf %211, %215 : vector<8x8x128xf32>
    %217 = arith.addf %209, %216 : vector<8x8x128xf32>
    %c1_170 = arith.constant 1 : index
    %c2_171 = arith.constant 2 : index
    %c0_172 = arith.constant 0 : index
    %c0_173 = arith.constant 0 : index
    %c0_174 = arith.constant 0 : index
    %218 = vector.load %arg11[%c1_170, %c2_171, %c0_172, %c0_173, %c0_174] : memref<3x4x10x8x128xf32, #tpu.memory_space<vmem>>, vector<1x1x8x8x128xf32>
    %219 = vector.shape_cast %218 : vector<1x1x8x8x128xf32> to vector<8x8x128xf32>
    %220 = vector.extract_strided_slice %63 {offsets = [2, 0, 1, 0], sizes = [1, 1, 1, 128], strides = [1, 1, 1, 1]} : vector<3x3x3x128xf32> to vector<1x1x1x128xf32>
    %221 = vector.shape_cast %220 : vector<1x1x1x128xf32> to vector<128xf32>
    %222 = vector.shape_cast %221 : vector<128xf32> to vector<1x1x128xf32>
    %223 = vector.broadcast %222 : vector<1x1x128xf32> to vector<8x8x128xf32>
    %224 = arith.mulf %219, %223 : vector<8x8x128xf32>
    %225 = arith.addf %217, %224 : vector<8x8x128xf32>
    %c2_175 = arith.constant 2 : index
    %c2_176 = arith.constant 2 : index
    %c0_177 = arith.constant 0 : index
    %c0_178 = arith.constant 0 : index
    %c0_179 = arith.constant 0 : index
    %226 = vector.load %arg11[%c2_175, %c2_176, %c0_177, %c0_178, %c0_179] : memref<3x4x10x8x128xf32, #tpu.memory_space<vmem>>, vector<1x1x8x8x128xf32>
    %227 = vector.shape_cast %226 : vector<1x1x8x8x128xf32> to vector<8x8x128xf32>
    %228 = vector.extract_strided_slice %63 {offsets = [2, 0, 2, 0], sizes = [1, 1, 1, 128], strides = [1, 1, 1, 1]} : vector<3x3x3x128xf32> to vector<1x1x1x128xf32>
    %229 = vector.shape_cast %228 : vector<1x1x1x128xf32> to vector<128xf32>
    %230 = vector.shape_cast %229 : vector<128xf32> to vector<1x1x128xf32>
    %231 = vector.broadcast %230 : vector<1x1x128xf32> to vector<8x8x128xf32>
    %232 = arith.mulf %227, %231 : vector<8x8x128xf32>
    %233 = arith.addf %225, %232 : vector<8x8x128xf32>
    %c0_180 = arith.constant 0 : index
    %c2_181 = arith.constant 2 : index
    %c1_182 = arith.constant 1 : index
    %c0_183 = arith.constant 0 : index
    %c0_184 = arith.constant 0 : index
    %234 = vector.load %arg11[%c0_180, %c2_181, %c1_182, %c0_183, %c0_184] : memref<3x4x10x8x128xf32, #tpu.memory_space<vmem>>, vector<1x1x8x8x128xf32>
    %235 = vector.shape_cast %234 : vector<1x1x8x8x128xf32> to vector<8x8x128xf32>
    %236 = vector.extract_strided_slice %63 {offsets = [2, 1, 0, 0], sizes = [1, 1, 1, 128], strides = [1, 1, 1, 1]} : vector<3x3x3x128xf32> to vector<1x1x1x128xf32>
    %237 = vector.shape_cast %236 : vector<1x1x1x128xf32> to vector<128xf32>
    %238 = vector.shape_cast %237 : vector<128xf32> to vector<1x1x128xf32>
    %239 = vector.broadcast %238 : vector<1x1x128xf32> to vector<8x8x128xf32>
    %240 = arith.mulf %235, %239 : vector<8x8x128xf32>
    %241 = arith.addf %233, %240 : vector<8x8x128xf32>
    %c1_185 = arith.constant 1 : index
    %c2_186 = arith.constant 2 : index
    %c1_187 = arith.constant 1 : index
    %c0_188 = arith.constant 0 : index
    %c0_189 = arith.constant 0 : index
    %242 = vector.load %arg11[%c1_185, %c2_186, %c1_187, %c0_188, %c0_189] : memref<3x4x10x8x128xf32, #tpu.memory_space<vmem>>, vector<1x1x8x8x128xf32>
    %243 = vector.shape_cast %242 : vector<1x1x8x8x128xf32> to vector<8x8x128xf32>
    %244 = vector.extract_strided_slice %63 {offsets = [2, 1, 1, 0], sizes = [1, 1, 1, 128], strides = [1, 1, 1, 1]} : vector<3x3x3x128xf32> to vector<1x1x1x128xf32>
    %245 = vector.shape_cast %244 : vector<1x1x1x128xf32> to vector<128xf32>
    %246 = vector.shape_cast %245 : vector<128xf32> to vector<1x1x128xf32>
    %247 = vector.broadcast %246 : vector<1x1x128xf32> to vector<8x8x128xf32>
    %248 = arith.mulf %243, %247 : vector<8x8x128xf32>
    %249 = arith.addf %241, %248 : vector<8x8x128xf32>
    %c2_190 = arith.constant 2 : index
    %c2_191 = arith.constant 2 : index
    %c1_192 = arith.constant 1 : index
    %c0_193 = arith.constant 0 : index
    %c0_194 = arith.constant 0 : index
    %250 = vector.load %arg11[%c2_190, %c2_191, %c1_192, %c0_193, %c0_194] : memref<3x4x10x8x128xf32, #tpu.memory_space<vmem>>, vector<1x1x8x8x128xf32>
    %251 = vector.shape_cast %250 : vector<1x1x8x8x128xf32> to vector<8x8x128xf32>
    %252 = vector.extract_strided_slice %63 {offsets = [2, 1, 2, 0], sizes = [1, 1, 1, 128], strides = [1, 1, 1, 1]} : vector<3x3x3x128xf32> to vector<1x1x1x128xf32>
    %253 = vector.shape_cast %252 : vector<1x1x1x128xf32> to vector<128xf32>
    %254 = vector.shape_cast %253 : vector<128xf32> to vector<1x1x128xf32>
    %255 = vector.broadcast %254 : vector<1x1x128xf32> to vector<8x8x128xf32>
    %256 = arith.mulf %251, %255 : vector<8x8x128xf32>
    %257 = arith.addf %249, %256 : vector<8x8x128xf32>
    %c0_195 = arith.constant 0 : index
    %c2_196 = arith.constant 2 : index
    %c2_197 = arith.constant 2 : index
    %c0_198 = arith.constant 0 : index
    %c0_199 = arith.constant 0 : index
    %258 = vector.load %arg11[%c0_195, %c2_196, %c2_197, %c0_198, %c0_199] : memref<3x4x10x8x128xf32, #tpu.memory_space<vmem>>, vector<1x1x8x8x128xf32>
    %259 = vector.shape_cast %258 : vector<1x1x8x8x128xf32> to vector<8x8x128xf32>
    %260 = vector.extract_strided_slice %63 {offsets = [2, 2, 0, 0], sizes = [1, 1, 1, 128], strides = [1, 1, 1, 1]} : vector<3x3x3x128xf32> to vector<1x1x1x128xf32>
    %261 = vector.shape_cast %260 : vector<1x1x1x128xf32> to vector<128xf32>
    %262 = vector.shape_cast %261 : vector<128xf32> to vector<1x1x128xf32>
    %263 = vector.broadcast %262 : vector<1x1x128xf32> to vector<8x8x128xf32>
    %264 = arith.mulf %259, %263 : vector<8x8x128xf32>
    %265 = arith.addf %257, %264 : vector<8x8x128xf32>
    %c1_200 = arith.constant 1 : index
    %c2_201 = arith.constant 2 : index
    %c2_202 = arith.constant 2 : index
    %c0_203 = arith.constant 0 : index
    %c0_204 = arith.constant 0 : index
    %266 = vector.load %arg11[%c1_200, %c2_201, %c2_202, %c0_203, %c0_204] : memref<3x4x10x8x128xf32, #tpu.memory_space<vmem>>, vector<1x1x8x8x128xf32>
    %267 = vector.shape_cast %266 : vector<1x1x8x8x128xf32> to vector<8x8x128xf32>
    %268 = vector.extract_strided_slice %63 {offsets = [2, 2, 1, 0], sizes = [1, 1, 1, 128], strides = [1, 1, 1, 1]} : vector<3x3x3x128xf32> to vector<1x1x1x128xf32>
    %269 = vector.shape_cast %268 : vector<1x1x1x128xf32> to vector<128xf32>
    %270 = vector.shape_cast %269 : vector<128xf32> to vector<1x1x128xf32>
    %271 = vector.broadcast %270 : vector<1x1x128xf32> to vector<8x8x128xf32>
    %272 = arith.mulf %267, %271 : vector<8x8x128xf32>
    %273 = arith.addf %265, %272 : vector<8x8x128xf32>
    %c2_205 = arith.constant 2 : index
    %c2_206 = arith.constant 2 : index
    %c2_207 = arith.constant 2 : index
    %c0_208 = arith.constant 0 : index
    %c0_209 = arith.constant 0 : index
    %274 = vector.load %arg11[%c2_205, %c2_206, %c2_207, %c0_208, %c0_209] : memref<3x4x10x8x128xf32, #tpu.memory_space<vmem>>, vector<1x1x8x8x128xf32>
    %275 = vector.shape_cast %274 : vector<1x1x8x8x128xf32> to vector<8x8x128xf32>
    %276 = vector.extract_strided_slice %63 {offsets = [2, 2, 2, 0], sizes = [1, 1, 1, 128], strides = [1, 1, 1, 1]} : vector<3x3x3x128xf32> to vector<1x1x1x128xf32>
    %277 = vector.shape_cast %276 : vector<1x1x1x128xf32> to vector<128xf32>
    %278 = vector.shape_cast %277 : vector<128xf32> to vector<1x1x128xf32>
    %279 = vector.broadcast %278 : vector<1x1x128xf32> to vector<8x8x128xf32>
    %280 = arith.mulf %275, %279 : vector<8x8x128xf32>
    %281 = arith.addf %273, %280 : vector<8x8x128xf32>
    %282 = vector.shape_cast %64 : vector<1x128xf32> to vector<1x1x128xf32>
    %283 = vector.broadcast %282 : vector<1x1x128xf32> to vector<8x8x128xf32>
    %284 = arith.addf %281, %283 : vector<8x8x128xf32>
    %cst_210 = arith.constant 0.000000e+00 : f32
    %285 = vector.broadcast %cst_210 : f32 to vector<8x8x128xf32>
    %286 = arith.maximumf %284, %285 : vector<8x8x128xf32>
    %287 = vector.shape_cast %286 : vector<8x8x128xf32> to vector<64x128xf32>
    %cst_211 = arith.constant dense<0.000000e+00> : vector<64x128xf32>
    %288 = tpu.matmul %287, %65, %cst_211 {dimension_numbers = #tpu.dot_dimension_numbers<[1], [0], [0], [1], [0, 0, 1, 1], [], []>} : vector<64x128xf32>, vector<128x128xf32>, vector<64x128xf32> -> vector<64x128xf32>
    %c0_212 = arith.constant 0 : index
    %c0_213 = arith.constant 0 : index
    %c0_214 = arith.constant 0 : index
    %c0_215 = arith.constant 0 : index
    %c0_216 = arith.constant 0 : index
    %289 = vector.load %arg2[%c0_212, %c0_213, %c0_214, %c0_215, %c0_216] : memref<1x2x8x8x128xf32, #tpu.memory_space<vmem>>, vector<1x1x8x8x128xf32>
    %290 = vector.shape_cast %289 : vector<1x1x8x8x128xf32> to vector<8x8x128xf32>
    %291 = vector.shape_cast %290 : vector<8x8x128xf32> to vector<64x128xf32>
    %292 = vector.broadcast %66 : vector<1x128xf32> to vector<64x128xf32>
    %293 = arith.addf %288, %292 : vector<64x128xf32>
    %294 = arith.addf %293, %291 : vector<64x128xf32>
    %cst_217 = arith.constant 0.000000e+00 : f32
    %295 = vector.broadcast %cst_217 : f32 to vector<64x128xf32>
    %296 = arith.maximumf %294, %295 : vector<64x128xf32>
    %297 = vector.shape_cast %296 : vector<64x128xf32> to vector<1x1x8x8x128xf32>
    %c0_218 = arith.constant 0 : index
    %c0_219 = arith.constant 0 : index
    %c0_220 = arith.constant 0 : index
    %c0_221 = arith.constant 0 : index
    %c0_222 = arith.constant 0 : index
    %298 = vector.load %arg10[%c0_218, %c0_219, %c0_220, %c0_221, %c0_222] : memref<1x2x8x8x128xf32, #tpu.memory_space<vmem>>, vector<1x1x8x8x128xf32>
    tpu.vector_store %arg10[%c0_218, %c0_219, %c0_220, %c0_221, %c0_222], %297 {strides = array<i32>} : memref<1x2x8x8x128xf32, #tpu.memory_space<vmem>>, vector<1x1x8x8x128xf32>,
    %c1_223 = arith.constant 1 : index
    %c2_224 = arith.constant 2 : index
    %c1_225 = arith.constant 1 : index
    %c0_226 = arith.constant 0 : index
    %c0_227 = arith.constant 0 : index
    %299 = vector.load %arg11[%c1_223, %c2_224, %c1_225, %c0_226, %c0_227] : memref<3x4x10x8x128xf32, #tpu.memory_space<vmem>>, vector<1x1x8x8x128xf32>
    %300 = vector.shape_cast %299 : vector<1x1x8x8x128xf32> to vector<8x8x128xf32>
    %301 = vector.extract_strided_slice %63 {offsets = [1, 1, 1, 0], sizes = [1, 1, 1, 128], strides = [1, 1, 1, 1]} : vector<3x3x3x128xf32> to vector<1x1x1x128xf32>
    %302 = vector.shape_cast %301 : vector<1x1x1x128xf32> to vector<128xf32>
    %303 = vector.shape_cast %302 : vector<128xf32> to vector<1x1x128xf32>
    %304 = vector.broadcast %303 : vector<1x1x128xf32> to vector<8x8x128xf32>
    %305 = arith.mulf %300, %304 : vector<8x8x128xf32>
    %c0_228 = arith.constant 0 : index
    %c1_229 = arith.constant 1 : index
    %c0_230 = arith.constant 0 : index
    %c0_231 = arith.constant 0 : index
    %c0_232 = arith.constant 0 : index
    %306 = vector.load %arg11[%c0_228, %c1_229, %c0_230, %c0_231, %c0_232] : memref<3x4x10x8x128xf32, #tpu.memory_space<vmem>>, vector<1x1x8x8x128xf32>
    %307 = vector.shape_cast %306 : vector<1x1x8x8x128xf32> to vector<8x8x128xf32>
    %308 = vector.extract_strided_slice %63 {offsets = [0, 0, 0, 0], sizes = [1, 1, 1, 128], strides = [1, 1, 1, 1]} : vector<3x3x3x128xf32> to vector<1x1x1x128xf32>
    %309 = vector.shape_cast %308 : vector<1x1x1x128xf32> to vector<128xf32>
    %310 = vector.shape_cast %309 : vector<128xf32> to vector<1x1x128xf32>
    %311 = vector.broadcast %310 : vector<1x1x128xf32> to vector<8x8x128xf32>
    %312 = arith.mulf %307, %311 : vector<8x8x128xf32>
    %313 = arith.addf %305, %312 : vector<8x8x128xf32>
    %c1_233 = arith.constant 1 : index
    %c1_234 = arith.constant 1 : index
    %c0_235 = arith.constant 0 : index
    %c0_236 = arith.constant 0 : index
    %c0_237 = arith.constant 0 : index
    %314 = vector.load %arg11[%c1_233, %c1_234, %c0_235, %c0_236, %c0_237] : memref<3x4x10x8x128xf32, #tpu.memory_space<vmem>>, vector<1x1x8x8x128xf32>
    %315 = vector.shape_cast %314 : vector<1x1x8x8x128xf32> to vector<8x8x128xf32>
    %316 = vector.extract_strided_slice %63 {offsets = [0, 0, 1, 0], sizes = [1, 1, 1, 128], strides = [1, 1, 1, 1]} : vector<3x3x3x128xf32> to vector<1x1x1x128xf32>
    %317 = vector.shape_cast %316 : vector<1x1x1x128xf32> to vector<128xf32>
    %318 = vector.shape_cast %317 : vector<128xf32> to vector<1x1x128xf32>
    %319 = vector.broadcast %318 : vector<1x1x128xf32> to vector<8x8x128xf32>
    %320 = arith.mulf %315, %319 : vector<8x8x128xf32>
    %321 = arith.addf %313, %320 : vector<8x8x128xf32>
    %c2_238 = arith.constant 2 : index
    %c1_239 = arith.constant 1 : index
    %c0_240 = arith.constant 0 : index
    %c0_241 = arith.constant 0 : index
    %c0_242 = arith.constant 0 : index
    %322 = vector.load %arg11[%c2_238, %c1_239, %c0_240, %c0_241, %c0_242] : memref<3x4x10x8x128xf32, #tpu.memory_space<vmem>>, vector<1x1x8x8x128xf32>
    %323 = vector.shape_cast %322 : vector<1x1x8x8x128xf32> to vector<8x8x128xf32>
    %324 = vector.extract_strided_slice %63 {offsets = [0, 0, 2, 0], sizes = [1, 1, 1, 128], strides = [1, 1, 1, 1]} : vector<3x3x3x128xf32> to vector<1x1x1x128xf32>
    %325 = vector.shape_cast %324 : vector<1x1x1x128xf32> to vector<128xf32>
    %326 = vector.shape_cast %325 : vector<128xf32> to vector<1x1x128xf32>
    %327 = vector.broadcast %326 : vector<1x1x128xf32> to vector<8x8x128xf32>
    %328 = arith.mulf %323, %327 : vector<8x8x128xf32>
    %329 = arith.addf %321, %328 : vector<8x8x128xf32>
    %c0_243 = arith.constant 0 : index
    %c1_244 = arith.constant 1 : index
    %c1_245 = arith.constant 1 : index
    %c0_246 = arith.constant 0 : index
    %c0_247 = arith.constant 0 : index
    %330 = vector.load %arg11[%c0_243, %c1_244, %c1_245, %c0_246, %c0_247] : memref<3x4x10x8x128xf32, #tpu.memory_space<vmem>>, vector<1x1x8x8x128xf32>
    %331 = vector.shape_cast %330 : vector<1x1x8x8x128xf32> to vector<8x8x128xf32>
    %332 = vector.extract_strided_slice %63 {offsets = [0, 1, 0, 0], sizes = [1, 1, 1, 128], strides = [1, 1, 1, 1]} : vector<3x3x3x128xf32> to vector<1x1x1x128xf32>
    %333 = vector.shape_cast %332 : vector<1x1x1x128xf32> to vector<128xf32>
    %334 = vector.shape_cast %333 : vector<128xf32> to vector<1x1x128xf32>
    %335 = vector.broadcast %334 : vector<1x1x128xf32> to vector<8x8x128xf32>
    %336 = arith.mulf %331, %335 : vector<8x8x128xf32>
    %337 = arith.addf %329, %336 : vector<8x8x128xf32>
    %c1_248 = arith.constant 1 : index
    %c1_249 = arith.constant 1 : index
    %c1_250 = arith.constant 1 : index
    %c0_251 = arith.constant 0 : index
    %c0_252 = arith.constant 0 : index
    %338 = vector.load %arg11[%c1_248, %c1_249, %c1_250, %c0_251, %c0_252] : memref<3x4x10x8x128xf32, #tpu.memory_space<vmem>>, vector<1x1x8x8x128xf32>
    %339 = vector.shape_cast %338 : vector<1x1x8x8x128xf32> to vector<8x8x128xf32>
    %340 = vector.extract_strided_slice %63 {offsets = [0, 1, 1, 0], sizes = [1, 1, 1, 128], strides = [1, 1, 1, 1]} : vector<3x3x3x128xf32> to vector<1x1x1x128xf32>
    %341 = vector.shape_cast %340 : vector<1x1x1x128xf32> to vector<128xf32>
    %342 = vector.shape_cast %341 : vector<128xf32> to vector<1x1x128xf32>
    %343 = vector.broadcast %342 : vector<1x1x128xf32> to vector<8x8x128xf32>
    %344 = arith.mulf %339, %343 : vector<8x8x128xf32>
    %345 = arith.addf %337, %344 : vector<8x8x128xf32>
    %c2_253 = arith.constant 2 : index
    %c1_254 = arith.constant 1 : index
    %c1_255 = arith.constant 1 : index
    %c0_256 = arith.constant 0 : index
    %c0_257 = arith.constant 0 : index
    %346 = vector.load %arg11[%c2_253, %c1_254, %c1_255, %c0_256, %c0_257] : memref<3x4x10x8x128xf32, #tpu.memory_space<vmem>>, vector<1x1x8x8x128xf32>
    %347 = vector.shape_cast %346 : vector<1x1x8x8x128xf32> to vector<8x8x128xf32>
    %348 = vector.extract_strided_slice %63 {offsets = [0, 1, 2, 0], sizes = [1, 1, 1, 128], strides = [1, 1, 1, 1]} : vector<3x3x3x128xf32> to vector<1x1x1x128xf32>
    %349 = vector.shape_cast %348 : vector<1x1x1x128xf32> to vector<128xf32>
    %350 = vector.shape_cast %349 : vector<128xf32> to vector<1x1x128xf32>
    %351 = vector.broadcast %350 : vector<1x1x128xf32> to vector<8x8x128xf32>
    %352 = arith.mulf %347, %351 : vector<8x8x128xf32>
    %353 = arith.addf %345, %352 : vector<8x8x128xf32>
    %c0_258 = arith.constant 0 : index
    %c1_259 = arith.constant 1 : index
    %c2_260 = arith.constant 2 : index
    %c0_261 = arith.constant 0 : index
    %c0_262 = arith.constant 0 : index
    %354 = vector.load %arg11[%c0_258, %c1_259, %c2_260, %c0_261, %c0_262] : memref<3x4x10x8x128xf32, #tpu.memory_space<vmem>>, vector<1x1x8x8x128xf32>
    %355 = vector.shape_cast %354 : vector<1x1x8x8x128xf32> to vector<8x8x128xf32>
    %356 = vector.extract_strided_slice %63 {offsets = [0, 2, 0, 0], sizes = [1, 1, 1, 128], strides = [1, 1, 1, 1]} : vector<3x3x3x128xf32> to vector<1x1x1x128xf32>
    %357 = vector.shape_cast %356 : vector<1x1x1x128xf32> to vector<128xf32>
    %358 = vector.shape_cast %357 : vector<128xf32> to vector<1x1x128xf32>
    %359 = vector.broadcast %358 : vector<1x1x128xf32> to vector<8x8x128xf32>
    %360 = arith.mulf %355, %359 : vector<8x8x128xf32>
    %361 = arith.addf %353, %360 : vector<8x8x128xf32>
    %c1_263 = arith.constant 1 : index
    %c1_264 = arith.constant 1 : index
    %c2_265 = arith.constant 2 : index
    %c0_266 = arith.constant 0 : index
    %c0_267 = arith.constant 0 : index
    %362 = vector.load %arg11[%c1_263, %c1_264, %c2_265, %c0_266, %c0_267] : memref<3x4x10x8x128xf32, #tpu.memory_space<vmem>>, vector<1x1x8x8x128xf32>
    %363 = vector.shape_cast %362 : vector<1x1x8x8x128xf32> to vector<8x8x128xf32>
    %364 = vector.extract_strided_slice %63 {offsets = [0, 2, 1, 0], sizes = [1, 1, 1, 128], strides = [1, 1, 1, 1]} : vector<3x3x3x128xf32> to vector<1x1x1x128xf32>
    %365 = vector.shape_cast %364 : vector<1x1x1x128xf32> to vector<128xf32>
    %366 = vector.shape_cast %365 : vector<128xf32> to vector<1x1x128xf32>
    %367 = vector.broadcast %366 : vector<1x1x128xf32> to vector<8x8x128xf32>
    %368 = arith.mulf %363, %367 : vector<8x8x128xf32>
    %369 = arith.addf %361, %368 : vector<8x8x128xf32>
    %c2_268 = arith.constant 2 : index
    %c1_269 = arith.constant 1 : index
    %c2_270 = arith.constant 2 : index
    %c0_271 = arith.constant 0 : index
    %c0_272 = arith.constant 0 : index
    %370 = vector.load %arg11[%c2_268, %c1_269, %c2_270, %c0_271, %c0_272] : memref<3x4x10x8x128xf32, #tpu.memory_space<vmem>>, vector<1x1x8x8x128xf32>
    %371 = vector.shape_cast %370 : vector<1x1x8x8x128xf32> to vector<8x8x128xf32>
    %372 = vector.extract_strided_slice %63 {offsets = [0, 2, 2, 0], sizes = [1, 1, 1, 128], strides = [1, 1, 1, 1]} : vector<3x3x3x128xf32> to vector<1x1x1x128xf32>
    %373 = vector.shape_cast %372 : vector<1x1x1x128xf32> to vector<128xf32>
    %374 = vector.shape_cast %373 : vector<128xf32> to vector<1x1x128xf32>
    %375 = vector.broadcast %374 : vector<1x1x128xf32> to vector<8x8x128xf32>
    %376 = arith.mulf %371, %375 : vector<8x8x128xf32>
    %377 = arith.addf %369, %376 : vector<8x8x128xf32>
    %c0_273 = arith.constant 0 : index
    %c2_274 = arith.constant 2 : index
    %c0_275 = arith.constant 0 : index
    %c0_276 = arith.constant 0 : index
    %c0_277 = arith.constant 0 : index
    %378 = vector.load %arg11[%c0_273, %c2_274, %c0_275, %c0_276, %c0_277] : memref<3x4x10x8x128xf32, #tpu.memory_space<vmem>>, vector<1x1x8x8x128xf32>
    %379 = vector.shape_cast %378 : vector<1x1x8x8x128xf32> to vector<8x8x128xf32>
    %380 = vector.extract_strided_slice %63 {offsets = [1, 0, 0, 0], sizes = [1, 1, 1, 128], strides = [1, 1, 1, 1]} : vector<3x3x3x128xf32> to vector<1x1x1x128xf32>
    %381 = vector.shape_cast %380 : vector<1x1x1x128xf32> to vector<128xf32>
    %382 = vector.shape_cast %381 : vector<128xf32> to vector<1x1x128xf32>
    %383 = vector.broadcast %382 : vector<1x1x128xf32> to vector<8x8x128xf32>
    %384 = arith.mulf %379, %383 : vector<8x8x128xf32>
    %385 = arith.addf %377, %384 : vector<8x8x128xf32>
    %c1_278 = arith.constant 1 : index
    %c2_279 = arith.constant 2 : index
    %c0_280 = arith.constant 0 : index
    %c0_281 = arith.constant 0 : index
    %c0_282 = arith.constant 0 : index
    %386 = vector.load %arg11[%c1_278, %c2_279, %c0_280, %c0_281, %c0_282] : memref<3x4x10x8x128xf32, #tpu.memory_space<vmem>>, vector<1x1x8x8x128xf32>
    %387 = vector.shape_cast %386 : vector<1x1x8x8x128xf32> to vector<8x8x128xf32>
    %388 = vector.extract_strided_slice %63 {offsets = [1, 0, 1, 0], sizes = [1, 1, 1, 128], strides = [1, 1, 1, 1]} : vector<3x3x3x128xf32> to vector<1x1x1x128xf32>
    %389 = vector.shape_cast %388 : vector<1x1x1x128xf32> to vector<128xf32>
    %390 = vector.shape_cast %389 : vector<128xf32> to vector<1x1x128xf32>
    %391 = vector.broadcast %390 : vector<1x1x128xf32> to vector<8x8x128xf32>
    %392 = arith.mulf %387, %391 : vector<8x8x128xf32>
    %393 = arith.addf %385, %392 : vector<8x8x128xf32>
    %c2_283 = arith.constant 2 : index
    %c2_284 = arith.constant 2 : index
    %c0_285 = arith.constant 0 : index
    %c0_286 = arith.constant 0 : index
    %c0_287 = arith.constant 0 : index
    %394 = vector.load %arg11[%c2_283, %c2_284, %c0_285, %c0_286, %c0_287] : memref<3x4x10x8x128xf32, #tpu.memory_space<vmem>>, vector<1x1x8x8x128xf32>
    %395 = vector.shape_cast %394 : vector<1x1x8x8x128xf32> to vector<8x8x128xf32>
    %396 = vector.extract_strided_slice %63 {offsets = [1, 0, 2, 0], sizes = [1, 1, 1, 128], strides = [1, 1, 1, 1]} : vector<3x3x3x128xf32> to vector<1x1x1x128xf32>
    %397 = vector.shape_cast %396 : vector<1x1x1x128xf32> to vector<128xf32>
    %398 = vector.shape_cast %397 : vector<128xf32> to vector<1x1x128xf32>
    %399 = vector.broadcast %398 : vector<1x1x128xf32> to vector<8x8x128xf32>
    %400 = arith.mulf %395, %399 : vector<8x8x128xf32>
    %401 = arith.addf %393, %400 : vector<8x8x128xf32>
    %c0_288 = arith.constant 0 : index
    %c2_289 = arith.constant 2 : index
    %c1_290 = arith.constant 1 : index
    %c0_291 = arith.constant 0 : index
    %c0_292 = arith.constant 0 : index
    %402 = vector.load %arg11[%c0_288, %c2_289, %c1_290, %c0_291, %c0_292] : memref<3x4x10x8x128xf32, #tpu.memory_space<vmem>>, vector<1x1x8x8x128xf32>
    %403 = vector.shape_cast %402 : vector<1x1x8x8x128xf32> to vector<8x8x128xf32>
    %404 = vector.extract_strided_slice %63 {offsets = [1, 1, 0, 0], sizes = [1, 1, 1, 128], strides = [1, 1, 1, 1]} : vector<3x3x3x128xf32> to vector<1x1x1x128xf32>
    %405 = vector.shape_cast %404 : vector<1x1x1x128xf32> to vector<128xf32>
    %406 = vector.shape_cast %405 : vector<128xf32> to vector<1x1x128xf32>
    %407 = vector.broadcast %406 : vector<1x1x128xf32> to vector<8x8x128xf32>
    %408 = arith.mulf %403, %407 : vector<8x8x128xf32>
    %409 = arith.addf %401, %408 : vector<8x8x128xf32>
    %c2_293 = arith.constant 2 : index
    %c2_294 = arith.constant 2 : index
    %c1_295 = arith.constant 1 : index
    %c0_296 = arith.constant 0 : index
    %c0_297 = arith.constant 0 : index
    %410 = vector.load %arg11[%c2_293, %c2_294, %c1_295, %c0_296, %c0_297] : memref<3x4x10x8x128xf32, #tpu.memory_space<vmem>>, vector<1x1x8x8x128xf32>
    %411 = vector.shape_cast %410 : vector<1x1x8x8x128xf32> to vector<8x8x128xf32>
    %412 = vector.extract_strided_slice %63 {offsets = [1, 1, 2, 0], sizes = [1, 1, 1, 128], strides = [1, 1, 1, 1]} : vector<3x3x3x128xf32> to vector<1x1x1x128xf32>
    %413 = vector.shape_cast %412 : vector<1x1x1x128xf32> to vector<128xf32>
    %414 = vector.shape_cast %413 : vector<128xf32> to vector<1x1x128xf32>
    %415 = vector.broadcast %414 : vector<1x1x128xf32> to vector<8x8x128xf32>
    %416 = arith.mulf %411, %415 : vector<8x8x128xf32>
    %417 = arith.addf %409, %416 : vector<8x8x128xf32>
    %c0_298 = arith.constant 0 : index
    %c2_299 = arith.constant 2 : index
    %c2_300 = arith.constant 2 : index
    %c0_301 = arith.constant 0 : index
    %c0_302 = arith.constant 0 : index
    %418 = vector.load %arg11[%c0_298, %c2_299, %c2_300, %c0_301, %c0_302] : memref<3x4x10x8x128xf32, #tpu.memory_space<vmem>>, vector<1x1x8x8x128xf32>
    %419 = vector.shape_cast %418 : vector<1x1x8x8x128xf32> to vector<8x8x128xf32>
    %420 = vector.extract_strided_slice %63 {offsets = [1, 2, 0, 0], sizes = [1, 1, 1, 128], strides = [1, 1, 1, 1]} : vector<3x3x3x128xf32> to vector<1x1x1x128xf32>
    %421 = vector.shape_cast %420 : vector<1x1x1x128xf32> to vector<128xf32>
    %422 = vector.shape_cast %421 : vector<128xf32> to vector<1x1x128xf32>
    %423 = vector.broadcast %422 : vector<1x1x128xf32> to vector<8x8x128xf32>
    %424 = arith.mulf %419, %423 : vector<8x8x128xf32>
    %425 = arith.addf %417, %424 : vector<8x8x128xf32>
    %c1_303 = arith.constant 1 : index
    %c2_304 = arith.constant 2 : index
    %c2_305 = arith.constant 2 : index
    %c0_306 = arith.constant 0 : index
    %c0_307 = arith.constant 0 : index
    %426 = vector.load %arg11[%c1_303, %c2_304, %c2_305, %c0_306, %c0_307] : memref<3x4x10x8x128xf32, #tpu.memory_space<vmem>>, vector<1x1x8x8x128xf32>
    %427 = vector.shape_cast %426 : vector<1x1x8x8x128xf32> to vector<8x8x128xf32>
    %428 = vector.extract_strided_slice %63 {offsets = [1, 2, 1, 0], sizes = [1, 1, 1, 128], strides = [1, 1, 1, 1]} : vector<3x3x3x128xf32> to vector<1x1x1x128xf32>
    %429 = vector.shape_cast %428 : vector<1x1x1x128xf32> to vector<128xf32>
    %430 = vector.shape_cast %429 : vector<128xf32> to vector<1x1x128xf32>
    %431 = vector.broadcast %430 : vector<1x1x128xf32> to vector<8x8x128xf32>
    %432 = arith.mulf %427, %431 : vector<8x8x128xf32>
    %433 = arith.addf %425, %432 : vector<8x8x128xf32>
    %c2_308 = arith.constant 2 : index
    %c2_309 = arith.constant 2 : index
    %c2_310 = arith.constant 2 : index
    %c0_311 = arith.constant 0 : index
    %c0_312 = arith.constant 0 : index
    %434 = vector.load %arg11[%c2_308, %c2_309, %c2_310, %c0_311, %c0_312] : memref<3x4x10x8x128xf32, #tpu.memory_space<vmem>>, vector<1x1x8x8x128xf32>
    %435 = vector.shape_cast %434 : vector<1x1x8x8x128xf32> to vector<8x8x128xf32>
    %436 = vector.extract_strided_slice %63 {offsets = [1, 2, 2, 0], sizes = [1, 1, 1, 128], strides = [1, 1, 1, 1]} : vector<3x3x3x128xf32> to vector<1x1x1x128xf32>
    %437 = vector.shape_cast %436 : vector<1x1x1x128xf32> to vector<128xf32>
    %438 = vector.shape_cast %437 : vector<128xf32> to vector<1x1x128xf32>
    %439 = vector.broadcast %438 : vector<1x1x128xf32> to vector<8x8x128xf32>
    %440 = arith.mulf %435, %439 : vector<8x8x128xf32>
    %441 = arith.addf %433, %440 : vector<8x8x128xf32>
    %c0_313 = arith.constant 0 : index
    %c3 = arith.constant 3 : index
    %c0_314 = arith.constant 0 : index
    %c0_315 = arith.constant 0 : index
    %c0_316 = arith.constant 0 : index
    %442 = vector.load %arg11[%c0_313, %c3, %c0_314, %c0_315, %c0_316] : memref<3x4x10x8x128xf32, #tpu.memory_space<vmem>>, vector<1x1x8x8x128xf32>
    %443 = vector.shape_cast %442 : vector<1x1x8x8x128xf32> to vector<8x8x128xf32>
    %444 = vector.extract_strided_slice %63 {offsets = [2, 0, 0, 0], sizes = [1, 1, 1, 128], strides = [1, 1, 1, 1]} : vector<3x3x3x128xf32> to vector<1x1x1x128xf32>
    %445 = vector.shape_cast %444 : vector<1x1x1x128xf32> to vector<128xf32>
    %446 = vector.shape_cast %445 : vector<128xf32> to vector<1x1x128xf32>
    %447 = vector.broadcast %446 : vector<1x1x128xf32> to vector<8x8x128xf32>
    %448 = arith.mulf %443, %447 : vector<8x8x128xf32>
    %449 = arith.addf %441, %448 : vector<8x8x128xf32>
    %c1_317 = arith.constant 1 : index
    %c3_318 = arith.constant 3 : index
    %c0_319 = arith.constant 0 : index
    %c0_320 = arith.constant 0 : index
    %c0_321 = arith.constant 0 : index
    %450 = vector.load %arg11[%c1_317, %c3_318, %c0_319, %c0_320, %c0_321] : memref<3x4x10x8x128xf32, #tpu.memory_space<vmem>>, vector<1x1x8x8x128xf32>
    %451 = vector.shape_cast %450 : vector<1x1x8x8x128xf32> to vector<8x8x128xf32>
    %452 = vector.extract_strided_slice %63 {offsets = [2, 0, 1, 0], sizes = [1, 1, 1, 128], strides = [1, 1, 1, 1]} : vector<3x3x3x128xf32> to vector<1x1x1x128xf32>
    %453 = vector.shape_cast %452 : vector<1x1x1x128xf32> to vector<128xf32>
    %454 = vector.shape_cast %453 : vector<128xf32> to vector<1x1x128xf32>
    %455 = vector.broadcast %454 : vector<1x1x128xf32> to vector<8x8x128xf32>
    %456 = arith.mulf %451, %455 : vector<8x8x128xf32>
    %457 = arith.addf %449, %456 : vector<8x8x128xf32>
    %c2_322 = arith.constant 2 : index
    %c3_323 = arith.constant 3 : index
    %c0_324 = arith.constant 0 : index
    %c0_325 = arith.constant 0 : index
    %c0_326 = arith.constant 0 : index
    %458 = vector.load %arg11[%c2_322, %c3_323, %c0_324, %c0_325, %c0_326] : memref<3x4x10x8x128xf32, #tpu.memory_space<vmem>>, vector<1x1x8x8x128xf32>
    %459 = vector.shape_cast %458 : vector<1x1x8x8x128xf32> to vector<8x8x128xf32>
    %460 = vector.extract_strided_slice %63 {offsets = [2, 0, 2, 0], sizes = [1, 1, 1, 128], strides = [1, 1, 1, 1]} : vector<3x3x3x128xf32> to vector<1x1x1x128xf32>
    %461 = vector.shape_cast %460 : vector<1x1x1x128xf32> to vector<128xf32>
    %462 = vector.shape_cast %461 : vector<128xf32> to vector<1x1x128xf32>
    %463 = vector.broadcast %462 : vector<1x1x128xf32> to vector<8x8x128xf32>
    %464 = arith.mulf %459, %463 : vector<8x8x128xf32>
    %465 = arith.addf %457, %464 : vector<8x8x128xf32>
    %c0_327 = arith.constant 0 : index
    %c3_328 = arith.constant 3 : index
    %c1_329 = arith.constant 1 : index
    %c0_330 = arith.constant 0 : index
    %c0_331 = arith.constant 0 : index
    %466 = vector.load %arg11[%c0_327, %c3_328, %c1_329, %c0_330, %c0_331] : memref<3x4x10x8x128xf32, #tpu.memory_space<vmem>>, vector<1x1x8x8x128xf32>
    %467 = vector.shape_cast %466 : vector<1x1x8x8x128xf32> to vector<8x8x128xf32>
    %468 = vector.extract_strided_slice %63 {offsets = [2, 1, 0, 0], sizes = [1, 1, 1, 128], strides = [1, 1, 1, 1]} : vector<3x3x3x128xf32> to vector<1x1x1x128xf32>
    %469 = vector.shape_cast %468 : vector<1x1x1x128xf32> to vector<128xf32>
    %470 = vector.shape_cast %469 : vector<128xf32> to vector<1x1x128xf32>
    %471 = vector.broadcast %470 : vector<1x1x128xf32> to vector<8x8x128xf32>
    %472 = arith.mulf %467, %471 : vector<8x8x128xf32>
    %473 = arith.addf %465, %472 : vector<8x8x128xf32>
    %c1_332 = arith.constant 1 : index
    %c3_333 = arith.constant 3 : index
    %c1_334 = arith.constant 1 : index
    %c0_335 = arith.constant 0 : index
    %c0_336 = arith.constant 0 : index
    %474 = vector.load %arg11[%c1_332, %c3_333, %c1_334, %c0_335, %c0_336] : memref<3x4x10x8x128xf32, #tpu.memory_space<vmem>>, vector<1x1x8x8x128xf32>
    %475 = vector.shape_cast %474 : vector<1x1x8x8x128xf32> to vector<8x8x128xf32>
    %476 = vector.extract_strided_slice %63 {offsets = [2, 1, 1, 0], sizes = [1, 1, 1, 128], strides = [1, 1, 1, 1]} : vector<3x3x3x128xf32> to vector<1x1x1x128xf32>
    %477 = vector.shape_cast %476 : vector<1x1x1x128xf32> to vector<128xf32>
    %478 = vector.shape_cast %477 : vector<128xf32> to vector<1x1x128xf32>
    %479 = vector.broadcast %478 : vector<1x1x128xf32> to vector<8x8x128xf32>
    %480 = arith.mulf %475, %479 : vector<8x8x128xf32>
    %481 = arith.addf %473, %480 : vector<8x8x128xf32>
    %c2_337 = arith.constant 2 : index
    %c3_338 = arith.constant 3 : index
    %c1_339 = arith.constant 1 : index
    %c0_340 = arith.constant 0 : index
    %c0_341 = arith.constant 0 : index
    %482 = vector.load %arg11[%c2_337, %c3_338, %c1_339, %c0_340, %c0_341] : memref<3x4x10x8x128xf32, #tpu.memory_space<vmem>>, vector<1x1x8x8x128xf32>
    %483 = vector.shape_cast %482 : vector<1x1x8x8x128xf32> to vector<8x8x128xf32>
    %484 = vector.extract_strided_slice %63 {offsets = [2, 1, 2, 0], sizes = [1, 1, 1, 128], strides = [1, 1, 1, 1]} : vector<3x3x3x128xf32> to vector<1x1x1x128xf32>
    %485 = vector.shape_cast %484 : vector<1x1x1x128xf32> to vector<128xf32>
    %486 = vector.shape_cast %485 : vector<128xf32> to vector<1x1x128xf32>
    %487 = vector.broadcast %486 : vector<1x1x128xf32> to vector<8x8x128xf32>
    %488 = arith.mulf %483, %487 : vector<8x8x128xf32>
    %489 = arith.addf %481, %488 : vector<8x8x128xf32>
    %c0_342 = arith.constant 0 : index
    %c3_343 = arith.constant 3 : index
    %c2_344 = arith.constant 2 : index
    %c0_345 = arith.constant 0 : index
    %c0_346 = arith.constant 0 : index
    %490 = vector.load %arg11[%c0_342, %c3_343, %c2_344, %c0_345, %c0_346] : memref<3x4x10x8x128xf32, #tpu.memory_space<vmem>>, vector<1x1x8x8x128xf32>
    %491 = vector.shape_cast %490 : vector<1x1x8x8x128xf32> to vector<8x8x128xf32>
    %492 = vector.extract_strided_slice %63 {offsets = [2, 2, 0, 0], sizes = [1, 1, 1, 128], strides = [1, 1, 1, 1]} : vector<3x3x3x128xf32> to vector<1x1x1x128xf32>
    %493 = vector.shape_cast %492 : vector<1x1x1x128xf32> to vector<128xf32>
    %494 = vector.shape_cast %493 : vector<128xf32> to vector<1x1x128xf32>
    %495 = vector.broadcast %494 : vector<1x1x128xf32> to vector<8x8x128xf32>
    %496 = arith.mulf %491, %495 : vector<8x8x128xf32>
    %497 = arith.addf %489, %496 : vector<8x8x128xf32>
    %c1_347 = arith.constant 1 : index
    %c3_348 = arith.constant 3 : index
    %c2_349 = arith.constant 2 : index
    %c0_350 = arith.constant 0 : index
    %c0_351 = arith.constant 0 : index
    %498 = vector.load %arg11[%c1_347, %c3_348, %c2_349, %c0_350, %c0_351] : memref<3x4x10x8x128xf32, #tpu.memory_space<vmem>>, vector<1x1x8x8x128xf32>
    %499 = vector.shape_cast %498 : vector<1x1x8x8x128xf32> to vector<8x8x128xf32>
    %500 = vector.extract_strided_slice %63 {offsets = [2, 2, 1, 0], sizes = [1, 1, 1, 128], strides = [1, 1, 1, 1]} : vector<3x3x3x128xf32> to vector<1x1x1x128xf32>
    %501 = vector.shape_cast %500 : vector<1x1x1x128xf32> to vector<128xf32>
    %502 = vector.shape_cast %501 : vector<128xf32> to vector<1x1x128xf32>
    %503 = vector.broadcast %502 : vector<1x1x128xf32> to vector<8x8x128xf32>
    %504 = arith.mulf %499, %503 : vector<8x8x128xf32>
    %505 = arith.addf %497, %504 : vector<8x8x128xf32>
    %c2_352 = arith.constant 2 : index
    %c3_353 = arith.constant 3 : index
    %c2_354 = arith.constant 2 : index
    %c0_355 = arith.constant 0 : index
    %c0_356 = arith.constant 0 : index
    %506 = vector.load %arg11[%c2_352, %c3_353, %c2_354, %c0_355, %c0_356] : memref<3x4x10x8x128xf32, #tpu.memory_space<vmem>>, vector<1x1x8x8x128xf32>
    %507 = vector.shape_cast %506 : vector<1x1x8x8x128xf32> to vector<8x8x128xf32>
    %508 = vector.extract_strided_slice %63 {offsets = [2, 2, 2, 0], sizes = [1, 1, 1, 128], strides = [1, 1, 1, 1]} : vector<3x3x3x128xf32> to vector<1x1x1x128xf32>
    %509 = vector.shape_cast %508 : vector<1x1x1x128xf32> to vector<128xf32>
    %510 = vector.shape_cast %509 : vector<128xf32> to vector<1x1x128xf32>
    %511 = vector.broadcast %510 : vector<1x1x128xf32> to vector<8x8x128xf32>
    %512 = arith.mulf %507, %511 : vector<8x8x128xf32>
    %513 = arith.addf %505, %512 : vector<8x8x128xf32>
    %514 = vector.shape_cast %64 : vector<1x128xf32> to vector<1x1x128xf32>
    %515 = vector.broadcast %514 : vector<1x1x128xf32> to vector<8x8x128xf32>
    %516 = arith.addf %513, %515 : vector<8x8x128xf32>
    %cst_357 = arith.constant 0.000000e+00 : f32
    %517 = vector.broadcast %cst_357 : f32 to vector<8x8x128xf32>
    %518 = arith.maximumf %516, %517 : vector<8x8x128xf32>
    %519 = vector.shape_cast %518 : vector<8x8x128xf32> to vector<64x128xf32>
    %cst_358 = arith.constant dense<0.000000e+00> : vector<64x128xf32>
    %520 = tpu.matmul %519, %65, %cst_358 {dimension_numbers = #tpu.dot_dimension_numbers<[1], [0], [0], [1], [0, 0, 1, 1], [], []>} : vector<64x128xf32>, vector<128x128xf32>, vector<64x128xf32> -> vector<64x128xf32>
    %c0_359 = arith.constant 0 : index
    %c1_360 = arith.constant 1 : index
    %c0_361 = arith.constant 0 : index
    %c0_362 = arith.constant 0 : index
    %c0_363 = arith.constant 0 : index
    %521 = vector.load %arg2[%c0_359, %c1_360, %c0_361, %c0_362, %c0_363] : memref<1x2x8x8x128xf32, #tpu.memory_space<vmem>>, vector<1x1x8x8x128xf32>
    %522 = vector.shape_cast %521 : vector<1x1x8x8x128xf32> to vector<8x8x128xf32>
    %523 = vector.shape_cast %522 : vector<8x8x128xf32> to vector<64x128xf32>
    %524 = vector.broadcast %66 : vector<1x128xf32> to vector<64x128xf32>
    %525 = arith.addf %520, %524 : vector<64x128xf32>
    %526 = arith.addf %525, %523 : vector<64x128xf32>
    %cst_364 = arith.constant 0.000000e+00 : f32
    %527 = vector.broadcast %cst_364 : f32 to vector<64x128xf32>
    %528 = arith.maximumf %526, %527 : vector<64x128xf32>
    %529 = vector.shape_cast %528 : vector<64x128xf32> to vector<1x1x8x8x128xf32>
    %c0_365 = arith.constant 0 : index
    %c1_366 = arith.constant 1 : index
    %c0_367 = arith.constant 0 : index
    %c0_368 = arith.constant 0 : index
    %c0_369 = arith.constant 0 : index
    %530 = vector.load %arg10[%c0_365, %c1_366, %c0_367, %c0_368, %c0_369] : memref<1x2x8x8x128xf32, #tpu.memory_space<vmem>>, vector<1x1x8x8x128xf32>
    tpu.vector_store %arg10[%c0_365, %c1_366, %c0_367, %c0_368, %c0_369], %529 {strides = array<i32>} : memref<1x2x8x8x128xf32, #tpu.memory_space<vmem>>, vector<1x1x8x8x128xf32>,
    return
  }
  func.func @transform_0(%arg0: i32, %arg1: i32) -> (i32, i32, i32, i32, i32) {
    %c0_i32 = arith.constant 0 : i32
    %c0_i32_0 = arith.constant 0 : i32
    %c0_i32_1 = arith.constant 0 : i32
    %c0_i32_2 = arith.constant 0 : i32
    return %arg0, %arg1, %c0_i32, %c0_i32_0, %c0_i32_1 : i32, i32, i32, i32, i32
  }
  func.func @transform_2(%arg0: i32, %arg1: i32) -> (i32, i32) {
    %c0_i32 = arith.constant 0 : i32
    %c0_i32_0 = arith.constant 0 : i32
    %c0_i32_1 = arith.constant 0 : i32
    return %c0_i32, %c0_i32_0 : i32, i32
  }
  func.func @transform_3(%arg0: i32, %arg1: i32) -> (i32, i32) {
    %c0_i32 = arith.constant 0 : i32
    %c0_i32_0 = arith.constant 0 : i32
    %c0_i32_1 = arith.constant 0 : i32
    return %c0_i32, %c0_i32_0 : i32, i32
  }
  func.func @transform_4(%arg0: i32, %arg1: i32) -> (i32, i32, i32, i32) {
    %c0_i32 = arith.constant 0 : i32
    %c0_i32_0 = arith.constant 0 : i32
    %c0_i32_1 = arith.constant 0 : i32
    %c0_i32_2 = arith.constant 0 : i32
    %c0_i32_3 = arith.constant 0 : i32
    return %c0_i32, %c0_i32_0, %c0_i32_1, %c0_i32_2 : i32, i32, i32, i32
  }
  func.func @transform_5(%arg0: i32, %arg1: i32) -> (i32, i32) {
    %c0_i32 = arith.constant 0 : i32
    %c0_i32_0 = arith.constant 0 : i32
    %c0_i32_1 = arith.constant 0 : i32
    return %c0_i32, %c0_i32_0 : i32, i32
  }
  func.func @transform_6(%arg0: i32, %arg1: i32) -> (i32, i32) {
    %c0_i32 = arith.constant 0 : i32
    %c0_i32_0 = arith.constant 0 : i32
    %c0_i32_1 = arith.constant 0 : i32
    return %c0_i32, %c0_i32_0 : i32, i32
  }
  func.func @transform_7(%arg0: i32, %arg1: i32) -> (i32, i32) {
    %c0_i32 = arith.constant 0 : i32
    %c0_i32_0 = arith.constant 0 : i32
    %c0_i32_1 = arith.constant 0 : i32
    return %c0_i32, %c0_i32_0 : i32, i32
  }
  func.func @transform_8(%arg0: i32, %arg1: i32) -> (i32, i32, i32, i32, i32) {
    %c0_i32 = arith.constant 0 : i32
    %c0_i32_0 = arith.constant 0 : i32
    %c0_i32_1 = arith.constant 0 : i32
    %c0_i32_2 = arith.constant 0 : i32
    return %arg0, %arg1, %c0_i32, %c0_i32_0, %c0_i32_1 : i32, i32, i32, i32, i32
  }
}

</mosaic_0001>

<bundles_post_ra>
// kernel: tpu_custom_call.1
= control target key start
LH: loop header
LB: loop body
LE: loop exit
PB: predicated region body
PF: predicated region fallthrough
CT: control target
= control target key end

     0   :  { %s6319_s0 = inlined_call_operand.hbm [shape: f32[2,4,8,8,128], index: 0, kind: input, shape index: {}]   ;;  %s6320_s1 = inlined_call_operand.hbm [shape: f32[2,4,8,8,128], index: 1, kind: input, shape index: {}]   ;;  %s6321_s2 = inlined_call_operand.hbm [shape: f32[128,128], index: 2, kind: input, shape index: {}]   ;;  %s6322_s3 = inlined_call_operand.vmem [shape: f32[1,128], index: 3, kind: input, shape index: {}]   ;;  %s6323_s4 = inlined_call_operand.hbm [shape: f32[3,3,3,128], index: 4, kind: input, shape index: {}]   ;;  %s6324_s5 = inlined_call_operand.vmem [shape: f32[1,128], index: 5, kind: input, shape index: {}]   ;;  %s6325_s6 = inlined_call_operand.hbm [shape: f32[128,128], index: 6, kind: input, shape index: {}]   ;;  %s6326_s7 = inlined_call_operand.vmem [shape: f32[1,128], index: 7, kind: input, shape index: {}]   ;;  %s6327_s8 = inlined_call_operand.hbm [shape: f32[2,4,8,8,128], index: 8, kind: output, shape index: {}]  }
   0x1   :  { %6498 = sst [smem:[#allocation60_spill]] %s6321_s2 }
   0x2   :  { %6499 = sst [smem:[#allocation61_spill]] %s6322_s3 }
   0x3   :  { %6500 = sst [smem:[#allocation62_spill]] %s6323_s4 }
   0x4   :  { %6501 = sst [smem:[#allocation63_spill]] %s6324_s5 }
   0x5   :  { %6502 = sst [smem:[#allocation64_spill]] %s6325_s6 }
   0x6   :  { %6503 = sst [smem:[#allocation65_spill]] %s6326_s7 }
   0x7   :  { %6504 = sst [smem:[#allocation66_spill]] %s6327_s8 }
   0x8   :  { %13 = vsyncpa [#allocation6], 0 }
   0x9   :  { %15 = vsyncpa [#allocation6 + $0x1], 0 }
   0xa   :  { %16 = vsyncpa [#allocation9], 0 }
   0xb   :  { %17 = vsyncpa [#allocation12], 0 }
   0xc   :  { %18 = vsyncpa [#allocation7], 0 }
   0xd   :  { %20 = vsyncpa [#allocation7 + $0x1], 0  ;;  %s4448_s27 = smov 0   ;;  %s4450_s28 = smov 0  }
   0xe   :  { %s4452_s29 = smov 0   ;;  %s4454_s30 = smov 0  }
   0xf   :  { %s4456_s9 = smov 0   ;;  %s4458_s10 = smov 0  }
  0x10   :  { %s4460_s11 = smov 0   ;;  %s4462_s12 = smov 0  }
  0x11 LB: > { %6505 = sst [smem:[#allocation26_spill]] %s4357_s27  ;;  %s3273_s13 = sadd.s32 4294967295, %s4385_s12   ;;  %s4385_s12 = sphi %s4462_s12, %s26_s12   ;;  %s4381_s11 = sphi %s4460_s11, %s6748_s11   ;;  %s4377_s10 = sphi %s4458_s10, %s6742_s10   ;;  %s4373_s9 = sphi %s4456_s9, %s6747_s9   ;;  %s4369_s30 = sphi %s4454_s30, %s6741_s30   ;;  %s4365_s29 = sphi %s4452_s29, %s6746_s29   ;;  %s4361_s28 = sphi %s4450_s28, %s6745_s28   ;;  %s4357_s27 = sphi %s4448_s27, %s6744_s27  }
  0x12   : > { %6506 = sst [smem:[#allocation27_spill]] %s4377_s10  ;;  %s3274_s14 = sadd.s32 4294967294, %s4385_s12  }
  0x13   : > { %p60_p0 = scmp.ne.s32.totalorder %s4361_s28, %s4357_s27  ;;  %p4492_p1 = scmp.eq.s32.totalorder %s3273_s13, 0 }
  0x14   : > { %p4496_p2 = scmp.eq.s32.totalorder %s3273_s13, 3  ;;  %p218_p3 = scmp.eq.s32.totalorder %s3274_s14, 3 }
  0x15   : > { %s6507_s15 = scalar_select %p4492_p1, 1, 0 }
  0x16   : > { %s6508_s16 = scalar_select %p4496_p2, 1, 0 }
  0x17   : > { %p4502_p4 = por %p4492_p1, %p60_p0  ;;  %p3275_p5 = scmp.ge.s32.totalorder %s4385_s12, 1 }
  0x18   : > { %p4507_p6 = por %p218_p3, %p60_p0  ;;  %p225_p7 = scmp.lt.s32.totalorder %s4385_s12, 5 }
  0x19   : > { %s6509_s17 = scalar_select %p4502_p4, 1, 0 }
  0x1a   : > { %s6510_s18 = scalar_select %p4507_p6, 1, 0 }
  0x1b   : > { %p4512_p8 = pnand %p3275_p5, %p225_p7  ;;  %s4387_s20 = smov [#allocation8]  }
  0x1c   : > { %6511 = sst [smem:[#allocation28_spill]] %s6510_s18  ;;  %s237_s21 = sshll.u32 %s4387_s20, 4  ;;  %s238_s21 = int_to_ptr.vmem [resolvable:$true] %s237_s21 }
  0x1d   : > { %s6512_s19 = scalar_select %p4512_p8, 1, 0 }
  0x1e   : > { %p3997_p9 = pneg %p4512_p8  ;;  %s4388_s23 = smov [#allocation10]  }
  0x1f   : > { %s253_s24 = sshll.u32 %s4388_s23, 4  ;;  %s6514_s2 = sld [smem:[#allocation60_spill]]  ;;  %s4524_s24 = int_to_ptr.vmem [resolvable:$true] %s253_s24 }
  0x20   : > { %p4520_p10 = pnand %p3997_p9, %p4492_p1 }
  0x22   : > { %p4534_p12 = pneg %p4520_p10 }
  0x25   : > { %s4104_s13 = scalar_lea.hbm %s6514_s2, 2048 }
  0x26   : > { %p4105_p11 = scmp.ne.s32.totalorder %s6514_s2, %s4104_s13  ;;  %p4111_p3 = scmp.lt.u32.totalorder %s4104_s13, %s6514_s2 }
  0x28   : > { %p4107_p13 = pnand %p4534_p12, %p4105_p11 }
  0x2a   : > { %p4108_p0 = pneg %p4107_p13 }
  0x2c   : > { %p4113_p5 = pnand %p4111_p3, %p4108_p0 }
  0x2e   : > { %4116 = shalt.err (!%p4113_p5)
}
  0x2f   : > { %s4117_s25 = scalar_lea.vmem %s238_s21, 2048  ;;  %p4125_p1 = scmp.lt.s32.totalorder %s238_s21, %s238_s21 }
  0x30   : > { %p4118_p7 = scmp.ne.s32.totalorder %s238_s21, %s4117_s25  ;;  %p4126_p4 = scmp.lt.s32.totalorder %s4117_s25, %s4117_s25 }
  0x32   : > { %p4120_p9 = pnand %p4118_p7, %p4534_p12  ;;  %p4127_p8 = por %p4126_p4, %p4125_p1 }
  0x34   : > { %p4121_p6 = pneg %p4120_p9 }
  0x36   : > { %p4128_p2 = pnand %p4127_p8, %p4121_p6 }
  0x38   : > { %4131 = shalt.err (!%p4128_p2)
}
  0x39   : > { %s6336_s18 = smov 128   ;;  %s6338_s26 = smov 8  }
  0x3a   : > { %4000 = dma.hbm_to_vmem [thread:$0]  (!%p4520_p10), %s6514_s2, 2048, %s238_s21, [#allocation9], %s6336_s18, %s6336_s18, %s6338_s26  }
  0x3b   : > { %s6516_s4 = sld [smem:[#allocation62_spill]] }
  0x41   : > { %s4132_s8 = scalar_lea.hbm %s6516_s4, 576 }
  0x42   : > { %p4133_p1 = scmp.ne.s32.totalorder %s6516_s4, %s4132_s8  ;;  %p4139_p6 = scmp.lt.u32.totalorder %s4132_s8, %s6516_s4 }
  0x44   : > { %p4135_p2 = pnand %p4133_p1, %p4534_p12 }
  0x46   : > { %p4136_p4 = pneg %p4135_p2 }
  0x48   : > { %p4141_p8 = pnand %p4139_p6, %p4136_p4 }
  0x4a   : > { %4144 = shalt.err (!%p4141_p8)
}
  0x4b   : > { %s4145_s21 = scalar_lea.vmem %s4524_s24, 576  ;;  %p4153_p3 = scmp.lt.s32.totalorder %s4524_s24, %s4524_s24 }
  0x4c   : > { %p4146_p11 = scmp.ne.s32.totalorder %s4524_s24, %s4145_s21  ;;  %p4154_p5 = scmp.lt.s32.totalorder %s4145_s21, %s4145_s21 }
  0x4e   : > { %p4148_p13 = pnand %p4146_p11, %p4534_p12  ;;  %p4155_p7 = por %p4154_p5, %p4153_p3 }
  0x50   : > { %p4149_p0 = pneg %p4148_p13 }
  0x52   : > { %p4156_p9 = pnand %p4155_p7, %p4149_p0 }
  0x54   : > { %4159 = shalt.err (!%p4156_p9)
}
  0x55   : > { %s4391_s7 = smov 64   ;;  %s4392_s3 = smov 4  }
  0x56   : > { %4003 = dma.hbm_to_vmem [thread:$0]  (!%p4520_p10), %s6516_s4, 576, %s4524_s24, [#allocation9], %s4391_s7, %s4391_s7, %s4392_s3  }
  0x57   : > { %s4393_s27 = smov [#allocation11]   ;;  %s6517_s6 = sld [smem:[#allocation64_spill]] }
  0x58   : > { %s269_s13 = sshll.u32 %s4393_s27, 4  ;;  %s270_s13 = int_to_ptr.vmem [resolvable:$true] %s269_s13 }
  0x5d   : > { %s4160_s25 = scalar_lea.hbm %s6517_s6, 2048 }
  0x5e   : > { %p4161_p1 = scmp.ne.s32.totalorder %s6517_s6, %s4160_s25  ;;  %p4167_p6 = scmp.lt.u32.totalorder %s4160_s25, %s6517_s6 }
  0x60   : > { %p4163_p2 = pnand %p4161_p1, %p4534_p12 }
  0x62   : > { %p4164_p4 = pneg %p4163_p2 }
  0x64   : > { %p4169_p8 = pnand %p4167_p6, %p4164_p4 }
  0x66   : > { %4172 = shalt.err (!%p4169_p8)
}
  0x67   : > { %s4173_s24 = scalar_lea.vmem %s270_s13, 2048  ;;  %p4181_p3 = scmp.lt.s32.totalorder %s270_s13, %s270_s13 }
  0x68   : > { %p4174_p11 = scmp.ne.s32.totalorder %s270_s13, %s4173_s24  ;;  %p4182_p5 = scmp.lt.s32.totalorder %s4173_s24, %s4173_s24 }
  0x6a   : > { %p4176_p13 = pnand %p4174_p11, %p4534_p12  ;;  %p4183_p7 = por %p4182_p5, %p4181_p3 }
  0x6c   : > { %p4177_p0 = pneg %p4176_p13 }
  0x6e   : > { %p4184_p9 = pnand %p4183_p7, %p4177_p0 }
  0x70   : > { %4187 = shalt.err (!%p4184_p9)
}
  0x71   : > { %s6518_s18 = smov 8   ;;  %s6519_s7 = smov 128  }
  0x72   : > { %4006 = dma.hbm_to_vmem [thread:$0]  (!%p4520_p10), %s6517_s6, 2048, %s270_s13, [#allocation12], %s6519_s7, %s6519_s7, %s6518_s18  }
  0x73   : > { %s35_s22 = sadd.s32 1, %s4377_s10  ;;  %s38_s20 = sadd.s32 1, %s4381_s11 }
  0x74   : > { %p36_p12 = scmp.ge.s32.totalorder %s35_s22, 2  ;;  %s47_s3 = sadd.s32 1, %s4365_s29 }
  0x75   : > { %p54_p1 = scmp.ne.s32.totalorder %s4365_s29, %s4361_s28  ;;  %p55_p2 = scmp.eq.s32.totalorder %s4385_s12, 0 }
  0x76   : > { %s6750_s22 = smov (%p36_p12, %s35_s22), 0  ;;  %s6752_s20 = smov (!%p36_p12, %s38_s20), %s4381_s11 }
  0x77   : > { %6520 = sst [smem:[#allocation29_spill]] %s6750_s22  ;;  %s43_s5 = ssub.s32 %s4377_s10, %s6750_s22 }
  0x78   : > { %p40_p4 = scmp.ge.s32.totalorder %s6752_s20, 2  ;;  %p6521_p6 = scmp.ne.s32.totalorder %s6508_s16, 0 }
  0x79   : > { %p4614_p10 = por %p55_p2, %p54_p1  ;;  %p4018_p11 = scmp.lt.s32.totalorder %s4385_s12, 4 }
  0x7a   : > { %p4610_p8 = por %p6521_p6, %p54_p1  ;;  %s6754_s20 = smov (%p40_p4, %s6752_s20), 0 }
  0x7b   : > { %6524 = sst [smem:[#allocation30_spill]] %s6754_s20  ;;  %s286_s13 = sand.u32 1, %s4365_s29  }
  0x7c   : > { %s6522_s8 = scalar_select %p4610_p8, 1, 0 }
  0x7d   : > { %s3342_s14 = sshll.u32 %s4377_s10, 4  ;;  %s42_s23 = ssub.s32 %s4381_s11, %s6754_s20 }
  0x7e   : > { %s44_s25 = sor.u32 %s43_s5, %s42_s23  ;;  %s3280_s21 = sshll.u32 %s286_s13, 7 }
  0x7f   : > { %p45_p13 = scmp.eq.s32.totalorder %s44_s25, 0  ;;  %s3283_s16 = sshll.u32 %s4381_s11, 5 }
  0x80   : > { %s290_s24 = scalar_lea.vmem [#allocation5], %s3280_s21  ;;  %s297_s4 = sadd.s32 %s3342_s14, %s3283_s16 }
  0x81   : > { %s300_s2 = sshll.u32 %s290_s24, 4  ;;  %s3284_s6 = sshll.u32 %s297_s4, 7  ;;  %s4629_s2 = int_to_ptr.vmem [resolvable:$true] %s300_s2 }
  0x82   : > { %s4627_s26 = scalar_select %p45_p13, %s4365_s29, %s47_s3  }
  0x83   : > { %p4635_p0 = pnand %p4018_p11, %p4614_p10  ;;  %s4642_s5 = scalar_lea.hbm %s6319_s0, %s3284_s6 }
  0x84   : > { %s4644_s3 = scalar_lea.sflag [#allocation6], %s286_s13  ;;  %s4188_s4 = scalar_lea.hbm %s4642_s5, 2048 }
  0x85   : > { %p4189_p3 = scmp.ne.s32.totalorder %s4642_s5, %s4188_s4  ;;  %p4190_p5 = pneg %p4635_p0 }
  0x86   : > { %s4193_s20 = scalar_lea.hbm %s6319_s0, 8192  ;;  %p4194_p12 = scmp.lt.u32.totalorder %s4642_s5, %s6319_s0 }
  0x87   : > { %p4191_p7 = pnand %p4190_p5, %p4189_p3  ;;  %p4195_p1 = scmp.lt.u32.totalorder %s4193_s20, %s4188_s4 }
  0x88   : > { %p4197_p4 = scmp.lt.u32.totalorder %s4188_s4, %s4642_s5 }
  0x89   : > { %p4192_p9 = pneg %p4191_p7  ;;  %p4196_p2 = por %p4195_p1, %p4194_p12 }
  0x8b   : > { %p4198_p6 = por %p4197_p4, %p4196_p2 }
  0x8d   : > { %p4199_p10 = pnand %p4198_p6, %p4192_p9 }
  0x8f   : > { %4202 = shalt.err (!%p4199_p10)
}
  0x90   : > { %s4203_s13 = scalar_lea.vmem %s4629_s2, 2048  ;;  %s4394_s23 = smov [#allocation5]  }
  0x91   : > { %p4204_p11 = scmp.ne.s32.totalorder %s4629_s2, %s4203_s13  ;;  %s4208_s25 = sshll.u32 %s4394_s23, 4  ;;  %s4209_s25 = int_to_ptr.vmem [resolvable:$false] %s4208_s25 }
  0x92   : > { %s4210_s21 = scalar_lea.vmem %s4209_s25, 4096  ;;  %p4211_p7 = scmp.lt.s32.totalorder %s4629_s2, %s4209_s25 }
  0x93   : > { %p4206_p13 = pnand %p4204_p11, %p4190_p5  ;;  %p4212_p12 = scmp.lt.s32.totalorder %s4210_s21, %s4203_s13 }
  0x95   : > { %p4207_p3 = pneg %p4206_p13  ;;  %p4213_p1 = por %p4212_p12, %p4211_p7 }
  0x97   : > { %p4214_p2 = pnand %p4213_p1, %p4207_p3 }
  0x99   : > { %4217 = shalt.err (!%p4214_p2)
}
  0x9a   : > { %4010 = dma.hbm_to_vmem [thread:$0]  (!%p4635_p0), %s4642_s5, 2048, %s4629_s2, %s4644_s3, %s6519_s7, %s6519_s7, %s6518_s18  }
  0x9b   : > { %p6526_p5 = scmp.ne.s32.totalorder %s6512_s19, 0 }
  0x9d   : > { %312 = sbr.rel (%p6526_p5) target bundleno = 1513 (0x5e9), region = 48 }
  0xa4   : > { %s4678_s16 = sand.u32 1, %s4361_s28   ;;  %p6527_p9 = scmp.ne.s32.totalorder %s6509_s17, 0 }
  0xa5   : > { %s3286_s24 = sshll.u32 %s4678_s16, 7  ;;  %s315_s4 = scalar_lea.sflag [#allocation6], %s4678_s16 }
  0xa6   : > { %s4684_s22 = scalar_lea.vmem [#allocation5], %s3286_s24 }
  0xa7   : > { %4336 = dma.done.wait (%p6527_p9), %s315_s4, 2048  }
  0xa8   : > { %4338 = vsyncadd (%p6527_p9), %s315_s4, 4294965248  ;;  %p6528_p0 = scmp.ne.s32.totalorder %s6507_s15, 0 }
  0xaa   : > { %4340 = dma.done.wait (%p6528_p0), [#allocation9], 2624  }
  0xab   : > { %4342 = vsyncadd (%p6528_p0), [#allocation9], 4294964672 }
  0xac   : > { %4344 = dma.done.wait (%p6528_p0), [#allocation12], 2048  }
  0xad   : > { %4346 = vsyncadd (%p6528_p0), [#allocation12], 4294965248  ;;  %v4395_v0 = vmov 0.0   ;;  %v433_v1 = vld [vmem:[#allocation8] sm:$0xff]  ;;  %v434_v2 = vld [vmem:[#allocation8 + $0x8] sm:$0xff]  ;;  %s3291_s15 = sshll.u32 %s4369_s30, 1 }
  0xae   : > { %408 = vst [vmem:[#allocation2] sm:$0xff] %v4395_v0  ;;  %409 = vst [vmem:[#allocation2 + $0x50] sm:$0xff] %v4395_v0  ;;  %v435_v3 = vld [vmem:[#allocation8 + $0x10] sm:$0xff]  ;;  %v4698_v4 = vpack.c.bf16 %v434_v2, %v433_v1  ;;  %v436_v5 = vld [vmem:[#allocation8 + $0x18] sm:$0xff]  ;;  %s3293_s17 = sadd.s32 4294967295, %s3291_s15  ;;  %s3295_s18 = sshll.u32 %s4373_s9, 8 }
  0xaf   : > { %410 = vst [vmem:[#allocation2 + $0xa0] sm:$0xff] %v4395_v0  ;;  %411 = vst [vmem:[#allocation2 + $0xf0] sm:$0xff] %v4395_v0  ;;  %v4700_v6 = vpack.c.bf16 %v436_v5, %v435_v3  ;;  %v437_v7 = vld [vmem:[#allocation8 + $0x20] sm:$0xff]  ;;  %v438_v8 = vld [vmem:[#allocation8 + $0x28] sm:$0xff]  ;;  %s3294_s19 = sshll.u32 %s3293_s17, 6  ;;  %p4022_p4 = scmp.gt.s32.totalorder %s4369_s30, 0 }
  0xb0   : > { %412 = vst [vmem:[#allocation2 + $0x140] sm:$0xff] %v4395_v0  ;;  %413 = vst [vmem:[#allocation2 + $0x190] sm:$0xff] %v4395_v0  ;;  %3754 = vmatprep.subr.bf16.mxu0 %v4698_v4  ;;  %3786 = vmatprep.subr.bf16.mxu1 %v4698_v4  ;;  %v4708_v9 = vpack.c.bf16 %v438_v8, %v437_v7  ;;  %v450_v10 = vld [vmem:[%s4684_s22] sm:$0xff]  ;;  %v439_v12 = vld [vmem:[#allocation8 + $0x30] sm:$0xff]  ;;  %s371_s7 = sadd.s32 %s3295_s18, %s3294_s19  ;;  %s4396_s10 = smov [#allocation3]  }
  0xb1   : > { %414 = vst [vmem:[#allocation2 + $0x1e0] sm:$0xff] %v4395_v0  ;;  %415 = vst [vmem:[#allocation2 + $0x230] sm:$0xff] %v4395_v0  ;;  %3756 = vmatpush3.bf16.msra.mxu0 %v4698_v4  ;;  %3788 = vmatpush3.bf16.msra.mxu1 %v4698_v4  ;;  %v3303_v11 = vld [vmem:[%s4684_s22 + $0x40] sm:$0xff]  ;;  %v440_v13 = vld [vmem:[#allocation8 + $0x38] sm:$0xff]  ;;  %s3296_s2 = sshll.u32 %s371_s7, 4  ;;  %s381_s20 = sshll.u32 %s4396_s10, 4  ;;  %s4770_s20 = int_to_ptr.vmem [resolvable:$true] %s381_s20 }
  0xb2   : > { %416 = vst [vmem:[#allocation2 + $0x280] sm:$0xff] %v4395_v0  ;;  %417 = vst [vmem:[#allocation2 + $0x2d0] sm:$0xff] %v4395_v0  ;;  %3758 = vmatprep.subr.bf16.mxu0 %v4700_v6  ;;  %3790 = vmatprep.subr.bf16.mxu1 %v4700_v6  ;;  %v4716_v14 = vpack.c.bf16 %v440_v13, %v439_v12  ;;  %v441_v15 = vld [vmem:[#allocation8 + $0x40] sm:$0xff]  ;;  %v442_v16 = vld [vmem:[#allocation8 + $0x48] sm:$0xff]  ;;  %s373_s27 = scalar_lea.hbm %s6320_s1, %s3296_s2  ;;  %s3343_s6 = sshll.u32 %s4369_s30, 7 }
  0xb3   : > { %418 = vst [vmem:[#allocation2 + $0x320] sm:$0xff] %v4395_v0  ;;  %419 = vst [vmem:[#allocation2 + $0x370] sm:$0xff] %v4395_v0  ;;  %3521 = vmatprep.mubr.f32.mxu0 %v450_v10  ;;  %3565 = vmatprep.mubr.f32.mxu1 %v3303_v11  ;;  %v4722_v17 = vpack.c.bf16 %v442_v16, %v441_v15  ;;  %v443_v18 = vld [vmem:[#allocation8 + $0x50] sm:$0xff]  ;;  %v444_v19 = vld [vmem:[#allocation8 + $0x58] sm:$0xff]  ;;  %s4218_s14 = scalar_lea.hbm %s373_s27, 1024  ;;  %s4222_s25 = scalar_lea.hbm %s6320_s1, 8192 }
  0xb4   : > { %421 = vst [vmem:[#allocation2 + $0x48] sm:$0xff] %v4395_v0  ;;  %422 = vst [vmem:[#allocation2 + $0x98] sm:$0xff] %v4395_v0  ;;  %v4728_v20 = vpack.c.bf16 %v444_v19, %v443_v18  ;;  %v445_v21 = vld [vmem:[#allocation8 + $0x60] sm:$0xff]  ;;  %v446_v22 = vld [vmem:[#allocation8 + $0x68] sm:$0xff]  ;;  %p4219_p10 = scmp.ne.s32.totalorder %s373_s27, %s4218_s14  ;;  %p4223_p3 = scmp.lt.u32.totalorder %s373_s27, %s6320_s1 }
  0xb5   : > { %423 = vst [vmem:[#allocation2 + $0xe8] sm:$0xff] %v4395_v0  ;;  %424 = vst [vmem:[#allocation2 + $0x138] sm:$0xff] %v4395_v0  ;;  %3760 = vmatpush3.bf16.msra.mxu0 %v4700_v6  ;;  %3792 = vmatpush3.bf16.msra.mxu1 %v4700_v6  ;;  %v4734_v23 = vpack.c.bf16 %v446_v22, %v445_v21  ;;  %v447_v24 = vld [vmem:[#allocation8 + $0x70] sm:$0xff]  ;;  %v448_v25 = vld [vmem:[#allocation8 + $0x78] sm:$0xff]  ;;  %p4224_p7 = scmp.lt.u32.totalorder %s4222_s25, %s4218_s14  ;;  %p4226_p1 = scmp.lt.u32.totalorder %s4218_s14, %s373_s27 }
  0xb6   : > { %425 = vst [vmem:[#allocation2 + $0x188] sm:$0xff] %v4395_v0  ;;  %426 = vst [vmem:[#allocation2 + $0x1d8] sm:$0xff] %v4395_v0  ;;  %3762 = vmatprep.subr.bf16.mxu0 %v4708_v9  ;;  %3794 = vmatprep.subr.bf16.mxu1 %v4708_v9  ;;  %v4740_v26 = vpack.c.bf16 %v448_v25, %v447_v24  ;;  %v451_v27 = vld [vmem:[%s4684_s22 + $0x8] sm:$0xff]  ;;  %v452_v29 = vld [vmem:[%s4684_s22 + $0x10] sm:$0xff]  ;;  %p4220_p11 = pnand %p4219_p10, %p4022_p4 }
  0xb7   : > { %427 = vst [vmem:[#allocation2 + $0x228] sm:$0xff] %v4395_v0  ;;  %428 = vst [vmem:[#allocation2 + $0x278] sm:$0xff] %v4395_v0  ;;  %v3304_v28 = vld [vmem:[%s4684_s22 + $0x48] sm:$0xff]  ;;  %v3305_v30 = vld [vmem:[%s4684_s22 + $0x50] sm:$0xff]  ;;  %p4225_p12 = por %p4224_p7, %p4223_p3 }
  0xb8   : > { %429 = vst [vmem:[#allocation2 + $0x2c8] sm:$0xff] %v4395_v0  ;;  %430 = vst [vmem:[#allocation2 + $0x318] sm:$0xff] %v4395_v0  ;;  %v453_v31 = vld [vmem:[%s4684_s22 + $0x18] sm:$0xff]  ;;  %v454_v33 = vld [vmem:[%s4684_s22 + $0x20] sm:$0xff]  ;;  %p4221_p13 = pneg %p4220_p11 }
  0xb9   : > { %431 = vst [vmem:[#allocation2 + $0x368] sm:$0xff] %v4395_v0  ;;  %432 = vst [vmem:[#allocation2 + $0x3b8] sm:$0xff] %v4395_v0  ;;  %3764 = vmatpush3.bf16.msra.mxu0 %v4708_v9  ;;  %3796 = vmatpush3.bf16.msra.mxu1 %v4708_v9  ;;  %v3306_v32 = vld [vmem:[%s4684_s22 + $0x58] sm:$0xff]  ;;  %v3307_v34 = vld [vmem:[%s4684_s22 + $0x60] sm:$0xff]  ;;  %p4227_p2 = por %p4226_p1, %p4225_p12 }
  0xba   : > { %3766 = vmatprep.subr.bf16.mxu0 %v4716_v14  ;;  %3798 = vmatprep.subr.bf16.mxu1 %v4716_v14  ;;  %v455_v35 = vld [vmem:[%s4684_s22 + $0x28] sm:$0xff]  ;;  %v456_v37 = vld [vmem:[%s4684_s22 + $0x30] sm:$0xff]  ;;  %v457_v39 = vld [vmem:[%s4684_s22 + $0x38] sm:$0xff] }
  0xbb   : > { %v3308_v36 = vld [vmem:[%s4684_s22 + $0x68] sm:$0xff]  ;;  %v3309_v38 = vld [vmem:[%s4684_s22 + $0x70] sm:$0xff]  ;;  %v3310_v40 = vld [vmem:[%s4684_s22 + $0x78] sm:$0xff]  ;;  %p4228_p5 = pnand %p4227_p2, %p4221_p13 }
  0xbd   : > { %3768 = vmatpush3.bf16.msra.mxu0 %v4716_v14  ;;  %3800 = vmatpush3.bf16.msra.mxu1 %v4716_v14 }
  0xbe   : > { %3770 = vmatprep.subr.bf16.mxu0 %v4722_v17  ;;  %3802 = vmatprep.subr.bf16.mxu1 %v4722_v17 }
  0xc1   : > { %3772 = vmatpush3.bf16.msra.mxu0 %v4722_v17  ;;  %3804 = vmatpush3.bf16.msra.mxu1 %v4722_v17 }
  0xc2   : > { %3774 = vmatprep.subr.bf16.mxu0 %v4728_v20  ;;  %3806 = vmatprep.subr.bf16.mxu1 %v4728_v20 }
  0xc5   : > { %3776 = vmatpush3.bf16.msra.mxu0 %v4728_v20  ;;  %3808 = vmatpush3.bf16.msra.mxu1 %v4728_v20 }
  0xc6   : > { %3778 = vmatprep.subr.bf16.mxu0 %v4734_v23  ;;  %3810 = vmatprep.subr.bf16.mxu1 %v4734_v23 }
  0xc9   : > { %3780 = vmatpush3.bf16.msra.mxu0 %v4734_v23  ;;  %3812 = vmatpush3.bf16.msra.mxu1 %v4734_v23 }
  0xca   : > { %3782 = vmatprep.subr.bf16.mxu0 %v4740_v26  ;;  %3814 = vmatprep.subr.bf16.mxu1 %v4740_v26 }
  0xcd   : > { %3784 = vmatpush3.bf16.msra.mxu0 %v4740_v26  ;;  %3816 = vmatpush3.bf16.msra.mxu1 %v4740_v26 }
  0xd0   : > { %3522 = vmatmul.mubr.f32.vlgmr.msra.gmra.mrb[0].mxu0 %v451_v27  ;;  %3566 = vmatmul.mubr.f32.vlgmr.msra.gmra.mrb[0].mxu1 %v3304_v28 }
  0xd1   : > { %3524 = vmatprep.mubr.f32.mxu0 %v452_v29  ;;  %3568 = vmatprep.mubr.f32.mxu1 %v3305_v30 }
  0xd4   : > { %3525 = vmatmul.mubr.f32.gmra.mrb[2].mxu0 %v453_v31  ;;  %3569 = vmatmul.mubr.f32.gmra.mrb[2].mxu1 %v3306_v32 }
  0xd5   : > { %3527 = vmatprep.mubr.f32.mxu0 %v454_v33  ;;  %3571 = vmatprep.mubr.f32.mxu1 %v3307_v34 }
  0xd8   : > { %3528 = vmatmul.mubr.f32.gmra.mrb[4].mxu0 %v455_v35  ;;  %3572 = vmatmul.mubr.f32.gmra.mrb[4].mxu1 %v3308_v36 }
  0xd9   : > { %3530 = vmatprep.mubr.f32.mxu0 %v456_v37  ;;  %3574 = vmatprep.mubr.f32.mxu1 %v3309_v38 }
  0xdc   : > { %3531 = vmatmul.mubr.f32.gmra.mrb[6].mxu0 %v457_v39  ;;  %3575 = vmatmul.mubr.f32.gmra.mrb[6].mxu1 %v3310_v40 }
  0xdd   : > { %4231 = shalt.err (!%p4228_p5)  }
  0xde   : > { %s4232_s19 = scalar_lea.vmem %s4770_s20, 1024  ;;  %s4238_s7 = scalar_lea.vmem %s4770_s20, 2048 }
  0xdf   : > { %p4233_p9 = scmp.ne.s32.totalorder %s4770_s20, %s4232_s19  ;;  %p4239_p11 = scmp.lt.s32.totalorder %s4770_s20, %s4770_s20 }
  0xe0   : > { %p4240_p3 = scmp.lt.s32.totalorder %s4238_s7, %s4232_s19 }
  0xe1   : > { %p4234_p0 = pnand %p4233_p9, %p4022_p4 }
  0xe2   : > { %p4241_p7 = por %p4240_p3, %p4239_p11 }
  0xe3   : > { %p4235_p10 = pneg %p4234_p0 }
  0xe5   : > { %p4242_p12 = pnand %p4241_p7, %p4235_p10 }
  0xe7   : > { %4245 = shalt.err (!%p4242_p12)  }
  0xe8   : > { %3992 = dma.hbm_to_vmem [thread:$0]  (%p4022_p4), %s373_s27, 1024, %s4770_s20, [#allocation4] }
  0xe9   : > { %s3196_s2 = sadd.s32 %s3343_s6, %s3295_s18  ;;  %p4023_p1 = scmp.lt.s32.totalorder %s4369_s30, 1 }
  0xea   : > { %s3301_s5 = sshll.u32 %s3196_s2, 4  ;;  %s4397_s23 = smov [#allocation3 + $0x40]  }
  0xeb   : > { %s3198_s14 = scalar_lea.hbm %s6320_s1, %s3301_s5  ;;  %s404_s21 = sshll.u32 %s4397_s23, 4  ;;  %s405_s21 = int_to_ptr.vmem [resolvable:$true] %s404_s21 }
  0xec   : > { %s3199_s13 = scalar_lea.hbm %s3198_s14, 2048  ;;  %s4274_s4 = scalar_lea.hbm %s3198_s14, 3072 }
  0xed   : > { %p4247_p2 = scmp.ne.s32.totalorder %s3199_s13, %s4274_s4  ;;  %p4251_p4 = scmp.lt.u32.totalorder %s3199_s13, %s6320_s1 }
  0xee   : > { %p4252_p0 = scmp.lt.u32.totalorder %s4222_s25, %s4274_s4  ;;  %p4254_p11 = scmp.lt.u32.totalorder %s4274_s4, %s3199_s13 }
  0xef   : > { %p4248_p5 = pnand %p4247_p2, %p4023_p1 }
  0xf0   : > { %p4253_p10 = por %p4252_p0, %p4251_p4 }
  0xf1   : > { %p4249_p9 = pneg %p4248_p5 }
  0xf2   : > { %p4255_p3 = por %p4254_p11, %p4253_p10 }
  0xf4   : > { %p4256_p7 = pnand %p4255_p3, %p4249_p9 }
  0xf6   : > { %4259 = shalt.err (!%p4256_p7)  }
  0xf7   : > { %s4260_s17 = scalar_lea.vmem %s405_s21, 1024  ;;  %p4267_p13 = scmp.lt.s32.totalorder %s405_s21, %s4770_s20 }
  0xf8   : > { %p4261_p12 = scmp.ne.s32.totalorder %s405_s21, %s4260_s17  ;;  %p4268_p6 = scmp.lt.s32.totalorder %s4238_s7, %s4260_s17 }
  0xfa   : > { %p4262_p2 = pnand %p4261_p12, %p4023_p1  ;;  %p4269_p8 = por %p4268_p6, %p4267_p13 }
  0xfc   : > { %p4263_p5 = pneg %p4262_p2 }
  0xfe   : > { %p4270_p0 = pnand %p4269_p8, %p4263_p5 }
 0x100   : > { %4273 = shalt.err (!%p4270_p0)  }
 0x101   : > { %3994 = dma.hbm_to_vmem [thread:$0]  (%p4023_p1), %s3199_s13, 1024, %s405_s21, [#allocation4 + $0x1]  ;;  %vm610_vm0 = vcmask 1040384   ;;  %vm644_vm1 = vcmask 1046528  }
 0x102   : > { %s6529_s2 = sld [smem:[#allocation61_spill]]  ;;  %s4876_s20 = scalar_lea.vmem [#allocation13], %s3286_s24 }
 0x103   : > { %p6530_p8 = scmp.le.s32.totalorder %s4369_s30, 0 }
 0x104   : > { %3818 = vmatprep.subr.bf16.mxu0 (!%p6530_p8), %v4698_v4  ;;  %3945 = vmatprep.subr.bf16.mxu1 (!%p6530_p8), %v4698_v4 }
 0x108   : > { %v4824_v41 = vld [vmem:[%s6529_s2] ss:$0 sm:$0xff] }
 0x1a3   : > { %v3523_v42 = vpop.f32.mrb[0].mxu0  ;;  %v3567_v43 = vpop.f32.mrb[0].mxu1 }
 0x1a4   : > { %v536_v44 = vadd.f32 %v3523_v42, %v4824_v41  ;;  %v743_v45 = vadd.f32 %v3567_v43, %v4824_v41  ;;  %v530_v46 = vpop.f32.mrb[1].mxu0  ;;  %v737_v47 = vpop.f32.mrb[1].mxu1 }
 0x1a5   : > { %v531_v48 = vadd.f32 %v4824_v41, %v530_v46  ;;  %v738_v49 = vadd.f32 %v4824_v41, %v737_v47 }
 0x1a6   : > { %v570_v50 = vmax.f32 %v536_v44, 0.0  ;;  %v777_v51 = vmax.f32 %v743_v45, 0.0 }
 0x1a7   : > { %v569_v52 = vmax.f32 %v531_v48, 0.0  ;;  %v776_v53 = vmax.f32 %v738_v49, 0.0  ;;  %v3526_v54 = vpop.f32.mrb[2].mxu0  ;;  %v3570_v55 = vpop.f32.mrb[2].mxu1 }
 0x1a8   : > { %579 = vst [vmem:[#allocation2 + $0x1a0] sm:$0xff] %v570_v50  ;;  %v595_v56 = vrot.slane %v570_v50, 7  ;;  %v629_v57 = vrot.slane %v570_v50, 1  ;;  %786 = vst [vmem:[#allocation2 + $0x1f0] sm:$0xff] %v777_v51  ;;  %v802_v58 = vrot.slane %v777_v51, 7  ;;  %v835_v59 = vrot.slane %v777_v51, 1 }
 0x1a9   : > { %v540_v60 = vpop.f32.mrb[3].mxu0  ;;  %v747_v61 = vpop.f32.mrb[3].mxu1  ;;  %578 = vst [vmem:[#allocation2 + $0x198] sm:$0xff] %v569_v52  ;;  %v594_v62 = vrot.slane %v569_v52, 7  ;;  %v628_v63 = vrot.slane %v569_v52, 1  ;;  %785 = vst [vmem:[#allocation2 + $0x1e8] sm:$0xff] %v776_v53  ;;  %v546_v16 = vadd.f32 %v3526_v54, %v4824_v41  ;;  %v753_v18 = vadd.f32 %v3570_v55, %v4824_v41 }
 0x1aa   : > { %v801_v0 = vrot.slane %v776_v53, 7  ;;  %v834_v1 = vrot.slane %v776_v53, 1  ;;  %v612_v2 = vsel %vm610_vm0, 0.0, %v595_v56  ;;  %v646_v3 = vsel %vm644_vm1, %v629_v57, 0.0 }
 0x1ab   : > { %v818_v5 = vsel %vm610_vm0, 0.0, %v802_v58  ;;  %v851_v7 = vsel %vm644_vm1, %v835_v59, 0.0  ;;  %621 = vst [vmem:[#allocation2 + $0x60] sm:$0xff] %v612_v2  ;;  %655 = vst [vmem:[#allocation2 + $0x2e0] sm:$0xff] %v646_v3  ;;  %v611_v8 = vsel %vm610_vm0, 0.0, %v594_v62  ;;  %v645_v10 = vsel %vm644_vm1, %v628_v63, 0.0 }
 0x1ac   : > { %827 = vst [vmem:[#allocation2 + $0xb0] sm:$0xff] %v818_v5  ;;  %860 = vst [vmem:[#allocation2 + $0x330] sm:$0xff] %v851_v7  ;;  %v817_v11 = vsel %vm610_vm0, 0.0, %v801_v0  ;;  %v850_v12 = vsel %vm644_vm1, %v834_v1, 0.0  ;;  %v3529_v13 = vpop.f32.mrb[4].mxu0  ;;  %v3573_v15 = vpop.f32.mrb[4].mxu1  ;;  %v541_v19 = vadd.f32 %v4824_v41, %v540_v60  ;;  %v748_v21 = vadd.f32 %v4824_v41, %v747_v61 }
 0x1ad   : > { %620 = vst [vmem:[#allocation2 + $0x58] sm:$0xff] %v611_v8  ;;  %654 = vst [vmem:[#allocation2 + $0x2d8] sm:$0xff] %v645_v10  ;;  %v550_v22 = vpop.f32.mrb[5].mxu0  ;;  %v757_v24 = vpop.f32.mrb[5].mxu1  ;;  %v556_v25 = vadd.f32 %v3529_v13, %v4824_v41  ;;  %v763_v27 = vadd.f32 %v3573_v15, %v4824_v41  ;;  %v572_v30 = vmax.f32 %v546_v16, 0.0  ;;  %v779_v31 = vmax.f32 %v753_v18, 0.0 }
 0x1ae   : > { %826 = vst [vmem:[#allocation2 + $0xa8] sm:$0xff] %v817_v11  ;;  %859 = vst [vmem:[#allocation2 + $0x328] sm:$0xff] %v850_v12  ;;  %v551_v28 = vadd.f32 %v4824_v41, %v550_v22  ;;  %v758_v29 = vadd.f32 %v4824_v41, %v757_v24  ;;  %v571_v32 = vmax.f32 %v541_v19, 0.0  ;;  %v778_v33 = vmax.f32 %v748_v21, 0.0 }
 0x1af   : > { %v574_v34 = vmax.f32 %v556_v25, 0.0  ;;  %v781_v35 = vmax.f32 %v763_v27, 0.0  ;;  %v3532_v38 = vpop.f32.mrb[6].mxu0  ;;  %v3576_v39 = vpop.f32.mrb[6].mxu1  ;;  %581 = vst [vmem:[#allocation2 + $0x1b0] sm:$0xff] %v572_v30  ;;  %v597_v40 = vrot.slane %v572_v30, 7 }
 0x1b0   : > { %v573_v36 = vmax.f32 %v551_v28, 0.0  ;;  %v780_v37 = vmax.f32 %v758_v29, 0.0  ;;  %v631_v42 = vrot.slane %v572_v30, 1  ;;  %788 = vst [vmem:[#allocation2 + $0x200] sm:$0xff] %v779_v31  ;;  %v804_v43 = vrot.slane %v779_v31, 7  ;;  %580 = vst [vmem:[#allocation2 + $0x1a8] sm:$0xff] %v571_v32 }
 0x1b1   : > { %v837_v44 = vrot.slane %v779_v31, 1  ;;  %787 = vst [vmem:[#allocation2 + $0x1f8] sm:$0xff] %v778_v33  ;;  %v560_v45 = vpop.f32.mrb[7].mxu0  ;;  %v767_v46 = vpop.f32.mrb[7].mxu1  ;;  %v596_v47 = vrot.slane %v571_v32, 7  ;;  %v630_v48 = vrot.slane %v571_v32, 1  ;;  %v566_v15 = vadd.f32 %v3532_v38, %v4824_v41 }
 0x1b2   : > { %v803_v49 = vrot.slane %v778_v33, 7  ;;  %v836_v50 = vrot.slane %v778_v33, 1  ;;  %583 = vst [vmem:[#allocation2 + $0x1c0] sm:$0xff] %v574_v34  ;;  %790 = vst [vmem:[#allocation2 + $0x210] sm:$0xff] %v781_v35  ;;  %v614_v51 = vsel %vm610_vm0, 0.0, %v597_v40  ;;  %v648_v52 = vsel %vm644_vm1, %v631_v42, 0.0 }
 0x1b3   : > { %582 = vst [vmem:[#allocation2 + $0x1b8] sm:$0xff] %v573_v36  ;;  %789 = vst [vmem:[#allocation2 + $0x208] sm:$0xff] %v780_v37  ;;  %v820_v53 = vsel %vm610_vm0, 0.0, %v804_v43  ;;  %v853_v54 = vsel %vm644_vm1, %v837_v44, 0.0  ;;  %v613_v55 = vsel %vm610_vm0, 0.0, %v596_v47  ;;  %v647_v56 = vsel %vm644_vm1, %v630_v48, 0.0 }
 0x1b4   : > { %623 = vst [vmem:[#allocation2 + $0x70] sm:$0xff] %v614_v51  ;;  %657 = vst [vmem:[#allocation2 + $0x2f0] sm:$0xff] %v648_v52  ;;  %v819_v57 = vsel %vm610_vm0, 0.0, %v803_v49  ;;  %v852_v58 = vsel %vm644_vm1, %v836_v50, 0.0  ;;  %v599_v59 = vrot.slane %v574_v34, 7  ;;  %v633_v60 = vrot.slane %v574_v34, 1 }
 0x1b5   : > { %829 = vst [vmem:[#allocation2 + $0xc0] sm:$0xff] %v820_v53  ;;  %862 = vst [vmem:[#allocation2 + $0x340] sm:$0xff] %v853_v54  ;;  %v806_v61 = vrot.slane %v781_v35, 7  ;;  %v839_v62 = vrot.slane %v781_v35, 1  ;;  %v598_v63 = vrot.slane %v573_v36, 7  ;;  %v632_v0 = vrot.slane %v573_v36, 1 }
 0x1b6   : > { %622 = vst [vmem:[#allocation2 + $0x68] sm:$0xff] %v613_v55  ;;  %656 = vst [vmem:[#allocation2 + $0x2e8] sm:$0xff] %v647_v56  ;;  %v805_v1 = vrot.slane %v780_v37, 7  ;;  %v838_v2 = vrot.slane %v780_v37, 1  ;;  %v616_v3 = vsel %vm610_vm0, 0.0, %v599_v59  ;;  %v650_v5 = vsel %vm644_vm1, %v633_v60, 0.0 }
 0x1b7   : > { %828 = vst [vmem:[#allocation2 + $0xb8] sm:$0xff] %v819_v57  ;;  %861 = vst [vmem:[#allocation2 + $0x338] sm:$0xff] %v852_v58  ;;  %v822_v7 = vsel %vm610_vm0, 0.0, %v806_v61  ;;  %v855_v8 = vsel %vm644_vm1, %v839_v62, 0.0  ;;  %v615_v10 = vsel %vm610_vm0, 0.0, %v598_v63  ;;  %v649_v11 = vsel %vm644_vm1, %v632_v0, 0.0 }
 0x1b8   : > { %625 = vst [vmem:[#allocation2 + $0x80] sm:$0xff] %v616_v3  ;;  %659 = vst [vmem:[#allocation2 + $0x300] sm:$0xff] %v650_v5  ;;  %v821_v12 = vsel %vm610_vm0, 0.0, %v805_v1  ;;  %v854_v13 = vsel %vm644_vm1, %v838_v2, 0.0  ;;  %v773_v16 = vadd.f32 %v3576_v39, %v4824_v41  ;;  %v561_v18 = vadd.f32 %v4824_v41, %v560_v45 }
 0x1b9   : > { %831 = vst [vmem:[#allocation2 + $0xd0] sm:$0xff] %v822_v7  ;;  %864 = vst [vmem:[#allocation2 + $0x350] sm:$0xff] %v855_v8  ;;  %v768_v19 = vadd.f32 %v4824_v41, %v767_v46  ;;  %v576_v21 = vmax.f32 %v566_v15, 0.0 }
 0x1ba   : > { %624 = vst [vmem:[#allocation2 + $0x78] sm:$0xff] %v615_v10  ;;  %658 = vst [vmem:[#allocation2 + $0x2f8] sm:$0xff] %v649_v11  ;;  %v783_v22 = vmax.f32 %v773_v16, 0.0  ;;  %v575_v24 = vmax.f32 %v561_v18, 0.0 }
 0x1bb   : > { %830 = vst [vmem:[#allocation2 + $0xc8] sm:$0xff] %v821_v12  ;;  %863 = vst [vmem:[#allocation2 + $0x348] sm:$0xff] %v854_v13  ;;  %v782_v25 = vmax.f32 %v768_v19, 0.0  ;;  %v601_v27 = vrot.slane %v576_v21, 7  ;;  %v635_v28 = vrot.slane %v576_v21, 1  ;;  %869 = sbr.rel (%p6530_p8) target bundleno = 712 (0x2c8), region = 84 }
 0x1bc   : > { %585 = vst [vmem:[#allocation2 + $0x1d0] sm:$0xff] %v576_v21  ;;  %792 = vst [vmem:[#allocation2 + $0x220] sm:$0xff] %v783_v22  ;;  %v808_v29 = vrot.slane %v783_v22, 7  ;;  %v841_v30 = vrot.slane %v783_v22, 1  ;;  %v600_v31 = vrot.slane %v575_v24, 7  ;;  %v634_v32 = vrot.slane %v575_v24, 1 }
 0x1bd   : > { %584 = vst [vmem:[#allocation2 + $0x1c8] sm:$0xff] %v575_v24  ;;  %791 = vst [vmem:[#allocation2 + $0x218] sm:$0xff] %v782_v25  ;;  %v807_v33 = vrot.slane %v782_v25, 7  ;;  %v840_v34 = vrot.slane %v782_v25, 1  ;;  %v618_v35 = vsel %vm610_vm0, 0.0, %v601_v27  ;;  %v652_v36 = vsel %vm644_vm1, %v635_v28, 0.0 }
 0x1be   : > { %v824_v37 = vsel %vm610_vm0, 0.0, %v808_v29  ;;  %v857_v38 = vsel %vm644_vm1, %v841_v30, 0.0  ;;  %627 = vst [vmem:[#allocation2 + $0x90] sm:$0xff] %v618_v35  ;;  %661 = vst [vmem:[#allocation2 + $0x310] sm:$0xff] %v652_v36  ;;  %v617_v39 = vsel %vm610_vm0, 0.0, %v600_v31  ;;  %v651_v40 = vsel %vm644_vm1, %v634_v32, 0.0 }
 0x1bf   : > { %833 = vst [vmem:[#allocation2 + $0xe0] sm:$0xff] %v824_v37  ;;  %866 = vst [vmem:[#allocation2 + $0x360] sm:$0xff] %v857_v38  ;;  %v823_v42 = vsel %vm610_vm0, 0.0, %v807_v33  ;;  %v856_v43 = vsel %vm644_vm1, %v840_v34, 0.0 }
 0x1c0   : > { %626 = vst [vmem:[#allocation2 + $0x88] sm:$0xff] %v617_v39  ;;  %660 = vst [vmem:[#allocation2 + $0x308] sm:$0xff] %v651_v40 }
 0x1c1   : > { %832 = vst [vmem:[#allocation2 + $0xd8] sm:$0xff] %v823_v42  ;;  %865 = vst [vmem:[#allocation2 + $0x358] sm:$0xff] %v856_v43 }
 0x1c2   : > { %4347 = dma.done.wait [#allocation4], 1024 }
 0x1c3   : > { %4348 = vsyncadd [#allocation4], 4294966272  ;;  %3820 = vmatpush3.bf16.msra.mxu0 %v4698_v4  ;;  %3953 = vmatpush3.bf16.msra.mxu1 %v4698_v4  ;;  %v874_v44 = vld [vmem:[#allocation3] sm:$0xff]  ;;  %v875_v46 = vld [vmem:[#allocation3 + $0x8] sm:$0xff] }
 0x1c4   : > { %3822 = vmatprep.subr.bf16.mxu0 %v4700_v6  ;;  %3946 = vmatprep.subr.bf16.mxu1 %v4700_v6  ;;  %v878_v45 = vld [vmem:[#allocation3 + $0x20] sm:$0xff]  ;;  %v879_v47 = vld [vmem:[#allocation3 + $0x28] sm:$0xff]  ;;  %v876_v48 = vld [vmem:[#allocation3 + $0x10] sm:$0xff] }
 0x1c5   : > { %3609 = vmatprep.mubr.f32.mxu0 %v874_v44  ;;  %3615 = vmatprep.mubr.f32.mxu1 %v878_v45  ;;  %v880_v49 = vld [vmem:[#allocation3 + $0x30] sm:$0xff]  ;;  %v877_v50 = vld [vmem:[#allocation3 + $0x18] sm:$0xff] }
 0x1c6   : > { %v881_v51 = vld [vmem:[#allocation3 + $0x38] sm:$0xff] }
 0x1c7   : > { %3824 = vmatpush3.bf16.msra.mxu0 %v4700_v6  ;;  %3954 = vmatpush3.bf16.msra.mxu1 %v4700_v6 }
 0x1c8   : > { %3826 = vmatprep.subr.bf16.mxu0 %v4708_v9  ;;  %3947 = vmatprep.subr.bf16.mxu1 %v4708_v9 }
 0x1cb   : > { %3828 = vmatpush3.bf16.msra.mxu0 %v4708_v9  ;;  %3955 = vmatpush3.bf16.msra.mxu1 %v4708_v9 }
 0x1cc   : > { %3830 = vmatprep.subr.bf16.mxu0 %v4716_v14  ;;  %3948 = vmatprep.subr.bf16.mxu1 %v4716_v14 }
 0x1cf   : > { %3832 = vmatpush3.bf16.msra.mxu0 %v4716_v14  ;;  %3956 = vmatpush3.bf16.msra.mxu1 %v4716_v14 }
 0x1d0   : > { %3834 = vmatprep.subr.bf16.mxu0 %v4722_v17  ;;  %3949 = vmatprep.subr.bf16.mxu1 %v4722_v17 }
 0x1d3   : > { %3836 = vmatpush3.bf16.msra.mxu0 %v4722_v17  ;;  %3957 = vmatpush3.bf16.msra.mxu1 %v4722_v17 }
 0x1d4   : > { %3838 = vmatprep.subr.bf16.mxu0 %v4728_v20  ;;  %3950 = vmatprep.subr.bf16.mxu1 %v4728_v20 }
 0x1d7   : > { %3840 = vmatpush3.bf16.msra.mxu0 %v4728_v20  ;;  %3958 = vmatpush3.bf16.msra.mxu1 %v4728_v20 }
 0x1d8   : > { %3842 = vmatprep.subr.bf16.mxu0 %v4734_v23  ;;  %3951 = vmatprep.subr.bf16.mxu1 %v4734_v23 }
 0x1db   : > { %3844 = vmatpush3.bf16.msra.mxu0 %v4734_v23  ;;  %3959 = vmatpush3.bf16.msra.mxu1 %v4734_v23 }
 0x1dc   : > { %3846 = vmatprep.subr.bf16.mxu0 %v4740_v26  ;;  %3952 = vmatprep.subr.bf16.mxu1 %v4740_v26 }
 0x1df   : > { %3848 = vmatpush3.bf16.msra.mxu0 %v4740_v26  ;;  %3960 = vmatpush3.bf16.msra.mxu1 %v4740_v26 }
 0x1e2   : > { %3610 = vmatmul.mubr.f32.vlgmr.msra.gmra.mrb[0].mxu0 %v875_v46  ;;  %3616 = vmatmul.mubr.f32.vlgmr.msra.gmra.mrb[0].mxu1 %v879_v47 }
 0x1e3   : > { %3612 = vmatprep.mubr.f32.mxu0 %v876_v48  ;;  %3618 = vmatprep.mubr.f32.mxu1 %v880_v49 }
 0x1e6   : > { %3613 = vmatmul.mubr.f32.gmra.mrb[2].mxu0 %v877_v50  ;;  %3619 = vmatmul.mubr.f32.gmra.mrb[2].mxu1 %v881_v51 }
 0x2b5   : > { %v3611_v52 = vpop.f32.mrb[0].mxu0  ;;  %v3617_v53 = vpop.f32.mrb[0].mxu1 }
 0x2b6   : > { %v954_v54 = vadd.f32 %v3611_v52, %v4824_v41  ;;  %v974_v55 = vadd.f32 %v3617_v53, %v4824_v41  ;;  %v948_v56 = vpop.f32.mrb[1].mxu0  ;;  %v968_v57 = vpop.f32.mrb[1].mxu1 }
 0x2b7   : > { %v949_v58 = vadd.f32 %v4824_v41, %v948_v56  ;;  %v969_v59 = vadd.f32 %v4824_v41, %v968_v57 }
 0x2b8   : > { %v988_v60 = vmax.f32 %v954_v54, 0.0  ;;  %v992_v61 = vmax.f32 %v974_v55, 0.0 }
 0x2b9   : > { %v987_v62 = vmax.f32 %v949_v58, 0.0  ;;  %v991_v63 = vmax.f32 %v969_v59, 0.0  ;;  %v3614_v0 = vpop.f32.mrb[2].mxu0  ;;  %v3620_v1 = vpop.f32.mrb[2].mxu1 }
 0x2ba   : > { %997 = vst [vmem:[#allocation2 + $0x150] sm:$0xff] %v988_v60  ;;  %v1013_v2 = vrot.slane %v988_v60, 7  ;;  %v1046_v3 = vrot.slane %v988_v60, 1  ;;  %1001 = vst [vmem:[#allocation2 + $0x170] sm:$0xff] %v992_v61  ;;  %v1017_v5 = vrot.slane %v992_v61, 7  ;;  %v1050_v7 = vrot.slane %v992_v61, 1 }
 0x2bb   : > { %v958_v8 = vpop.f32.mrb[3].mxu0  ;;  %v978_v10 = vpop.f32.mrb[3].mxu1  ;;  %996 = vst [vmem:[#allocation2 + $0x148] sm:$0xff] %v987_v62  ;;  %v1012_v11 = vrot.slane %v987_v62, 7  ;;  %v1045_v12 = vrot.slane %v987_v62, 1  ;;  %1000 = vst [vmem:[#allocation2 + $0x168] sm:$0xff] %v991_v63  ;;  %v964_v28 = vadd.f32 %v3614_v0, %v4824_v41  ;;  %v984_v29 = vadd.f32 %v3620_v1, %v4824_v41 }
 0x2bc   : > { %v1016_v13 = vrot.slane %v991_v63, 7  ;;  %v1049_v15 = vrot.slane %v991_v63, 1  ;;  %v1029_v16 = vsel %vm610_vm0, 0.0, %v1013_v2  ;;  %v1062_v18 = vsel %vm644_vm1, %v1046_v3, 0.0 }
 0x2bd   : > { %v1033_v19 = vsel %vm610_vm0, 0.0, %v1017_v5  ;;  %v1066_v21 = vsel %vm644_vm1, %v1050_v7, 0.0  ;;  %1038 = vst [vmem:[#allocation2 + $0x10] sm:$0xff] %v1029_v16  ;;  %1071 = vst [vmem:[#allocation2 + $0x290] sm:$0xff] %v1062_v18  ;;  %v1028_v22 = vsel %vm610_vm0, 0.0, %v1012_v11  ;;  %v1061_v24 = vsel %vm644_vm1, %v1045_v12, 0.0 }
 0x2be   : > { %1042 = vst [vmem:[#allocation2 + $0x30] sm:$0xff] %v1033_v19  ;;  %1075 = vst [vmem:[#allocation2 + $0x2b0] sm:$0xff] %v1066_v21  ;;  %v1032_v25 = vsel %vm610_vm0, 0.0, %v1016_v13  ;;  %v1065_v27 = vsel %vm644_vm1, %v1049_v15, 0.0  ;;  %v959_v30 = vadd.f32 %v4824_v41, %v958_v8  ;;  %v979_v31 = vadd.f32 %v4824_v41, %v978_v10 }
 0x2bf   : > { %1037 = vst [vmem:[#allocation2 + $0x8] sm:$0xff] %v1028_v22  ;;  %1070 = vst [vmem:[#allocation2 + $0x288] sm:$0xff] %v1061_v24  ;;  %v990_v32 = vmax.f32 %v964_v28, 0.0  ;;  %v994_v33 = vmax.f32 %v984_v29, 0.0 }
 0x2c0   : > { %1041 = vst [vmem:[#allocation2 + $0x28] sm:$0xff] %v1032_v25  ;;  %1074 = vst [vmem:[#allocation2 + $0x2a8] sm:$0xff] %v1065_v27  ;;  %v989_v34 = vmax.f32 %v959_v30, 0.0  ;;  %v993_v35 = vmax.f32 %v979_v31, 0.0 }
 0x2c1   : > { %999 = vst [vmem:[#allocation2 + $0x160] sm:$0xff] %v990_v32  ;;  %v1015_v36 = vrot.slane %v990_v32, 7  ;;  %v1048_v37 = vrot.slane %v990_v32, 1  ;;  %1003 = vst [vmem:[#allocation2 + $0x180] sm:$0xff] %v994_v33  ;;  %v1019_v38 = vrot.slane %v994_v33, 7  ;;  %v1052_v39 = vrot.slane %v994_v33, 1 }
 0x2c2   : > { %998 = vst [vmem:[#allocation2 + $0x158] sm:$0xff] %v989_v34  ;;  %1002 = vst [vmem:[#allocation2 + $0x178] sm:$0xff] %v993_v35  ;;  %v1014_v40 = vrot.slane %v989_v34, 7  ;;  %v1047_v42 = vrot.slane %v989_v34, 1  ;;  %v1018_v43 = vrot.slane %v993_v35, 7  ;;  %v1051_v44 = vrot.slane %v993_v35, 1 }
 0x2c3   : > { %v1031_v45 = vsel %vm610_vm0, 0.0, %v1015_v36  ;;  %v1064_v46 = vsel %vm644_vm1, %v1048_v37, 0.0  ;;  %v1035_v47 = vsel %vm610_vm0, 0.0, %v1019_v38  ;;  %v1068_v48 = vsel %vm644_vm1, %v1052_v39, 0.0 }
 0x2c4   : > { %1040 = vst [vmem:[#allocation2 + $0x20] sm:$0xff] %v1031_v45  ;;  %1073 = vst [vmem:[#allocation2 + $0x2a0] sm:$0xff] %v1064_v46  ;;  %v1030_v49 = vsel %vm610_vm0, 0.0, %v1014_v40  ;;  %v1063_v50 = vsel %vm644_vm1, %v1047_v42, 0.0  ;;  %v1034_v51 = vsel %vm610_vm0, 0.0, %v1018_v43  ;;  %v1067_v52 = vsel %vm644_vm1, %v1051_v44, 0.0 }
 0x2c5   : > { %1044 = vst [vmem:[#allocation2 + $0x40] sm:$0xff] %v1035_v47  ;;  %1077 = vst [vmem:[#allocation2 + $0x2c0] sm:$0xff] %v1068_v48 }
 0x2c6   : > { %1039 = vst [vmem:[#allocation2 + $0x18] sm:$0xff] %v1030_v49  ;;  %1072 = vst [vmem:[#allocation2 + $0x298] sm:$0xff] %v1063_v50 }
 0x2c7   : > { %1043 = vst [vmem:[#allocation2 + $0x38] sm:$0xff] %v1034_v51  ;;  %1076 = vst [vmem:[#allocation2 + $0x2b8] sm:$0xff] %v1067_v52 }
 0x2c8 PF: > { %p3312_p6 = scmp.ne.s32.totalorder %s4369_s30, 0 }
 0x2c9   : > { %v4398_v53 = vmov (!%p3312_p6), 0.0  }
 0x2ca   : > { %1081 = sbr.rel (%p3312_p6) target bundleno = 726 (0x2d6), region = 88  ;;  %1083 = vst [vmem:[#allocation2 + $0x8] sm:$0xff] (!%p3312_p6), %v4398_v53  ;;  %1084 = vst [vmem:[#allocation2 + $0x10] sm:$0xff] (!%p3312_p6), %v4398_v53 }
 0x2cb   : > { %1085 = vst [vmem:[#allocation2 + $0x18] sm:$0xff] (!%p3312_p6), %v4398_v53  ;;  %1086 = vst [vmem:[#allocation2 + $0x20] sm:$0xff] (!%p3312_p6), %v4398_v53 }
 0x2cc   : > { %1087 = vst [vmem:[#allocation2 + $0x28] sm:$0xff] (!%p3312_p6), %v4398_v53  ;;  %1088 = vst [vmem:[#allocation2 + $0x30] sm:$0xff] (!%p3312_p6), %v4398_v53 }
 0x2cd   : > { %1089 = vst [vmem:[#allocation2 + $0x38] sm:$0xff] (!%p3312_p6), %v4398_v53  ;;  %1090 = vst [vmem:[#allocation2 + $0x40] sm:$0xff] (!%p3312_p6), %v4398_v53 }
 0x2ce   : > { %1091 = vst [vmem:[#allocation2 + $0x148] sm:$0xff] (!%p3312_p6), %v4398_v53  ;;  %1092 = vst [vmem:[#allocation2 + $0x150] sm:$0xff] (!%p3312_p6), %v4398_v53 }
 0x2cf   : > { %1093 = vst [vmem:[#allocation2 + $0x158] sm:$0xff] (!%p3312_p6), %v4398_v53  ;;  %1094 = vst [vmem:[#allocation2 + $0x160] sm:$0xff] (!%p3312_p6), %v4398_v53 }
 0x2d0   : > { %1095 = vst [vmem:[#allocation2 + $0x168] sm:$0xff] (!%p3312_p6), %v4398_v53  ;;  %1096 = vst [vmem:[#allocation2 + $0x170] sm:$0xff] (!%p3312_p6), %v4398_v53 }
 0x2d1   : > { %1097 = vst [vmem:[#allocation2 + $0x178] sm:$0xff] %v4398_v53  ;;  %1098 = vst [vmem:[#allocation2 + $0x180] sm:$0xff] %v4398_v53 }
 0x2d2   : > { %1099 = vst [vmem:[#allocation2 + $0x288] sm:$0xff] %v4398_v53  ;;  %1100 = vst [vmem:[#allocation2 + $0x290] sm:$0xff] %v4398_v53 }
 0x2d3   : > { %1101 = vst [vmem:[#allocation2 + $0x298] sm:$0xff] %v4398_v53  ;;  %1102 = vst [vmem:[#allocation2 + $0x2a0] sm:$0xff] %v4398_v53 }
 0x2d4   : > { %1103 = vst [vmem:[#allocation2 + $0x2a8] sm:$0xff] %v4398_v53  ;;  %1104 = vst [vmem:[#allocation2 + $0x2b0] sm:$0xff] %v4398_v53 }
 0x2d5   : > { %1105 = vst [vmem:[#allocation2 + $0x2b8] sm:$0xff] %v4398_v53  ;;  %1106 = vst [vmem:[#allocation2 + $0x2c0] sm:$0xff] %v4398_v53 }
 0x2d6 PF: > { %p6531_p13 = scmp.ge.s32.totalorder %s4369_s30, 1 }
 0x2d7   : > { %3850 = vmatprep.subr.bf16.mxu0 (!%p6531_p13), %v4698_v4  ;;  %3961 = vmatprep.subr.bf16.mxu1 (!%p6531_p13), %v4698_v4 }
 0x2d8   : > { %1109 = sbr.rel (%p6531_p13) target bundleno = 997 (0x3e5), region = 92 }
 0x2df   : > { %4349 = dma.done.wait [#allocation4 + $0x1], 1024 }
 0x2e0   : > { %4350 = vsyncadd [#allocation4 + $0x1], 4294966272  ;;  %3852 = vmatpush3.bf16.msra.mxu0 %v4698_v4  ;;  %3969 = vmatpush3.bf16.msra.mxu1 %v4698_v4  ;;  %v1116_v54 = vld [vmem:[#allocation3 + $0x40] sm:$0xff]  ;;  %v1117_v4 = vld [vmem:[#allocation3 + $0x48] sm:$0xff] }
 0x2e1   : > { %3854 = vmatprep.subr.bf16.mxu0 %v4700_v6  ;;  %3962 = vmatprep.subr.bf16.mxu1 %v4700_v6  ;;  %v1120_v55 = vld [vmem:[#allocation3 + $0x60] sm:$0xff] }
 0x2e2   : > { %3653 = vmatprep.mubr.f32.mxu0 %v1116_v54  ;;  %3659 = vmatprep.mubr.f32.mxu1 %v1120_v55 }
 0x2e4   : > { %3856 = vmatpush3.bf16.msra.mxu0 %v4700_v6  ;;  %3970 = vmatpush3.bf16.msra.mxu1 %v4700_v6  ;;  %v1121_v6 = vld [vmem:[#allocation3 + $0x68] sm:$0xff] }
 0x2e5   : > { %3858 = vmatprep.subr.bf16.mxu0 %v4708_v9  ;;  %3963 = vmatprep.subr.bf16.mxu1 %v4708_v9 }
 0x2e8   : > { %3860 = vmatpush3.bf16.msra.mxu0 %v4708_v9  ;;  %3971 = vmatpush3.bf16.msra.mxu1 %v4708_v9  ;;  %v1118_v9 = vld [vmem:[#allocation3 + $0x50] sm:$0xff] }
 0x2e9   : > { %3862 = vmatprep.subr.bf16.mxu0 %v4716_v14  ;;  %3964 = vmatprep.subr.bf16.mxu1 %v4716_v14 }
 0x2ec   : > { %3864 = vmatpush3.bf16.msra.mxu0 %v4716_v14  ;;  %3972 = vmatpush3.bf16.msra.mxu1 %v4716_v14  ;;  %v1122_v14 = vld [vmem:[#allocation3 + $0x70] sm:$0xff] }
 0x2ed   : > { %3866 = vmatprep.subr.bf16.mxu0 %v4722_v17  ;;  %3965 = vmatprep.subr.bf16.mxu1 %v4722_v17 }
 0x2f0   : > { %3868 = vmatpush3.bf16.msra.mxu0 %v4722_v17  ;;  %3973 = vmatpush3.bf16.msra.mxu1 %v4722_v17  ;;  %v1119_v17 = vld [vmem:[#allocation3 + $0x58] sm:$0xff] }
 0x2f1   : > { %3870 = vmatprep.subr.bf16.mxu0 %v4728_v20  ;;  %3966 = vmatprep.subr.bf16.mxu1 %v4728_v20 }
 0x2f4   : > { %3872 = vmatpush3.bf16.msra.mxu0 %v4728_v20  ;;  %3974 = vmatpush3.bf16.msra.mxu1 %v4728_v20  ;;  %v1123_v20 = vld [vmem:[#allocation3 + $0x78] sm:$0xff] }
 0x2f5   : > { %3874 = vmatprep.subr.bf16.mxu0 %v4734_v23  ;;  %3967 = vmatprep.subr.bf16.mxu1 %v4734_v23 }
 0x2f8   : > { %3876 = vmatpush3.bf16.msra.mxu0 %v4734_v23  ;;  %3975 = vmatpush3.bf16.msra.mxu1 %v4734_v23 }
 0x2f9   : > { %3878 = vmatprep.subr.bf16.mxu0 %v4740_v26  ;;  %3968 = vmatprep.subr.bf16.mxu1 %v4740_v26 }
 0x2fc   : > { %3880 = vmatpush3.bf16.msra.mxu0 %v4740_v26  ;;  %3976 = vmatpush3.bf16.msra.mxu1 %v4740_v26 }
 0x2ff   : > { %3654 = vmatmul.mubr.f32.vlgmr.msra.gmra.mrb[0].mxu0 %v1117_v4  ;;  %3660 = vmatmul.mubr.f32.vlgmr.msra.gmra.mrb[0].mxu1 %v1121_v6 }
 0x300   : > { %3656 = vmatprep.mubr.f32.mxu0 %v1118_v9  ;;  %3662 = vmatprep.mubr.f32.mxu1 %v1122_v14 }
 0x303   : > { %3657 = vmatmul.mubr.f32.gmra.mrb[2].mxu0 %v1119_v17  ;;  %3663 = vmatmul.mubr.f32.gmra.mrb[2].mxu1 %v1123_v20 }
 0x3d2   : > { %v3655_v23 = vpop.f32.mrb[0].mxu0  ;;  %v3661_v56 = vpop.f32.mrb[0].mxu1 }
 0x3d3   : > { %v1196_v57 = vadd.f32 %v3655_v23, %v4824_v41  ;;  %v1216_v58 = vadd.f32 %v3661_v56, %v4824_v41  ;;  %v1190_v59 = vpop.f32.mrb[1].mxu0  ;;  %v1210_v26 = vpop.f32.mrb[1].mxu1 }
 0x3d4   : > { %v1191_v60 = vadd.f32 %v4824_v41, %v1190_v59  ;;  %v1211_v61 = vadd.f32 %v4824_v41, %v1210_v26 }
 0x3d5   : > { %v1230_v62 = vmax.f32 %v1196_v57, 0.0  ;;  %v1234_v63 = vmax.f32 %v1216_v58, 0.0 }
 0x3d6   : > { %v1229_v0 = vmax.f32 %v1191_v60, 0.0  ;;  %v1233_v1 = vmax.f32 %v1211_v61, 0.0  ;;  %v3658_v2 = vpop.f32.mrb[2].mxu0  ;;  %v3664_v3 = vpop.f32.mrb[2].mxu1 }
 0x3d7   : > { %1239 = vst [vmem:[#allocation2 + $0x240] sm:$0xff] %v1230_v62  ;;  %v1255_v5 = vrot.slane %v1230_v62, 7  ;;  %v1288_v7 = vrot.slane %v1230_v62, 1  ;;  %1243 = vst [vmem:[#allocation2 + $0x260] sm:$0xff] %v1234_v63  ;;  %v1259_v8 = vrot.slane %v1234_v63, 7  ;;  %v1292_v10 = vrot.slane %v1234_v63, 1 }
 0x3d8   : > { %v1200_v11 = vpop.f32.mrb[3].mxu0  ;;  %v1220_v12 = vpop.f32.mrb[3].mxu1  ;;  %1238 = vst [vmem:[#allocation2 + $0x238] sm:$0xff] %v1229_v0  ;;  %v1254_v13 = vrot.slane %v1229_v0, 7  ;;  %v1287_v15 = vrot.slane %v1229_v0, 1  ;;  %1242 = vst [vmem:[#allocation2 + $0x258] sm:$0xff] %v1233_v1  ;;  %v1206_v30 = vadd.f32 %v3658_v2, %v4824_v41  ;;  %v1226_v31 = vadd.f32 %v3664_v3, %v4824_v41 }
 0x3d9   : > { %v1258_v16 = vrot.slane %v1233_v1, 7  ;;  %v1291_v18 = vrot.slane %v1233_v1, 1  ;;  %v1271_v19 = vsel %vm610_vm0, 0.0, %v1255_v5  ;;  %v1304_v21 = vsel %vm644_vm1, %v1288_v7, 0.0 }
 0x3da   : > { %v1275_v22 = vsel %vm610_vm0, 0.0, %v1259_v8  ;;  %v1308_v24 = vsel %vm644_vm1, %v1292_v10, 0.0  ;;  %1280 = vst [vmem:[#allocation2 + $0x100] sm:$0xff] %v1271_v19  ;;  %1313 = vst [vmem:[#allocation2 + $0x380] sm:$0xff] %v1304_v21  ;;  %v1270_v25 = vsel %vm610_vm0, 0.0, %v1254_v13  ;;  %v1303_v27 = vsel %vm644_vm1, %v1287_v15, 0.0 }
 0x3db   : > { %1284 = vst [vmem:[#allocation2 + $0x120] sm:$0xff] %v1275_v22  ;;  %1317 = vst [vmem:[#allocation2 + $0x3a0] sm:$0xff] %v1308_v24  ;;  %v1274_v28 = vsel %vm610_vm0, 0.0, %v1258_v16  ;;  %v1307_v29 = vsel %vm644_vm1, %v1291_v18, 0.0  ;;  %v1201_v32 = vadd.f32 %v4824_v41, %v1200_v11  ;;  %v1221_v33 = vadd.f32 %v4824_v41, %v1220_v12 }
 0x3dc   : > { %1279 = vst [vmem:[#allocation2 + $0xf8] sm:$0xff] %v1270_v25  ;;  %1312 = vst [vmem:[#allocation2 + $0x378] sm:$0xff] %v1303_v27  ;;  %v1232_v34 = vmax.f32 %v1206_v30, 0.0  ;;  %v1236_v35 = vmax.f32 %v1226_v31, 0.0 }
 0x3dd   : > { %1283 = vst [vmem:[#allocation2 + $0x118] sm:$0xff] %v1274_v28  ;;  %1316 = vst [vmem:[#allocation2 + $0x398] sm:$0xff] %v1307_v29  ;;  %v1231_v36 = vmax.f32 %v1201_v32, 0.0  ;;  %v1235_v37 = vmax.f32 %v1221_v33, 0.0 }
 0x3de   : > { %1241 = vst [vmem:[#allocation2 + $0x250] sm:$0xff] %v1232_v34  ;;  %v1257_v38 = vrot.slane %v1232_v34, 7  ;;  %v1290_v39 = vrot.slane %v1232_v34, 1  ;;  %1245 = vst [vmem:[#allocation2 + $0x270] sm:$0xff] %v1236_v35  ;;  %v1261_v40 = vrot.slane %v1236_v35, 7  ;;  %v1294_v42 = vrot.slane %v1236_v35, 1 }
 0x3df   : > { %1240 = vst [vmem:[#allocation2 + $0x248] sm:$0xff] %v1231_v36  ;;  %1244 = vst [vmem:[#allocation2 + $0x268] sm:$0xff] %v1235_v37  ;;  %v1256_v43 = vrot.slane %v1231_v36, 7  ;;  %v1289_v44 = vrot.slane %v1231_v36, 1  ;;  %v1260_v45 = vrot.slane %v1235_v37, 7  ;;  %v1293_v46 = vrot.slane %v1235_v37, 1 }
 0x3e0   : > { %v1273_v47 = vsel %vm610_vm0, 0.0, %v1257_v38  ;;  %v1306_v41 = vsel %vm644_vm1, %v1290_v39, 0.0  ;;  %v1277_v48 = vsel %vm610_vm0, 0.0, %v1261_v40  ;;  %v1310_v49 = vsel %vm644_vm1, %v1294_v42, 0.0 }
 0x3e1   : > { %1282 = vst [vmem:[#allocation2 + $0x110] sm:$0xff] %v1273_v47  ;;  %1315 = vst [vmem:[#allocation2 + $0x390] sm:$0xff] %v1306_v41  ;;  %v1272_v50 = vsel %vm610_vm0, 0.0, %v1256_v43  ;;  %v1305_v51 = vsel %vm644_vm1, %v1289_v44, 0.0  ;;  %v1276_v52 = vsel %vm610_vm0, 0.0, %v1260_v45  ;;  %v1309_v53 = vsel %vm644_vm1, %v1293_v46, 0.0 }
 0x3e2   : > { %1286 = vst [vmem:[#allocation2 + $0x130] sm:$0xff] %v1277_v48  ;;  %1319 = vst [vmem:[#allocation2 + $0x3b0] sm:$0xff] %v1310_v49 }
 0x3e3   : > { %1281 = vst [vmem:[#allocation2 + $0x108] sm:$0xff] %v1272_v50  ;;  %1314 = vst [vmem:[#allocation2 + $0x388] sm:$0xff] %v1305_v51 }
 0x3e4   : > { %1285 = vst [vmem:[#allocation2 + $0x128] sm:$0xff] %v1276_v52  ;;  %1318 = vst [vmem:[#allocation2 + $0x3a8] sm:$0xff] %v1309_v53 }
 0x3e5 PF: > { %p3314_p1 = scmp.ne.s32.totalorder %s4369_s30, 1 }
 0x3e6   : > { %v4399_v54 = vmov (!%p3314_p1), 0.0  }
 0x3e7   : > { %1323 = sbr.rel (%p3314_p1) target bundleno = 1011 (0x3f3), region = 96  ;;  %1325 = vst [vmem:[#allocation2 + $0xf8] sm:$0xff] (!%p3314_p1), %v4399_v54  ;;  %1326 = vst [vmem:[#allocation2 + $0x100] sm:$0xff] (!%p3314_p1), %v4399_v54 }
 0x3e8   : > { %1327 = vst [vmem:[#allocation2 + $0x108] sm:$0xff] (!%p3314_p1), %v4399_v54  ;;  %1328 = vst [vmem:[#allocation2 + $0x110] sm:$0xff] (!%p3314_p1), %v4399_v54 }
 0x3e9   : > { %1329 = vst [vmem:[#allocation2 + $0x118] sm:$0xff] (!%p3314_p1), %v4399_v54  ;;  %1330 = vst [vmem:[#allocation2 + $0x120] sm:$0xff] (!%p3314_p1), %v4399_v54 }
 0x3ea   : > { %1331 = vst [vmem:[#allocation2 + $0x128] sm:$0xff] (!%p3314_p1), %v4399_v54  ;;  %1332 = vst [vmem:[#allocation2 + $0x130] sm:$0xff] (!%p3314_p1), %v4399_v54 }
 0x3eb   : > { %1333 = vst [vmem:[#allocation2 + $0x238] sm:$0xff] (!%p3314_p1), %v4399_v54  ;;  %1334 = vst [vmem:[#allocation2 + $0x240] sm:$0xff] (!%p3314_p1), %v4399_v54 }
 0x3ec   : > { %1335 = vst [vmem:[#allocation2 + $0x248] sm:$0xff] (!%p3314_p1), %v4399_v54  ;;  %1336 = vst [vmem:[#allocation2 + $0x250] sm:$0xff] (!%p3314_p1), %v4399_v54 }
 0x3ed   : > { %1337 = vst [vmem:[#allocation2 + $0x258] sm:$0xff] (!%p3314_p1), %v4399_v54  ;;  %1338 = vst [vmem:[#allocation2 + $0x260] sm:$0xff] (!%p3314_p1), %v4399_v54 }
 0x3ee   : > { %1339 = vst [vmem:[#allocation2 + $0x268] sm:$0xff] %v4399_v54  ;;  %1340 = vst [vmem:[#allocation2 + $0x270] sm:$0xff] %v4399_v54 }
 0x3ef   : > { %1341 = vst [vmem:[#allocation2 + $0x378] sm:$0xff] %v4399_v54  ;;  %1342 = vst [vmem:[#allocation2 + $0x380] sm:$0xff] %v4399_v54 }
 0x3f0   : > { %1343 = vst [vmem:[#allocation2 + $0x388] sm:$0xff] %v4399_v54  ;;  %1344 = vst [vmem:[#allocation2 + $0x390] sm:$0xff] %v4399_v54 }
 0x3f1   : > { %1345 = vst [vmem:[#allocation2 + $0x398] sm:$0xff] %v4399_v54  ;;  %1346 = vst [vmem:[#allocation2 + $0x3a0] sm:$0xff] %v4399_v54 }
 0x3f2   : > { %1347 = vst [vmem:[#allocation2 + $0x3a8] sm:$0xff] %v4399_v54  ;;  %1348 = vst [vmem:[#allocation2 + $0x3b0] sm:$0xff] %v4399_v54 }
 0x3f3 PF: > { %v1359_v55 = vld [vmem:[#allocation11] sm:$0xff]  ;;  %v1360_v4 = vld [vmem:[#allocation11 + $0x8] sm:$0xff]  ;;  %v1361_v6 = vld [vmem:[#allocation11 + $0x10] sm:$0xff]  ;;  %v1384_v9 = vlaneseq  ;;  %s6577_s5 = sld [smem:[#allocation63_spill]]  ;;  %s6735_s23 = sld [smem:[#allocation65_spill]] }
 0x3f4   : > { %v3881_v14 = vpack.c.bf16 %v1360_v4, %v1359_v55  ;;  %v1362_v17 = vld [vmem:[#allocation11 + $0x18] sm:$0xff]  ;;  %v1363_v23 = vld [vmem:[#allocation11 + $0x20] sm:$0xff]  ;;  %v1364_v56 = vld [vmem:[#allocation11 + $0x28] sm:$0xff]  ;;  %s3344_s21 = sshll.u32 %s4369_s30, 4  ;;  %s3336_s4 = sshll.u32 %s4373_s9, 5 }
 0x3f5   : > { %v3885_v20 = vpack.c.bf16 %v1362_v17, %v1361_v6  ;;  %v1385_v57 = vshrl.u32 %v1384_v9, 7  ;;  %v3889_v26 = vpack.c.bf16 %v1364_v56, %v1363_v23  ;;  %v1349_v60 = vld [vmem:[#allocation10] sm:$0x7]  ;;  %v1365_v62 = vld [vmem:[#allocation11 + $0x30] sm:$0xff]  ;;  %v5002_v0 = vld [vmem:[#allocation10 + $0x10] sm:$0x7]  ;;  %s3126_s15 = sadd.s32 %s3344_s21, %s3336_s4 }
 0x3f6   : > { %3882 = vmatprep.subr.bf16.mxu0 %v3881_v14  ;;  %3914 = vmatprep.subr.bf16.mxu1 %v3881_v14  ;;  %v1366_v63 = vld [vmem:[#allocation11 + $0x38] sm:$0xff]  ;;  %v1350_v3 = vld [vmem:[#allocation10 + $0x4] sm:$0x7]  ;;  %v1368_v18 = vld [vmem:[#allocation11 + $0x48] sm:$0xff]  ;;  %s3337_s27 = sshll.u32 %s3126_s15, 7  ;;  %s3129_s18 = sshll.u32 %s4876_s20, 4  ;;  %s6263_s18 = int_to_ptr.vmem [resolvable:$true] %s3129_s18 }
 0x3f7   : > { %3884 = vmatpush3.bf16.msra.mxu0 %v3881_v14  ;;  %3916 = vmatpush3.bf16.msra.mxu1 %v3881_v14  ;;  %v4996_v58 = vsub.s32 1, %v1385_v57  ;;  %v4998_v59 = vsub.s32 0, %v1385_v57  ;;  %v5000_v61 = vsub.s32 2, %v1385_v57  ;;  %v5014_v7 = vld [vmem:[#allocation2 + $0x198] sm:$0xff]  ;;  %v3893_v10 = vpack.c.bf16 %v1366_v63, %v1365_v62  ;;  %v1396_v12 = vld [vmem:[#allocation2] sm:$0xff]  ;;  %v5030_v30 = vld [vmem:[#allocation2 + $0x8] sm:$0xff] }
 0x3f8   : > { %3886 = vmatprep.subr.bf16.mxu0 %v3885_v20  ;;  %3918 = vmatprep.subr.bf16.mxu1 %v3885_v20  ;;  %v1425_v13 = vld [vmem:[#allocation2 + $0x140] sm:$0xff]  ;;  %v1351_v29 = vld [vmem:[#allocation10 + $0x8] sm:$0x7]  ;;  %v1369_v31 = vld [vmem:[#allocation11 + $0x50] sm:$0xff]  ;;  %s6736_s6 = sld [smem:[#allocation66_spill]]  ;;  %s4275_s25 = scalar_lea.vmem %s6263_s18, 2048 }
 0x3f9   : > { %v5005_v1 = vrot.slane %v1349_v60, %v4998_v59  ;;  %v5008_v2 = vrot.slane %v1349_v60, %v4996_v58  ;;  %v5012_v5 = vrot.slane %v5002_v0, %v4996_v58  ;;  %v5017_v8 = vrot.slane %v1349_v60, %v5000_v61  ;;  %v1454_v15 = vld [vmem:[#allocation2 + $0x280] sm:$0xff]  ;;  %v1352_v37 = vld [vmem:[#allocation10 + $0xc] sm:$0x7]  ;;  %v1373_v40 = vld [vmem:[#allocation11 + $0x70] sm:$0xff]  ;;  %p4276_p9 = scmp.ne.s32.totalorder %s6263_s18, %s4275_s25  ;;  %p6737_p4 = scmp.ne.s32.totalorder %s6522_s8, 0 }
 0x3fa   : > { %v1367_v16 = vld [vmem:[#allocation11 + $0x40] sm:$0xff]  ;;  %v5024_v22 = vrot.slane %v1350_v3, %v4998_v59  ;;  %v5028_v27 = vrot.slane %v1350_v3, %v4996_v58  ;;  %v1370_v32 = vld [vmem:[#allocation11 + $0x58] sm:$0xff]  ;;  %v5035_v35 = vrot.slane %v1350_v3, %v5000_v61  ;;  %v1372_v39 = vld [vmem:[#allocation11 + $0x68] sm:$0xff]  ;;  %v5042_v45 = vrot.slane %v1351_v29, %v4998_v59  ;;  %s4400_s19 = smov [#allocation13]  }
 0x3fb   : > { %3888 = vmatpush3.bf16.msra.mxu0 %v3885_v20  ;;  %3920 = vmatpush3.bf16.msra.mxu1 %v3885_v20  ;;  %6532 = vst [vmem:[#allocation31_spill] sm:$0xff] %v5017_v8  ;;  %v1388_v11 = vmul.f32 %v5012_v5, %v5014_v7  ;;  %v1408_v19 = vmul.f32 %v5005_v1, %v1396_v12  ;;  %v1371_v36 = vld [vmem:[#allocation11 + $0x60] sm:$0xff]  ;;  %v1374_v42 = vld [vmem:[#allocation11 + $0x78] sm:$0xff]  ;;  %v1354_v49 = vld [vmem:[#allocation10 + $0x14] sm:$0x7]  ;;  %p4277_p10 = pnand %p4276_p9, %p6737_p4  ;;  %s4279_s2 = sshll.u32 %s4400_s19, 4  ;;  %s4280_s2 = int_to_ptr.vmem [resolvable:$false] %s4279_s2 }
 0x3fc   : > { %3890 = vmatprep.subr.bf16.mxu0 %v3889_v26  ;;  %3922 = vmatprep.subr.bf16.mxu1 %v3889_v26  ;;  %v1437_v21 = vmul.f32 %v5008_v2, %v1425_v13  ;;  %v1466_v25 = vmul.f32 %v5017_v8, %v1454_v15  ;;  %v3897_v28 = vpack.c.bf16 %v1368_v18, %v1367_v16  ;;  %v5037_v38 = vld [vmem:[#allocation2 + $0x148] sm:$0xff]  ;;  %v5062_v4 = vld [vmem:[#allocation2 + $0x10] sm:$0xff]  ;;  %v1355_v13 = vld [vmem:[#allocation10 + $0x18] sm:$0x7]  ;;  %s4281_s24 = scalar_lea.vmem %s4280_s2, 4096  ;;  %p4282_p3 = scmp.lt.s32.totalorder %s6263_s18, %s4280_s2 }
 0x3fd   : > { %v1416_v24 = vadd.f32 %v1408_v19, %v1388_v11  ;;  %v1495_v34 = vmul.f32 %v5024_v22, %v5030_v30  ;;  %v1524_v44 = vmul.f32 %v5028_v27, %v5037_v38  ;;  %v3901_v46 = vpack.c.bf16 %v1370_v32, %v1369_v31  ;;  %v5044_v47 = vld [vmem:[#allocation2 + $0x288] sm:$0xff]  ;;  %v5064_v6 = vld [vmem:[#allocation2 + $0x150] sm:$0xff]  ;;  %p4278_p11 = pneg %p4277_p10  ;;  %p4283_p7 = scmp.lt.s32.totalorder %s4281_s24, %s4275_s25 }
 0x3fe   : > { %v5047_v41 = vrot.slane %v1351_v29, %v4996_v58  ;;  %v5050_v48 = vrot.slane %v1351_v29, %v5000_v61  ;;  %v1553_v51 = vmul.f32 %v5035_v35, %v5044_v47  ;;  %v5055_v52 = vrot.slane %v1352_v37, %v4998_v59  ;;  %v5066_v9 = vld [vmem:[#allocation2 + $0x290] sm:$0xff]  ;;  %v5073_v57 = vld [vmem:[#allocation2 + $0x1e8] sm:$0xff]  ;;  %s6261_s17 = scalar_lea.hbm %s6736_s6, %s3337_s27 }
 0x3ff   : > { %3892 = vmatpush3.bf16.msra.mxu0 %v3889_v26  ;;  %3924 = vmatpush3.bf16.msra.mxu1 %v3889_v26  ;;  %v1445_v33 = vadd.f32 %v1437_v21, %v1416_v24  ;;  %v5058_v53 = vrot.slane %v1352_v37, %v4996_v58  ;;  %v3905_v54 = vpack.c.bf16 %v1372_v39, %v1371_v36  ;;  %v1657_v20 = vld [vmem:[#allocation2 + $0x50] sm:$0xff]  ;;  %v5110_v36 = vld [vmem:[#allocation2 + $0x60] sm:$0xff]  ;;  %p4284_p12 = por %p4283_p7, %p4282_p3 }
 0x400   : > { %3894 = vmatprep.subr.bf16.mxu0 %v3893_v10  ;;  %3926 = vmatprep.subr.bf16.mxu1 %v3893_v10  ;;  %v5060_v55 = vpack.c.bf16 %v1374_v42, %v1373_v40  ;;  %v1582_v17 = vmul.f32 %v5042_v45, %v5062_v4  ;;  %v1686_v23 = vld [vmem:[#allocation2 + $0x190] sm:$0xff]  ;;  %v5071_v56 = vrot.slane %v1352_v37, %v5000_v61  ;;  %v1356_v40 = vld [vmem:[#allocation10 + $0x1c] sm:$0x7] }
 0x401   : > { %v1474_v43 = vadd.f32 %v1466_v25, %v1445_v33  ;;  %6534 = vst [vmem:[#allocation33_spill] sm:$0xff] %v5073_v57  ;;  %v1611_v26 = vmul.f32 %v5047_v41, %v5064_v6  ;;  %v1640_v60 = vmul.f32 %v5050_v48, %v5066_v9  ;;  %v5081_v62 = vrot.slane %v5002_v0, %v4998_v59  ;;  %v1715_v11 = vld [vmem:[#allocation2 + $0x2d0] sm:$0xff]  ;;  %p4285_p2 = pnand %p4284_p12, %p4278_p11 }
 0x402   : > { %6533 = vst [vmem:[#allocation32_spill] sm:$0xff] %v5071_v56  ;;  %v1669_v3 = vmul.f32 %v5055_v52, %v1657_v20  ;;  %v5087_v12 = vrot.slane %v5002_v0, %v5000_v61  ;;  %v5090_v15 = vrot.slane %v1354_v49, %v4998_v59  ;;  %v2317_v16 = vmul.f32 %v5073_v57, %v5012_v5  ;;  %v5100_v0 = vld [vmem:[#allocation2 + $0x58] sm:$0xff] }
 0x403   : > { %3896 = vmatpush3.bf16.msra.mxu0 %v3893_v10  ;;  %3928 = vmatpush3.bf16.msra.mxu1 %v3893_v10  ;;  %v1503_v50 = vadd.f32 %v1495_v34, %v1474_v43  ;;  %v1698_v10 = vmul.f32 %v5058_v53, %v1686_v23  ;;  %v2333_v18 = vmul.f32 %v1657_v20, %v5005_v1  ;;  %v5108_v34 = vld [vmem:[#allocation2 + $0x2d8] sm:$0xff]  ;;  %v1357_v20 = vld [vmem:[#allocation10 + $0x20] sm:$0x7] }
 0x404   : > { %3898 = vmatprep.subr.bf16.mxu0 %v3897_v28  ;;  %3930 = vmatprep.subr.bf16.mxu1 %v3897_v28  ;;  %v2357_v19 = vmul.f32 %v1686_v23, %v5008_v2  ;;  %v1727_v24 = vmul.f32 %v5071_v56, %v1715_v11  ;;  %v5098_v25 = vrot.slane %v1354_v49, %v4996_v58 }
 0x405   : > { %v1532_v14 = vadd.f32 %v1524_v44, %v1503_v50  ;;  %v2341_v29 = vadd.f32 %v2333_v18, %v2317_v16  ;;  %v2381_v31 = vmul.f32 %v1715_v11, %v5017_v8  ;;  %v1755_v33 = vmul.f32 %v5081_v62, %v5100_v0  ;;  %6535 = vst [vmem:[#allocation34_spill] sm:$0xff] %v5108_v34  ;;  %v5124_v44 = vld [vmem:[#allocation2 + $0x1a0] sm:$0xff] }
 0x406   : > { %v5113_v37 = vrot.slane %v1355_v13, %v4998_v59  ;;  %v5116_v39 = vrot.slane %v1355_v13, %v4996_v58  ;;  %v1783_v42 = vmul.f32 %v5087_v12, %v5108_v34  ;;  %v5122_v43 = vmul.f32 %v5090_v15, %v5110_v36  ;;  %6536 = vst [vmem:[#allocation35_spill] sm:$0xff] %v5124_v44 }
 0x407   : > { %3900 = vmatpush3.bf16.msra.mxu0 %v3897_v28  ;;  %3932 = vmatpush3.bf16.msra.mxu1 %v3897_v28  ;;  %v1561_v63 = vadd.f32 %v1553_v51, %v1532_v14  ;;  %v5103_v28 = vrot.slane %v1354_v49, %v5000_v61  ;;  %v2405_v49 = vmul.f32 %v5100_v0, %v5024_v22  ;;  %v5132_v14 = vld [vmem:[#allocation2 + $0x2e0] sm:$0xff] }
 0x408   : > { %3902 = vmatprep.subr.bf16.mxu0 %v3901_v46  ;;  %3934 = vmatprep.subr.bf16.mxu1 %v3901_v46  ;;  %v5130_v51 = vmul.f32 %v5098_v25, %v5124_v44  ;;  %6537 = vst [vmem:[#allocation36_spill] sm:$0xff] %v5132_v14  ;;  %v5152_v18 = vrot.slane %v1356_v40, %v4998_v59 }
 0x409   : > { %v1590_v21 = vadd.f32 %v1582_v17, %v1561_v63  ;;  %v5135_v17 = vrot.slane %v1355_v13, %v5000_v61  ;;  %v5141_v23 = vmul.f32 %v5103_v28, %v5132_v14  ;;  %v2429_v63 = vmul.f32 %v5028_v27, %v5014_v7 }
 0x40b   : > { %3904 = vmatpush3.bf16.msra.mxu0 %v3901_v46  ;;  %3936 = vmatpush3.bf16.msra.mxu1 %v3901_v46  ;;  %v1619_v32 = vadd.f32 %v1611_v26, %v1590_v21  ;;  %v2365_v46 = vadd.f32 %v2357_v19, %v2341_v29  ;;  %6538 = vst [vmem:[#allocation37_spill] sm:$0xff] %v5135_v17  ;;  %v1916_v26 = vld [vmem:[#allocation2 + $0x1e0] sm:$0xff] }
 0x40c   : > { %3906 = vmatprep.subr.bf16.mxu0 %v3905_v54  ;;  %3938 = vmatprep.subr.bf16.mxu1 %v3905_v54  ;;  %v5149_v13 = vmul.f32 %v5116_v39, %v1916_v26  ;;  %v1945_v19 = vld [vmem:[#allocation2 + $0x320] sm:$0xff]  ;;  %v5155_v21 = vrot.slane %v1356_v40, %v4996_v58  ;;  %v5158_v29 = vrot.slane %v1356_v40, %v5000_v61 }
 0x40d   : > { %v1648_v50 = vadd.f32 %v1640_v60, %v1619_v32  ;;  %v2389_v60 = vadd.f32 %v2381_v31, %v2365_v46  ;;  %v5165_v46 = vmul.f32 %v5135_v17, %v1945_v19 }
 0x40e   : > { %6540 = vst [vmem:[#allocation39_spill] sm:$0xff] %v5149_v13  ;;  %6541 = vst [vmem:[#allocation40_spill] sm:$0xff] %v5155_v21  ;;  %v5171_v13 = vrot.slane %v1357_v20, %v4996_v58  ;;  %v1438_v58 = vmul.f32 %v5037_v38, %v5008_v2  ;;  %v5202_v38 = vld [vmem:[#allocation2 + $0xb0] sm:$0xff] }
 0x40f   : > { %3908 = vmatpush3.bf16.msra.mxu0 %v3905_v54  ;;  %3940 = vmatpush3.bf16.msra.mxu1 %v3905_v54  ;;  %v1887_v54 = vld [vmem:[#allocation2 + $0xa0] sm:$0xff]  ;;  %v1677_v11 = vadd.f32 %v1669_v3, %v1648_v50  ;;  %v2413_v31 = vadd.f32 %v2405_v49, %v2389_v60  ;;  %v2453_v3 = vmul.f32 %v5108_v34, %v5035_v35 }
 0x410   : > { %3910 = vmatprep.subr.bf16.mxu0 %v5060_v55  ;;  %3942 = vmatprep.subr.bf16.mxu1 %v5060_v55  ;;  %v5146_v16 = vmul.f32 %v5113_v37, %v1887_v54  ;;  %v5168_v50 = vrot.slane %v1357_v20, %v4998_v59  ;;  %6542 = vst [vmem:[#allocation41_spill] sm:$0xff] %v5171_v13  ;;  %6548 = vst [vmem:[#allocation47_spill] sm:$0xff] %v5202_v38 }
 0x411   : > { %v1706_v32 = vadd.f32 %v1698_v10, %v1677_v11  ;;  %v2437_v40 = vadd.f32 %v2429_v63, %v2413_v31  ;;  %v2477_v49 = vmul.f32 %v5110_v36, %v5042_v45  ;;  %v1389_v60 = vmul.f32 %v5124_v44, %v5012_v5  ;;  %v5204_v31 = vld [vmem:[#allocation2 + $0x1f0] sm:$0xff] }
 0x412   : > { %6539 = vst [vmem:[#allocation38_spill] sm:$0xff] %v5146_v16  ;;  %v5177_v16 = vld [vmem:[#allocation2 + $0xa8] sm:$0xff]  ;;  %v1409_v59 = vmul.f32 %v5030_v30, %v5005_v1  ;;  %v5192_v63 = vmul.f32 %v5155_v21, %v5073_v57  ;;  %6549 = vst [vmem:[#allocation48_spill] sm:$0xff] %v5204_v31  ;;  %v1467_v57 = vmul.f32 %v5044_v47, %v5017_v8 }
 0x413   : > { %3912 = vmatpush3.bf16.msra.mxu0 %v5060_v55  ;;  %3944 = vmatpush3.bf16.msra.mxu1 %v5060_v55  ;;  %v1735_v34 = vadd.f32 %v1727_v24, %v1706_v32  ;;  %v5180_v55 = vrot.slane %v1357_v20, %v5000_v61  ;;  %v5188_v10 = vmul.f32 %v5152_v18, %v5177_v16  ;;  %v5194_v24 = vld [vmem:[#allocation2 + $0x328] sm:$0xff] }
 0x414   : > { %6545 = vst [vmem:[#allocation44_spill] sm:$0xff] %v5192_v63  ;;  %6546 = vst [vmem:[#allocation45_spill] sm:$0xff] %v5194_v24  ;;  %v2461_v11 = vadd.f32 %v2453_v3, %v2437_v40  ;;  %v2501_v61 = vmul.f32 %v5124_v44, %v5047_v41  ;;  %v5200_v30 = vmul.f32 %v5158_v29, %v5194_v24 }
 0x415   : > { %6543 = vst [vmem:[#allocation42_spill] sm:$0xff] %v5180_v55  ;;  %6544 = vst [vmem:[#allocation43_spill] sm:$0xff] %v5188_v10  ;;  %v1763_v20 = vadd.f32 %v1755_v33, %v1735_v34  ;;  %v1417_v32 = vadd.f32 %v1409_v59, %v1389_v60  ;;  %v5210_v63 = vmul.f32 %v5168_v50, %v5202_v38  ;;  %v5216_v33 = vld [vmem:[#allocation2 + $0x330] sm:$0xff] }
 0x416   : > { %6547 = vst [vmem:[#allocation46_spill] sm:$0xff] %v5200_v30  ;;  %v5214_v3 = vmul.f32 %v5171_v13, %v5204_v31  ;;  %6552 = vst [vmem:[#allocation51_spill] sm:$0xff] %v5216_v33  ;;  %v2485_v34 = vadd.f32 %v2477_v49, %v2461_v11  ;;  %v2525_v40 = vmul.f32 %v5132_v14, %v5050_v48  ;;  %v2734_v11 = vld [vmem:[#allocation2 + $0xf0] sm:$0xff] }
 0x417   : > { %6550 = vst [vmem:[#allocation49_spill] sm:$0xff] %v5210_v63  ;;  %v1791_v30 = vadd.f32 %v1783_v42, %v1763_v20  ;;  %v5222_v60 = vmul.f32 %v5180_v55, %v5216_v33  ;;  %v1446_v47 = vadd.f32 %v1438_v58, %v1417_v32  ;;  %v1496_v59 = vmul.f32 %v5062_v4, %v5024_v22  ;;  %v2759_v20 = vld [vmem:[#allocation2 + $0x230] sm:$0xff] }
 0x418   : > { %6551 = vst [vmem:[#allocation50_spill] sm:$0xff] %v5214_v3  ;;  %v2509_v63 = vadd.f32 %v2501_v61, %v2485_v34  ;;  %v2549_v10 = vmul.f32 %v1887_v54, %v5055_v52  ;;  %v2573_v3 = vmul.f32 %v1916_v26, %v5058_v53  ;;  %v2597_v13 = vmul.f32 %v1945_v19, %v5071_v56  ;;  %v5249_v34 = vld [vmem:[#allocation2 + $0x18] sm:$0xff] }
 0x419   : > { %6553 = vst [vmem:[#allocation52_spill] sm:$0xff] %v5222_v60  ;;  %v1820_v49 = vadd.f32 %v5122_v43, %v1791_v30  ;;  %v2621_v42 = vmul.f32 %v5177_v16, %v5081_v62  ;;  %v1475_v14 = vadd.f32 %v1467_v57, %v1446_v47  ;;  %v1525_v58 = vmul.f32 %v5064_v6, %v5028_v27  ;;  %v2784_v57 = vld [vmem:[#allocation2 + $0x370] sm:$0xff]  ;;  %v5278_v60 = vld [vmem:[#allocation2 + $0x298] sm:$0xff] }
 0x41a   : > { %v2533_v32 = vadd.f32 %v2525_v40, %v2509_v63  ;;  %v2645_v61 = vmul.f32 %v5194_v24, %v5087_v12  ;;  %v2669_v54 = vmul.f32 %v5202_v38, %v5090_v15  ;;  %v5240_v26 = vmul.f32 %v5204_v31, %v5098_v25  ;;  %6554 = vst [vmem:[#allocation53_spill] sm:$0xff] %v5249_v34  ;;  %v5260_v24 = vld [vmem:[#allocation2 + $0x158] sm:$0xff] }
 0x41b   : > { %v1849_v43 = vadd.f32 %v5130_v51, %v1820_v49  ;;  %v5245_v19 = vmul.f32 %v5216_v33, %v5103_v28  ;;  %v1504_v30 = vadd.f32 %v1496_v59, %v1475_v14  ;;  %v1554_v63 = vmul.f32 %v5066_v9, %v5035_v35  ;;  %6555 = vst [vmem:[#allocation54_spill] sm:$0xff] %v5260_v24 }
 0x41c   : > { %v2557_v40 = vadd.f32 %v2549_v10, %v2533_v32  ;;  %v5252_v47 = vmul.f32 %v2734_v11, %v5113_v37  ;;  %v5255_v38 = vmul.f32 %v2759_v20, %v5116_v39  ;;  %v1583_v51 = vmul.f32 %v5042_v45, %v5249_v34 }
 0x41d   : > { %v1878_v49 = vadd.f32 %v5141_v23, %v1849_v43  ;;  %v1533_v33 = vadd.f32 %v1525_v58, %v1504_v30  ;;  %v2318_v14 = vmul.f32 %v5204_v31, %v5012_v5  ;;  %v2334_v10 = vmul.f32 %v5100_v0, %v5005_v1  ;;  %v6557_v23 = vld [vmem:[#allocation38_spill] sm:$0xff] }
 0x41e   : > { %v2581_v59 = vadd.f32 %v2573_v3, %v2557_v40  ;;  %v5267_v11 = vmul.f32 %v2784_v57, %v5135_v17  ;;  %v1612_v20 = vmul.f32 %v5047_v41, %v5260_v24  ;;  %v2358_v32 = vmul.f32 %v5008_v2, %v5014_v7  ;;  %v5274_v43 = vld [vmem:[#allocation2 + $0xf8] sm:$0xff] }
 0x41f   : > { %v1907_v58 = vadd.f32 %v6557_v23, %v1878_v49  ;;  %6558 = vst [vmem:[#allocation38_spill] sm:$0xff] %v5274_v43  ;;  %v5276_v30 = vld [vmem:[#allocation2 + $0x238] sm:$0xff]  ;;  %v1562_v31 = vadd.f32 %v1554_v63, %v1533_v33  ;;  %v2342_v34 = vadd.f32 %v2334_v10, %v2318_v14  ;;  %v5284_v24 = vmul.f32 %v5274_v43, %v5152_v18  ;;  %v6561_v23 = vld [vmem:[#allocation39_spill] sm:$0xff] }
 0x420   : > { %6556 = vst [vmem:[#allocation55_spill] sm:$0xff] %v5267_v11  ;;  %6559 = vst [vmem:[#allocation56_spill] sm:$0xff] %v5276_v30  ;;  %v6560_v3 = vld [vmem:[#allocation34_spill] sm:$0xff]  ;;  %v2605_v40 = vadd.f32 %v2597_v13, %v2581_v59  ;;  %v5288_v17 = vmul.f32 %v5276_v30, %v5155_v21  ;;  %v1641_v49 = vmul.f32 %v5050_v48, %v5278_v60 }
 0x421   : > { %v2382_v57 = vmul.f32 %v6560_v3, %v5017_v8  ;;  %v1936_v33 = vadd.f32 %v6561_v23, %v1907_v58  ;;  %v5293_v63 = vld [vmem:[#allocation2 + $0x378] sm:$0xff]  ;;  %v5295_v14 = vld [vmem:[#allocation2 + $0x100] sm:$0xff]  ;;  %v1591_v10 = vadd.f32 %v1583_v51, %v1562_v31  ;;  %v2366_v11 = vadd.f32 %v2358_v32, %v2342_v34 }
 0x422   : > { %6562 = vst [vmem:[#allocation34_spill] sm:$0xff] %v5293_v63  ;;  %6563 = vst [vmem:[#allocation39_spill] sm:$0xff] %v5295_v14  ;;  %v2406_v13 = vmul.f32 %v5110_v36, %v5024_v22  ;;  %v2629_v59 = vadd.f32 %v2621_v42, %v2605_v40  ;;  %v5301_v43 = vmul.f32 %v5293_v63, %v5158_v29  ;;  %v5310_v21 = vld [vmem:[#allocation2 + $0x240] sm:$0xff]  ;;  %v6567_v40 = vld [vmem:[#allocation41_spill] sm:$0xff] }
 0x423   : > { %v5305_v30 = vmul.f32 %v5295_v14, %v5168_v50  ;;  %v1670_v58 = vmul.f32 %v5100_v0, %v5055_v52  ;;  %v1965_v23 = vadd.f32 %v5165_v46, %v1936_v33  ;;  %6565 = vst [vmem:[#allocation58_spill] sm:$0xff] %v5310_v21  ;;  %v5312_v31 = vld [vmem:[#allocation2 + $0x380] sm:$0xff]  ;;  %v1620_v34 = vadd.f32 %v1612_v20, %v1591_v10 }
 0x424   : > { %6566 = vst [vmem:[#allocation59_spill] sm:$0xff] %v5312_v31  ;;  %v2390_v51 = vadd.f32 %v2382_v57, %v2366_v11  ;;  %v2430_v42 = vmul.f32 %v5124_v44, %v5028_v27  ;;  %v2653_v32 = vadd.f32 %v2645_v61, %v2629_v59  ;;  %v5318_v63 = vmul.f32 %v5310_v21, %v6567_v40  ;;  %v6569_v46 = vld [vmem:[#allocation43_spill] sm:$0xff]  ;;  %v6570_v11 = vld [vmem:[#allocation36_spill] sm:$0xff] }
 0x425   : > { %6564 = vst [vmem:[#allocation57_spill] sm:$0xff] %v5305_v30  ;;  %v5322_v14 = vmul.f32 %v5312_v31, %v5180_v55  ;;  %v1699_v0 = vmul.f32 %v5058_v53, %v5014_v7  ;;  %v1993_v33 = vadd.f32 %v6569_v46, %v1965_v23  ;;  %v1649_v30 = vadd.f32 %v1641_v49, %v1620_v34  ;;  %v5335_v21 = vld [vmem:[#allocation2 + $0x68] sm:$0xff] }
 0x426   : > { %v2414_v20 = vadd.f32 %v2406_v13, %v2390_v51  ;;  %v2454_v57 = vmul.f32 %v6570_v11, %v5035_v35  ;;  %v2677_v10 = vadd.f32 %v2669_v54, %v2653_v32  ;;  %v1728_v61 = vmul.f32 %v6560_v3, %v5071_v56  ;;  %6571 = vst [vmem:[#allocation43_spill] sm:$0xff] %v5335_v21  ;;  %v6572_v7 = vld [vmem:[#allocation44_spill] sm:$0xff] }
 0x427   : > { %6568 = vst [vmem:[#allocation41_spill] sm:$0xff] %v5322_v14  ;;  %v1756_v59 = vmul.f32 %v5110_v36, %v5081_v62  ;;  %v1784_v31 = vmul.f32 %v6570_v11, %v5087_v12  ;;  %v2021_v55 = vadd.f32 %v6572_v7, %v1993_v33  ;;  %v1678_v23 = vadd.f32 %v1670_v58, %v1649_v30  ;;  %v5338_v49 = vld [vmem:[#allocation2 + $0x1a8] sm:$0xff]  ;;  %v6574_v30 = vld [vmem:[#allocation46_spill] sm:$0xff]  ;;  %v6575_v11 = vld [vmem:[#allocation49_spill] sm:$0xff] }
 0x428   : > { %v5340_v13 = vld [vmem:[#allocation2 + $0x2e8] sm:$0xff]  ;;  %v2438_v34 = vadd.f32 %v2430_v42, %v2414_v20  ;;  %v2478_v54 = vmul.f32 %v5335_v21, %v5042_v45  ;;  %v2701_v3 = vadd.f32 %v5240_v26, %v2677_v10  ;;  %v1813_v51 = vmul.f32 %v5090_v15, %v5335_v21 }
 0x429   : > { %6573 = vst [vmem:[#allocation44_spill] sm:$0xff] %v5340_v13  ;;  %v1842_v32 = vmul.f32 %v5098_v25, %v5338_v49  ;;  %v1871_v46 = vmul.f32 %v5103_v28, %v5340_v13  ;;  %v2049_v58 = vadd.f32 %v6574_v30, %v2021_v55  ;;  %v1707_v33 = vadd.f32 %v1699_v0, %v1678_v23 }
 0x42a   : > { %v2462_v7 = vadd.f32 %v2454_v57, %v2438_v34  ;;  %v2502_v42 = vmul.f32 %v5338_v49, %v5047_v41  ;;  %v2725_v20 = vadd.f32 %v5245_v19, %v2701_v3  ;;  %v2526_v26 = vmul.f32 %v5340_v13, %v5050_v48  ;;  %v6576_v3 = vld [vmem:[#allocation50_spill] sm:$0xff] }
 0x42b   : > { %v1390_v10 = vmul.f32 %v5338_v49, %v5012_v5  ;;  %v1410_v21 = vmul.f32 %v5062_v4, %v5005_v1  ;;  %v2078_v14 = vadd.f32 %v6575_v11, %v2049_v58  ;;  %v1736_v44 = vadd.f32 %v1728_v61, %v1707_v33  ;;  %v6578_v61 = vld [vmem:[#allocation33_spill] sm:$0xff] }
 0x42c   : > { %v2486_v55 = vadd.f32 %v2478_v54, %v2462_v7  ;;  %v1439_v0 = vmul.f32 %v5064_v6, %v5008_v2  ;;  %v2750_v57 = vadd.f32 %v5252_v47, %v2725_v20  ;;  %v1900_v19 = vmul.f32 %v5177_v16, %v5113_v37  ;;  %v5375_v6 = vld [vmem:[%s6577_s5] ss:$0 sm:$0xff]  ;;  %v6581_v7 = vld [vmem:[#allocation55_spill] sm:$0xff]  ;;  %v6582_v20 = vld [vmem:[#allocation37_spill] sm:$0xff] }
 0x42d   : > { %v1418_v23 = vadd.f32 %v1410_v21, %v1390_v10  ;;  %v1468_v34 = vmul.f32 %v5066_v9, %v5017_v8  ;;  %v2107_v30 = vadd.f32 %v6576_v3, %v2078_v14  ;;  %v1764_v13 = vadd.f32 %v1756_v59, %v1736_v44  ;;  %v6579_v9 = vld [vmem:[#allocation53_spill] sm:$0xff]  ;;  %v6580_v14 = vld [vmem:[#allocation52_spill] sm:$0xff] }
 0x42e   : > { %v2510_v4 = vadd.f32 %v2502_v42, %v2486_v55  ;;  %v2550_v11 = vmul.f32 %v5177_v16, %v5055_v52  ;;  %v2775_v47 = vadd.f32 %v5255_v38, %v2750_v57  ;;  %v1929_v21 = vmul.f32 %v6578_v61, %v5116_v39  ;;  %v6583_v10 = vld [vmem:[#allocation45_spill] sm:$0xff]  ;;  %v6584_v57 = vld [vmem:[#allocation54_spill] sm:$0xff] }
 0x42f   : > { %v1447_v54 = vadd.f32 %v1439_v0, %v1418_v23  ;;  %v1497_v58 = vmul.f32 %v6579_v9, %v5024_v22  ;;  %v2136_v44 = vadd.f32 %v6580_v14, %v2107_v30  ;;  %v1792_v59 = vadd.f32 %v1784_v31, %v1764_v13 }
 0x430   : > { %v2534_v33 = vadd.f32 %v2526_v26, %v2510_v4  ;;  %v2574_v16 = vmul.f32 %v6578_v61, %v5058_v53  ;;  %v2800_v42 = vadd.f32 %v6581_v7, %v2775_v47  ;;  %v1958_v55 = vmul.f32 %v6583_v10, %v6582_v20  ;;  %v6585_v26 = vld [vmem:[#allocation47_spill] sm:$0xff] }
 0x431   : > { %v1476_v38 = vadd.f32 %v1468_v34, %v1447_v54  ;;  %v1526_v3 = vmul.f32 %v6584_v57, %v5028_v27  ;;  %v2150_v0 = vadd.f32 %v5375_v6, %v2136_v44  ;;  %v1821_v23 = vadd.f32 %v1813_v51, %v1792_v59  ;;  %v5400_v51 = vld [vmem:[#allocation2 + $0x20] sm:$0xff]  ;;  %v6587_v44 = vld [vmem:[#allocation40_spill] sm:$0xff] }
 0x432   : > { %v2558_v9 = vadd.f32 %v2550_v11, %v2534_v33  ;;  %v2598_v31 = vmul.f32 %v6583_v10, %v5071_v56  ;;  %v2825_v13 = vadd.f32 %v5284_v24, %v2800_v42  ;;  %v1986_v30 = vmul.f32 %v6585_v26, %v5152_v18  ;;  %6586 = vst [vmem:[#allocation46_spill] sm:$0xff] %v5400_v51  ;;  %v6588_v59 = vld [vmem:[#allocation48_spill] sm:$0xff]  ;;  %v6589_v42 = vld [vmem:[#allocation51_spill] sm:$0xff] }
 0x433   : > { %v1505_v4 = vadd.f32 %v1497_v58, %v1476_v38  ;;  %v1555_v47 = vmul.f32 %v5278_v60, %v5035_v35  ;;  %v2158_v34 = vmax.f32 %v2150_v0, 0.0  ;;  %v1850_v61 = vadd.f32 %v1842_v32, %v1821_v23  ;;  %v5413_v38 = vld [vmem:[#allocation2 + $0x160] sm:$0xff]  ;;  %v5418_v0 = vld [vmem:[#allocation2 + $0x1f8] sm:$0xff] }
 0x434   : > { %v2582_v54 = vadd.f32 %v2574_v16, %v2558_v9  ;;  %v2622_v14 = vmul.f32 %v6585_v26, %v5081_v62  ;;  %v2850_v11 = vadd.f32 %v5288_v17, %v2825_v13  ;;  %v2014_v24 = vmul.f32 %v6588_v59, %v6587_v44  ;;  %v5409_v9 = vld [vmem:[#allocation2 + $0xb8] sm:$0xff]  ;;  %6591 = vst [vmem:[#allocation50_spill] sm:$0xff] %v5413_v38 }
 0x435   : > { %v1534_v33 = vadd.f32 %v1526_v3, %v1505_v4  ;;  %v1584_v58 = vmul.f32 %v5042_v45, %v5400_v51  ;;  %3697 = vmatprep.mubr.f32.mxu0 %v2158_v34  ;;  %v1879_v7 = vadd.f32 %v1871_v46, %v1850_v61  ;;  %v2042_v32 = vmul.f32 %v6589_v42, %v5158_v29  ;;  %v5426_v61 = vld [vmem:[#allocation2 + $0x2a0] sm:$0xff] }
 0x436   : > { %6590 = vst [vmem:[#allocation49_spill] sm:$0xff] %v5409_v9  ;;  %v2606_v16 = vadd.f32 %v2598_v31, %v2582_v54  ;;  %v2646_v10 = vmul.f32 %v6589_v42, %v5087_v12  ;;  %v2875_v17 = vadd.f32 %v5301_v43, %v2850_v11  ;;  %v2071_v3 = vmul.f32 %v5168_v50, %v5409_v9  ;;  %v6594_v43 = vld [vmem:[#allocation57_spill] sm:$0xff] }
 0x437   : > { %6592 = vst [vmem:[#allocation33_spill] sm:$0xff] %v5418_v0  ;;  %v1563_v23 = vadd.f32 %v1555_v47, %v1534_v33  ;;  %v1613_v46 = vmul.f32 %v5047_v41, %v5413_v38  ;;  %v1908_v13 = vadd.f32 %v1900_v19, %v1879_v7  ;;  %v2100_v31 = vmul.f32 %v6567_v40, %v5418_v0  ;;  %v5429_v11 = vld [vmem:[#allocation2 + $0x338] sm:$0xff] }
 0x438   : > { %v2630_v4 = vadd.f32 %v2622_v14, %v2606_v16  ;;  %v2670_v34 = vmul.f32 %v5409_v9, %v5090_v15  ;;  %6593 = vst [vmem:[#allocation52_spill] sm:$0xff] %v5426_v61  ;;  %v2900_v54 = vadd.f32 %v6594_v43, %v2875_v17  ;;  %6595 = vst [vmem:[#allocation55_spill] sm:$0xff] %v5429_v11 }
 0x439   : > { %v2694_v47 = vmul.f32 %v5418_v0, %v5098_v25  ;;  %v1592_v33 = vadd.f32 %v1584_v58, %v1563_v23  ;;  %v1642_v19 = vmul.f32 %v5050_v48, %v5426_v61  ;;  %v1937_v7 = vadd.f32 %v1929_v21, %v1908_v13  ;;  %v6596_v21 = vld [vmem:[#allocation35_spill] sm:$0xff] }
 0x43a   : > { %v2654_v38 = vadd.f32 %v2646_v10, %v2630_v4  ;;  %v2718_v14 = vmul.f32 %v5429_v11, %v5103_v28  ;;  %v1671_v16 = vmul.f32 %v5110_v36, %v5055_v52  ;;  %v2925_v9 = vadd.f32 %v5318_v63, %v2900_v54  ;;  %v6597_v4 = vld [vmem:[#allocation41_spill] sm:$0xff]  ;;  %v6598_v63 = vld [vmem:[#allocation36_spill] sm:$0xff] }
 0x43b   : > { %v1621_v17 = vadd.f32 %v1613_v46, %v1592_v33  ;;  %v2319_v43 = vmul.f32 %v5418_v0, %v5012_v5  ;;  %v2335_v58 = vmul.f32 %v5110_v36, %v5005_v1  ;;  %v1966_v23 = vadd.f32 %v1958_v55, %v1937_v7  ;;  %v6599_v0 = vld [vmem:[#allocation38_spill] sm:$0xff] }
 0x43c   : > { %v2678_v42 = vadd.f32 %v2670_v34, %v2654_v38  ;;  %v1700_v10 = vmul.f32 %v6596_v21, %v5058_v53  ;;  %v2359_v13 = vmul.f32 %v6596_v21, %v5008_v2  ;;  %v2950_v61 = vadd.f32 %v6597_v4, %v2925_v9  ;;  %v6600_v21 = vld [vmem:[#allocation43_spill] sm:$0xff]  ;;  %v6604_v4 = vld [vmem:[#allocation44_spill] sm:$0xff] }
 0x43d   : > { %v1650_v51 = vadd.f32 %v1642_v19, %v1621_v17  ;;  %v2343_v59 = vadd.f32 %v2335_v58, %v2319_v43  ;;  %v2383_v46 = vmul.f32 %v6598_v63, %v5017_v8  ;;  %v1994_v54 = vadd.f32 %v1986_v30, %v1966_v23  ;;  %v6601_v43 = vld [vmem:[#allocation56_spill] sm:$0xff] }
 0x43e   : > { %v2702_v33 = vadd.f32 %v2694_v47, %v2678_v42  ;;  %v2743_v36 = vmul.f32 %v6599_v0, %v5113_v37  ;;  %v1729_v55 = vmul.f32 %v6598_v63, %v5071_v56  ;;  %v2958_v38 = vadd.f32 %v5375_v6, %v2950_v61 }
 0x43f   : > { %v1679_v34 = vadd.f32 %v1671_v16, %v1650_v51  ;;  %v2367_v7 = vadd.f32 %v2359_v13, %v2343_v59  ;;  %v2407_v9 = vmul.f32 %v6600_v21, %v5024_v22  ;;  %v2022_v19 = vadd.f32 %v2014_v24, %v1994_v54  ;;  %v6602_v51 = vld [vmem:[#allocation42_spill] sm:$0xff] }
 0x440   : > { %v2726_v17 = vadd.f32 %v2718_v14, %v2702_v33  ;;  %v2768_v58 = vmul.f32 %v6601_v43, %v5116_v39  ;;  %v1757_v30 = vmul.f32 %v6600_v21, %v5081_v62  ;;  %v2966_v42 = vmax.f32 %v2958_v38, 0.0  ;;  %v6603_v24 = vld [vmem:[#allocation34_spill] sm:$0xff] }
 0x441   : > { %v1708_v0 = vadd.f32 %v1700_v10, %v1679_v34  ;;  %v2391_v47 = vadd.f32 %v2383_v46, %v2367_v7  ;;  %v2431_v23 = vmul.f32 %v5338_v49, %v5028_v27  ;;  %v2050_v61 = vadd.f32 %v2042_v32, %v2022_v19  ;;  %v6605_v32 = vld [vmem:[#allocation39_spill] sm:$0xff]  ;;  %v6606_v34 = vld [vmem:[#allocation58_spill] sm:$0xff]  ;;  %v5476_v7 = vld [vmem:[#allocation2 + $0x70] sm:$0xff] }
 0x442   : > { %v2129_v59 = vmul.f32 %v6602_v51, %v5429_v11  ;;  %v2751_v16 = vadd.f32 %v2743_v36, %v2726_v17  ;;  %v2793_v14 = vmul.f32 %v6603_v24, %v6582_v20  ;;  %3741 = vmatprep.mubr.f32.mxu1 %v2966_v42  ;;  %v1785_v63 = vmul.f32 %v6604_v4, %v5087_v12  ;;  %v5478_v19 = vld [vmem:[#allocation2 + $0x108] sm:$0xff] }
 0x443   : > { %v1737_v13 = vadd.f32 %v1729_v55, %v1708_v0  ;;  %v2415_v54 = vadd.f32 %v2407_v9, %v2391_v47  ;;  %v2455_v10 = vmul.f32 %v6604_v4, %v5035_v35  ;;  %v2079_v46 = vadd.f32 %v2071_v3, %v2050_v61  ;;  %6607 = vst [vmem:[#allocation45_spill] sm:$0xff] %v5478_v19  ;;  %v6608_v42 = vld [vmem:[#allocation59_spill] sm:$0xff]  ;;  %v5488_v61 = vld [vmem:[#allocation2 + $0x1b0] sm:$0xff] }
 0x444   : > { %v2776_v33 = vadd.f32 %v2768_v58, %v2751_v16  ;;  %v2818_v38 = vmul.f32 %v6605_v32, %v5152_v18  ;;  %v2843_v36 = vmul.f32 %v6606_v34, %v6587_v44  ;;  %v1814_v17 = vmul.f32 %v5090_v15, %v5476_v7  ;;  %6609 = vst [vmem:[#allocation54_spill] sm:$0xff] %v5488_v61  ;;  %v5490_v16 = vld [vmem:[#allocation2 + $0x248] sm:$0xff] }
 0x445   : > { %v1765_v55 = vadd.f32 %v1757_v30, %v1737_v13  ;;  %v2439_v9 = vadd.f32 %v2431_v23, %v2415_v54  ;;  %v2479_v43 = vmul.f32 %v5476_v7, %v5042_v45  ;;  %v2108_v3 = vadd.f32 %v2100_v31, %v2079_v46  ;;  %6610 = vst [vmem:[#allocation47_spill] sm:$0xff] %v5490_v16  ;;  %v5494_v23 = vld [vmem:[#allocation2 + $0x2f0] sm:$0xff] }
 0x446   : > { %v2801_v58 = vadd.f32 %v2793_v14, %v2776_v33  ;;  %v2868_v0 = vmul.f32 %v6608_v42, %v5158_v29  ;;  %v2893_v47 = vmul.f32 %v5478_v19, %v5168_v50  ;;  %v1843_v24 = vmul.f32 %v5098_v25, %v5488_v61  ;;  %6611 = vst [vmem:[#allocation40_spill] sm:$0xff] %v5494_v23 }
 0x447   : > { %v1793_v30 = vadd.f32 %v1785_v63, %v1765_v55  ;;  %v2463_v13 = vadd.f32 %v2455_v10, %v2439_v9  ;;  %v2503_v31 = vmul.f32 %v5488_v61, %v5047_v41  ;;  %v2137_v14 = vadd.f32 %v2129_v59, %v2108_v3 }
 0x448   : > { %v2826_v54 = vadd.f32 %v2818_v38, %v2801_v58  ;;  %v2918_v46 = vmul.f32 %v5490_v16, %v6567_v40  ;;  %v1872_v33 = vmul.f32 %v5103_v28, %v5494_v23  ;;  %v1901_v63 = vmul.f32 %v6585_v26, %v5113_v37  ;;  %v6612_v38 = vld [vmem:[#allocation53_spill] sm:$0xff] }
 0x449   : > { %v1822_v19 = vadd.f32 %v1814_v17, %v1793_v30  ;;  %v2487_v55 = vadd.f32 %v2479_v43, %v2463_v13  ;;  %v2527_v42 = vmul.f32 %v5494_v23, %v5050_v48  ;;  %v2151_v10 = vadd.f32 %v5375_v6, %v2137_v14  ;;  %v5517_v14 = vld [vmem:[#allocation2 + $0x388] sm:$0xff] }
 0x44a   : > { %v2851_v9 = vadd.f32 %v2843_v36, %v2826_v54  ;;  %v1391_v59 = vmul.f32 %v5488_v61, %v5012_v5  ;;  %v1411_v3 = vmul.f32 %v6612_v38, %v5005_v1  ;;  %v2551_v17 = vmul.f32 %v6585_v26, %v5055_v52  ;;  %6613 = vst [vmem:[#allocation57_spill] sm:$0xff] %v5517_v14  ;;  %v6614_v61 = vld [vmem:[#allocation48_spill] sm:$0xff] }
 0x44b   : > { %v1851_v58 = vadd.f32 %v1843_v24, %v1822_v19  ;;  %v2511_v16 = vadd.f32 %v2503_v31, %v2487_v55  ;;  %v1440_v43 = vmul.f32 %v6584_v57, %v5008_v2  ;;  %v2159_v30 = vmax.f32 %v2151_v10, 0.0  ;;  %v6615_v31 = vld [vmem:[#allocation46_spill] sm:$0xff]  ;;  %v6616_v10 = vld [vmem:[#allocation51_spill] sm:$0xff] }
 0x44c   : > { %v2876_v13 = vadd.f32 %v2868_v0, %v2851_v9  ;;  %v1419_v23 = vadd.f32 %v1411_v3, %v1391_v59  ;;  %v1469_v36 = vmul.f32 %v5278_v60, %v5017_v8  ;;  %v1930_v38 = vmul.f32 %v6614_v61, %v5116_v39 }
 0x44d   : > { %v1880_v54 = vadd.f32 %v1872_v33, %v1851_v58  ;;  %v2535_v19 = vadd.f32 %v2527_v42, %v2511_v16  ;;  %v2575_v24 = vmul.f32 %v6614_v61, %v5058_v53  ;;  %3698 = vmatmul.mubr.f32.vlgmr.msra.gmra.mrb[0].mxu0 %v2159_v30  ;;  %v2943_v57 = vmul.f32 %v5517_v14, %v6602_v51  ;;  %v6617_v61 = vld [vmem:[#allocation50_spill] sm:$0xff]  ;;  %v6618_v58 = vld [vmem:[#allocation49_spill] sm:$0xff] }
 0x44e   : > { %v2901_v26 = vadd.f32 %v2893_v47, %v2876_v13  ;;  %v1448_v0 = vadd.f32 %v1440_v43, %v1419_v23  ;;  %v1498_v55 = vmul.f32 %v6615_v31, %v5024_v22  ;;  %v1959_v33 = vmul.f32 %v6616_v10, %v6582_v20 }
 0x44f   : > { %v1909_v60 = vadd.f32 %v1901_v63, %v1880_v54  ;;  %v2559_v9 = vadd.f32 %v2551_v17, %v2535_v19  ;;  %v2599_v42 = vmul.f32 %v6616_v10, %v5071_v56  ;;  %v1527_v47 = vmul.f32 %v6617_v61, %v5028_v27  ;;  %v6619_v17 = vld [vmem:[#allocation52_spill] sm:$0xff] }
 0x450   : > { %v2926_v16 = vadd.f32 %v2918_v46, %v2901_v26  ;;  %v1477_v59 = vadd.f32 %v1469_v36, %v1448_v0  ;;  %v1987_v23 = vmul.f32 %v6618_v58, %v5152_v18  ;;  %v2623_v63 = vmul.f32 %v6618_v58, %v5081_v62  ;;  %v6620_v46 = vld [vmem:[#allocation33_spill] sm:$0xff]  ;;  %v5543_v0 = vld [vmem:[#allocation2 + $0x28] sm:$0xff] }
 0x451   : > { %v1938_v3 = vadd.f32 %v1930_v38, %v1909_v60  ;;  %v2583_v43 = vadd.f32 %v2575_v24, %v2559_v9  ;;  %v1556_v54 = vmul.f32 %v6619_v17, %v5035_v35  ;;  %v2015_v36 = vmul.f32 %v6620_v46, %v6587_v44  ;;  %6621 = vst [vmem:[#allocation35_spill] sm:$0xff] %v5543_v0 }
 0x452   : > { %v2951_v30 = vadd.f32 %v2943_v57, %v2926_v16  ;;  %v1506_v13 = vadd.f32 %v1498_v55, %v1477_v59  ;;  %v2647_v38 = vmul.f32 %v5429_v11, %v5087_v12  ;;  %v2043_v60 = vmul.f32 %v5429_v11, %v5158_v29  ;;  %v5548_v57 = vld [vmem:[#allocation2 + $0xc0] sm:$0xff] }
 0x453   : > { %v1967_v19 = vadd.f32 %v1959_v33, %v1938_v3  ;;  %v2607_v26 = vadd.f32 %v2599_v42, %v2583_v43  ;;  %6622 = vst [vmem:[#allocation41_spill] sm:$0xff] %v5548_v57  ;;  %v1585_v10 = vmul.f32 %v5042_v45, %v5543_v0  ;;  %v2072_v9 = vmul.f32 %v5168_v50, %v5548_v57  ;;  %v5554_v42 = vld [vmem:[#allocation2 + $0x200] sm:$0xff]  ;;  %v5558_v3 = vld [vmem:[#allocation2 + $0x168] sm:$0xff] }
 0x454   : > { %v2959_v24 = vadd.f32 %v5375_v6, %v2951_v30  ;;  %v1535_v55 = vadd.f32 %v1527_v47, %v1506_v13  ;;  %6623 = vst [vmem:[#allocation36_spill] sm:$0xff] %v5554_v42  ;;  %v2671_v59 = vmul.f32 %v5548_v57, %v5090_v15  ;;  %6624 = vst [vmem:[#allocation38_spill] sm:$0xff] %v5558_v3  ;;  %v5570_v57 = vld [vmem:[#allocation2 + $0x340] sm:$0xff] }
 0x455   : > { %v1995_v33 = vadd.f32 %v1987_v23, %v1967_v19  ;;  %v2631_v16 = vadd.f32 %v2623_v63, %v2607_v26  ;;  %v2101_v30 = vmul.f32 %v6567_v40, %v5554_v42  ;;  %v1614_v13 = vmul.f32 %v5047_v41, %v5558_v3  ;;  %v5564_v23 = vld [vmem:[#allocation2 + $0x2a8] sm:$0xff]  ;;  %6626 = vst [vmem:[#allocation56_spill] sm:$0xff] %v5570_v57 }
 0x456   : > { %v2967_v43 = vmax.f32 %v2959_v24, 0.0  ;;  %v1564_v47 = vadd.f32 %v1556_v54, %v1535_v55  ;;  %6625 = vst [vmem:[#allocation43_spill] sm:$0xff] %v5564_v23  ;;  %v2695_v63 = vmul.f32 %v5554_v42, %v5098_v25  ;;  %v1643_v26 = vmul.f32 %v5050_v48, %v5564_v23 }
 0x457   : > { %v2023_v19 = vadd.f32 %v2015_v36, %v1995_v33  ;;  %v2655_v0 = vadd.f32 %v2647_v38, %v2631_v16  ;;  %v2320_v54 = vmul.f32 %v5554_v42, %v5012_v5  ;;  %v2336_v55 = vmul.f32 %v6600_v21, %v5005_v1 }
 0x458   : > { %3742 = vmatmul.mubr.f32.vlgmr.msra.gmra.mrb[0].mxu1 %v2967_v43  ;;  %v1593_v24 = vadd.f32 %v1585_v10, %v1564_v47  ;;  %v2360_v36 = vmul.f32 %v5338_v49, %v5008_v2  ;;  %v2130_v33 = vmul.f32 %v6602_v51, %v5570_v57  ;;  %v2719_v43 = vmul.f32 %v5570_v57, %v5103_v28 }
 0x459   : > { %v2051_v38 = vadd.f32 %v2043_v60, %v2023_v19  ;;  %v2679_v16 = vadd.f32 %v2671_v59, %v2655_v0  ;;  %v1672_v10 = vmul.f32 %v6600_v21, %v5055_v52  ;;  %v2344_v47 = vadd.f32 %v2336_v55, %v2320_v54  ;;  %v6627_v55 = vld [vmem:[#allocation59_spill] sm:$0xff] }
 0x45a   : > { %v1622_v23 = vadd.f32 %v1614_v13, %v1593_v24  ;;  %v2384_v3 = vmul.f32 %v6604_v4, %v5017_v8  ;;  %v2744_v60 = vmul.f32 %v6605_v32, %v5113_v37  ;;  %v2769_v19 = vmul.f32 %v6606_v34, %v5116_v39 }
 0x45b   : > { %v2080_v42 = vadd.f32 %v2072_v9, %v2051_v38  ;;  %v2703_v11 = vadd.f32 %v2695_v63, %v2679_v16  ;;  %v1701_v59 = vmul.f32 %v5338_v49, %v5058_v53  ;;  %v2368_v13 = vadd.f32 %v2360_v36, %v2344_v47  ;;  %v6628_v63 = vld [vmem:[#allocation45_spill] sm:$0xff]  ;;  %v6630_v47 = vld [vmem:[#allocation47_spill] sm:$0xff] }
 0x45c   : > { %v1651_v0 = vadd.f32 %v1643_v26, %v1622_v23  ;;  %v2408_v21 = vmul.f32 %v5476_v7, %v5024_v22  ;;  %v2794_v9 = vmul.f32 %v6627_v55, %v6582_v20  ;;  %v2819_v38 = vmul.f32 %v6628_v63, %v5152_v18  ;;  %v6629_v26 = vld [vmem:[#allocation54_spill] sm:$0xff] }
 0x45d   : > { %v2109_v24 = vadd.f32 %v2101_v30, %v2080_v42  ;;  %v2727_v54 = vadd.f32 %v2719_v43, %v2703_v11  ;;  %v1730_v34 = vmul.f32 %v6604_v4, %v5071_v56  ;;  %v2392_v23 = vadd.f32 %v2384_v3, %v2368_v13  ;;  %v5606_v30 = vld [vmem:[#allocation2 + $0x110] sm:$0xff]  ;;  %v5619_v55 = vld [vmem:[#allocation2 + $0x78] sm:$0xff] }
 0x45e   : > { %v1680_v32 = vadd.f32 %v1672_v10, %v1651_v0  ;;  %v2432_v49 = vmul.f32 %v6629_v26, %v5028_v27  ;;  %v2844_v42 = vmul.f32 %v6630_v47, %v6587_v44  ;;  %v2869_v11 = vmul.f32 %v5517_v14, %v5158_v29  ;;  %6631 = vst [vmem:[#allocation34_spill] sm:$0xff] %v5606_v30  ;;  %v5608_v43 = vld [vmem:[#allocation2 + $0x250] sm:$0xff] }
 0x45f   : > { %v2138_v36 = vadd.f32 %v2130_v33, %v2109_v24  ;;  %v2752_v16 = vadd.f32 %v2744_v60, %v2727_v54  ;;  %6632 = vst [vmem:[#allocation44_spill] sm:$0xff] %v5608_v43  ;;  %v1758_v4 = vmul.f32 %v5476_v7, %v5081_v62  ;;  %v2416_v3 = vadd.f32 %v2408_v21, %v2392_v23  ;;  %v6633_v0 = vld [vmem:[#allocation40_spill] sm:$0xff] }
 0x460   : > { %v1709_v10 = vadd.f32 %v1701_v59, %v1680_v32  ;;  %v2456_v13 = vmul.f32 %v6633_v0, %v5035_v35  ;;  %v2894_v24 = vmul.f32 %v5606_v30, %v5168_v50  ;;  %v2919_v54 = vmul.f32 %v5608_v43, %v6567_v40  ;;  %v5621_v14 = vld [vmem:[#allocation2 + $0x390] sm:$0xff]  ;;  %v5625_v32 = vld [vmem:[#allocation2 + $0x1b8] sm:$0xff] }
 0x461   : > { %v2152_v33 = vadd.f32 %v5375_v6, %v2138_v36  ;;  %v2777_v60 = vadd.f32 %v2769_v19, %v2752_v16  ;;  %6634 = vst [vmem:[#allocation39_spill] sm:$0xff] %v5621_v14  ;;  %v1786_v21 = vmul.f32 %v6633_v0, %v5087_v12  ;;  %6635 = vst [vmem:[#allocation58_spill] sm:$0xff] %v5625_v32 }
 0x462   : > { %v1738_v59 = vadd.f32 %v1730_v34, %v1709_v10  ;;  %v2440_v23 = vadd.f32 %v2432_v49, %v2416_v3  ;;  %v2480_v19 = vmul.f32 %v5619_v55, %v5042_v45  ;;  %v2944_v30 = vmul.f32 %v5621_v14, %v6602_v51  ;;  %v5637_v3 = vld [vmem:[#allocation2 + $0x2f8] sm:$0xff] }
 0x463   : > { %v2160_v36 = vmax.f32 %v2152_v33, 0.0  ;;  %v2802_v16 = vadd.f32 %v2794_v9, %v2777_v60  ;;  %v1815_v43 = vmul.f32 %v5090_v15, %v5619_v55  ;;  %v1844_v34 = vmul.f32 %v5098_v25, %v5625_v32  ;;  %6636 = vst [vmem:[#allocation53_spill] sm:$0xff] %v5637_v3 }
 0x464   : > { %v1766_v47 = vadd.f32 %v1758_v4, %v1738_v59  ;;  %v2464_v10 = vadd.f32 %v2456_v13, %v2440_v23  ;;  %v2504_v63 = vmul.f32 %v5625_v32, %v5047_v41  ;;  %v1392_v9 = vmul.f32 %v5625_v32, %v5012_v5 }
 0x465   : > { %3700 = vmatprep.mubr.f32.mxu0 %v2160_v36  ;;  %v2827_v49 = vadd.f32 %v2819_v38, %v2802_v16  ;;  %v1412_v33 = vmul.f32 %v6615_v31, %v5005_v1  ;;  %v1441_v4 = vmul.f32 %v6617_v61, %v5008_v2  ;;  %v1873_v13 = vmul.f32 %v5103_v28, %v5637_v3 }
 0x466   : > { %v1794_v60 = vadd.f32 %v1786_v21, %v1766_v47  ;;  %v2488_v59 = vadd.f32 %v2480_v19, %v2464_v10  ;;  %v2528_v23 = vmul.f32 %v5637_v3, %v5050_v48  ;;  %v1902_v36 = vmul.f32 %v6618_v58, %v5113_v37  ;;  %v6637_v10 = vld [vmem:[#allocation55_spill] sm:$0xff] }
 0x467   : > { %v2852_v38 = vadd.f32 %v2844_v42, %v2827_v49  ;;  %v1420_v16 = vadd.f32 %v1412_v33, %v1392_v9  ;;  %v1470_v14 = vmul.f32 %v6619_v17, %v5017_v8  ;;  %v1931_v61 = vmul.f32 %v6620_v46, %v5116_v39  ;;  %v6638_v49 = vld [vmem:[#allocation35_spill] sm:$0xff]  ;;  %v6639_v33 = vld [vmem:[#allocation41_spill] sm:$0xff] }
 0x468   : > { %v1823_v31 = vadd.f32 %v1815_v43, %v1794_v60  ;;  %v2512_v47 = vadd.f32 %v2504_v63, %v2488_v59  ;;  %v2552_v21 = vmul.f32 %v6618_v58, %v5055_v52  ;;  %v1960_v3 = vmul.f32 %v6637_v10, %v6582_v20  ;;  %v6640_v59 = vld [vmem:[#allocation36_spill] sm:$0xff] }
 0x469   : > { %v2877_v19 = vadd.f32 %v2869_v11, %v2852_v38  ;;  %v1449_v42 = vadd.f32 %v1441_v4, %v1420_v16  ;;  %v1499_v32 = vmul.f32 %v6638_v49, %v5024_v22  ;;  %v1988_v17 = vmul.f32 %v6639_v33, %v5152_v18  ;;  %v6641_v38 = vld [vmem:[#allocation38_spill] sm:$0xff] }
 0x46a   : > { %v1852_v9 = vadd.f32 %v1844_v34, %v1823_v31  ;;  %v2536_v43 = vadd.f32 %v2528_v23, %v2512_v47  ;;  %v2576_v60 = vmul.f32 %v6620_v46, %v5058_v53  ;;  %v2016_v58 = vmul.f32 %v6640_v59, %v6587_v44  ;;  %v5671_v34 = vld [vmem:[#allocation2 + $0xc8] sm:$0xff] }
 0x46b   : > { %v2902_v63 = vadd.f32 %v2894_v24, %v2877_v19  ;;  %v1478_v11 = vadd.f32 %v1470_v14, %v1449_v42  ;;  %v1528_v20 = vmul.f32 %v6641_v38, %v5028_v27  ;;  %v2044_v16 = vmul.f32 %v5570_v57, %v5158_v29  ;;  %6642 = vst [vmem:[#allocation48_spill] sm:$0xff] %v5671_v34  ;;  %v5677_v24 = vld [vmem:[#allocation2 + $0x208] sm:$0xff] }
 0x46c   : > { %v1881_v4 = vadd.f32 %v1873_v13, %v1852_v9  ;;  %v2560_v31 = vadd.f32 %v2552_v21, %v2536_v43  ;;  %v2600_v23 = vmul.f32 %v6637_v10, %v5071_v56  ;;  %v2073_v46 = vmul.f32 %v5168_v50, %v5671_v34  ;;  %6643 = vst [vmem:[#allocation46_spill] sm:$0xff] %v5677_v24  ;;  %v6644_v19 = vld [vmem:[#allocation43_spill] sm:$0xff] }
 0x46d   : > { %v2927_v47 = vadd.f32 %v2919_v54, %v2902_v63  ;;  %v1507_v14 = vadd.f32 %v1499_v32, %v1478_v11  ;;  %v1557_v42 = vmul.f32 %v6644_v19, %v5035_v35  ;;  %v2102_v9 = vmul.f32 %v6567_v40, %v5677_v24  ;;  %v5683_v59 = vld [vmem:[#allocation2 + $0x348] sm:$0xff]  ;;  %v5687_v54 = vld [vmem:[#allocation2 + $0x30] sm:$0xff] }
 0x46e   : > { %v1910_v13 = vadd.f32 %v1902_v36, %v1881_v4  ;;  %6645 = vst [vmem:[#allocation51_spill] sm:$0xff] %v5683_v59  ;;  %v2584_v21 = vadd.f32 %v2576_v60, %v2560_v31  ;;  %v2624_v10 = vmul.f32 %v6639_v33, %v5081_v62  ;;  %6646 = vst [vmem:[#allocation50_spill] sm:$0xff] %v5687_v54  ;;  %v5699_v31 = vld [vmem:[#allocation2 + $0x170] sm:$0xff] }
 0x46f   : > { %v2952_v43 = vadd.f32 %v2944_v30, %v2927_v47  ;;  %v5691_v63 = vmul.f32 %v6602_v51, %v5683_v59  ;;  %v1536_v32 = vadd.f32 %v1528_v20, %v1507_v14  ;;  %v1586_v36 = vmul.f32 %v5042_v45, %v5687_v54  ;;  %6647 = vst [vmem:[#allocation49_spill] sm:$0xff] %v5699_v31 }
 0x470   : > { %v1939_v11 = vadd.f32 %v1931_v61, %v1910_v13  ;;  %v2608_v4 = vadd.f32 %v2600_v23, %v2584_v21  ;;  %v2648_v19 = vmul.f32 %v5570_v57, %v5087_v12  ;;  %v2672_v60 = vmul.f32 %v5671_v34, %v5090_v15  ;;  %v5706_v23 = vld [vmem:[#allocation2 + $0x2b0] sm:$0xff] }
 0x471   : > { %v2960_v30 = vadd.f32 %v5375_v6, %v2952_v43  ;;  %v2696_v47 = vmul.f32 %v5677_v24, %v5098_v25  ;;  %v1565_v51 = vadd.f32 %v1557_v42, %v1536_v32  ;;  %v1615_v20 = vmul.f32 %v5047_v41, %v5699_v31  ;;  %6648 = vst [vmem:[#allocation52_spill] sm:$0xff] %v5706_v23 }
 0x472   : > { %v1968_v14 = vadd.f32 %v1960_v3, %v1939_v11  ;;  %v2632_v61 = vadd.f32 %v2624_v10, %v2608_v4  ;;  %v2321_v13 = vmul.f32 %v5677_v24, %v5012_v5  ;;  %v2337_v21 = vmul.f32 %v5476_v7, %v5005_v1  ;;  %v6649_v4 = vld [vmem:[#allocation45_spill] sm:$0xff] }
 0x473   : > { %v2968_v34 = vmax.f32 %v2960_v30, 0.0  ;;  %v1594_v57 = vadd.f32 %v1586_v36, %v1565_v51  ;;  %v1644_v43 = vmul.f32 %v5050_v48, %v5706_v23  ;;  %v2361_v42 = vmul.f32 %v6629_v26, %v5008_v2 }
 0x474   : > { %v1996_v32 = vadd.f32 %v1988_v17, %v1968_v14  ;;  %v2656_v31 = vadd.f32 %v2648_v19, %v2632_v61  ;;  %v2345_v3 = vadd.f32 %v2337_v21, %v2321_v13  ;;  %v2385_v10 = vmul.f32 %v6633_v0, %v5017_v8  ;;  %v6650_v19 = vld [vmem:[#allocation47_spill] sm:$0xff]  ;;  %v6652_v61 = vld [vmem:[#allocation57_spill] sm:$0xff] }
 0x475   : > { %3744 = vmatprep.mubr.f32.mxu1 %v2968_v34  ;;  %v2720_v11 = vmul.f32 %v5683_v59, %v5103_v28  ;;  %v2745_v30 = vmul.f32 %v6649_v4, %v5113_v37  ;;  %v1623_v51 = vadd.f32 %v1615_v20, %v1594_v57  ;;  %v1673_v36 = vmul.f32 %v5476_v7, %v5055_v52  ;;  %v6651_v34 = vld [vmem:[#allocation37_spill] sm:$0xff]  ;;  %v6653_v7 = vld [vmem:[#allocation58_spill] sm:$0xff] }
 0x476   : > { %v2024_v24 = vadd.f32 %v2016_v58, %v1996_v32  ;;  %v2680_v23 = vadd.f32 %v2672_v60, %v2656_v31  ;;  %v2369_v54 = vadd.f32 %v2361_v42, %v2345_v3  ;;  %v2409_v17 = vmul.f32 %v5619_v55, %v5024_v22  ;;  %v6654_v60 = vld [vmem:[#allocation34_spill] sm:$0xff]  ;;  %v6655_v42 = vld [vmem:[#allocation44_spill] sm:$0xff] }
 0x477   : > { %v2770_v14 = vmul.f32 %v6650_v19, %v5116_v39  ;;  %v2795_v13 = vmul.f32 %v6652_v61, %v6651_v34  ;;  %v1652_v21 = vadd.f32 %v1644_v43, %v1623_v51  ;;  %v1702_v4 = vmul.f32 %v6629_v26, %v5058_v53  ;;  %v5740_v61 = vld [vmem:[#allocation2 + $0x118] sm:$0xff] }
 0x478   : > { %v2052_v57 = vadd.f32 %v2044_v16, %v2024_v24  ;;  %v2704_v20 = vadd.f32 %v2696_v47, %v2680_v23  ;;  %v2393_v59 = vadd.f32 %v2385_v10, %v2369_v54  ;;  %v2433_v58 = vmul.f32 %v6653_v7, %v5028_v27  ;;  %6656 = vst [vmem:[#allocation33_spill] sm:$0xff] %v5740_v61  ;;  %v6657_v16 = vld [vmem:[#allocation53_spill] sm:$0xff]  ;;  %v6658_v54 = vld [vmem:[#allocation39_spill] sm:$0xff] }
 0x479   : > { %v2820_v31 = vmul.f32 %v6654_v60, %v5152_v18  ;;  %v2845_v32 = vmul.f32 %v6655_v42, %v6587_v44  ;;  %v1681_v3 = vadd.f32 %v1673_v36, %v1652_v21  ;;  %v1731_v19 = vmul.f32 %v6633_v0, %v5071_v56  ;;  %v5750_v21 = vld [vmem:[#allocation2 + $0x80] sm:$0xff] }
 0x47a   : > { %v2081_v43 = vadd.f32 %v2073_v46, %v2052_v57  ;;  %v2728_v51 = vadd.f32 %v2720_v11, %v2704_v20  ;;  %v2417_v26 = vadd.f32 %v2409_v17, %v2393_v59  ;;  %v2457_v24 = vmul.f32 %v6657_v16, %v5035_v35  ;;  %6659 = vst [vmem:[#allocation59_spill] sm:$0xff] %v5750_v21  ;;  %v5752_v11 = vld [vmem:[#allocation2 + $0x258] sm:$0xff]  ;;  %v5754_v59 = vld [vmem:[#allocation2 + $0x1c0] sm:$0xff] }
 0x47b   : > { %v2870_v47 = vmul.f32 %v6658_v54, %v5158_v29  ;;  %v2895_v23 = vmul.f32 %v5740_v61, %v5168_v50  ;;  %v1710_v10 = vadd.f32 %v1702_v4, %v1681_v3  ;;  %v1759_v36 = vmul.f32 %v5619_v55, %v5081_v62  ;;  %6660 = vst [vmem:[#allocation54_spill] sm:$0xff] %v5752_v11 }
 0x47c   : > { %v2110_v0 = vadd.f32 %v2102_v9, %v2081_v43  ;;  %v2753_v46 = vadd.f32 %v2745_v30, %v2728_v51  ;;  %6661 = vst [vmem:[#allocation40_spill] sm:$0xff] %v5754_v59  ;;  %v2441_v17 = vadd.f32 %v2433_v58, %v2417_v26  ;;  %v2481_v57 = vmul.f32 %v5750_v21, %v5042_v45  ;;  %v5765_v43 = vld [vmem:[#allocation2 + $0x300] sm:$0xff] }
 0x47d   : > { %v2920_v20 = vmul.f32 %v5752_v11, %v6567_v40  ;;  %v1739_v61 = vadd.f32 %v1731_v19, %v1710_v10  ;;  %v1787_v4 = vmul.f32 %v6657_v16, %v5087_v12  ;;  %v1816_v3 = vmul.f32 %v5090_v15, %v5750_v21 }
 0x47e   : > { %v2139_v9 = vadd.f32 %v5691_v63, %v2110_v0  ;;  %v2778_v30 = vadd.f32 %v2770_v14, %v2753_v46  ;;  %v2465_v51 = vadd.f32 %v2457_v24, %v2441_v17  ;;  %v2505_v58 = vmul.f32 %v5754_v59, %v5047_v41  ;;  %v6662_v46 = vld [vmem:[#allocation43_spill] sm:$0xff] }
 0x47f   : > { %v1767_v26 = vadd.f32 %v1759_v36, %v1739_v61  ;;  %v1845_v11 = vmul.f32 %v5098_v25, %v5754_v59  ;;  %v2529_v19 = vmul.f32 %v5765_v43, %v5050_v48  ;;  %v1393_v10 = vmul.f32 %v5754_v59, %v5012_v5  ;;  %v5784_v59 = vld [vmem:[#allocation2 + $0x398] sm:$0xff] }
 0x480   : > { %v2153_v54 = vadd.f32 %v5375_v6, %v2139_v9  ;;  %v2803_v63 = vadd.f32 %v2795_v13, %v2778_v30  ;;  %v2489_v14 = vadd.f32 %v2481_v57, %v2465_v51  ;;  %v1413_v24 = vmul.f32 %v6638_v49, %v5005_v1  ;;  %6663 = vst [vmem:[#allocation55_spill] sm:$0xff] %v5784_v59  ;;  %v6664_v57 = vld [vmem:[#allocation42_spill] sm:$0xff]  ;;  %v6665_v51 = vld [vmem:[#allocation36_spill] sm:$0xff] }
 0x481   : > { %v1795_v0 = vadd.f32 %v1787_v4, %v1767_v26  ;;  %v2553_v61 = vmul.f32 %v6639_v33, %v5055_v52  ;;  %v1442_v36 = vmul.f32 %v6641_v38, %v5008_v2  ;;  %v1471_v17 = vmul.f32 %v6662_v46, %v5017_v8 }
 0x482   : > { %v2161_v42 = vmax.f32 %v2153_v54, 0.0  ;;  %v2828_v21 = vadd.f32 %v2820_v31, %v2803_v63  ;;  %v2513_v9 = vadd.f32 %v2505_v58, %v2489_v14  ;;  %v1421_v13 = vadd.f32 %v1413_v24, %v1393_v10  ;;  %v6666_v31 = vld [vmem:[#allocation50_spill] sm:$0xff]  ;;  %v6667_v10 = vld [vmem:[#allocation56_spill] sm:$0xff] }
 0x483   : > { %v2945_v30 = vmul.f32 %v5784_v59, %v6664_v57  ;;  %v1824_v49 = vadd.f32 %v1816_v3, %v1795_v0  ;;  %v1874_v4 = vmul.f32 %v5103_v28, %v5765_v43  ;;  %v2577_v26 = vmul.f32 %v6665_v51, %v5058_v53 }
 0x484   : > { %3701 = vmatmul.mubr.f32.gmra.mrb[2].mxu0 %v2161_v42  ;;  %v2853_v38 = vadd.f32 %v2845_v32, %v2828_v21  ;;  %v2537_v60 = vadd.f32 %v2529_v19, %v2513_v9  ;;  %v1450_v46 = vadd.f32 %v1442_v36, %v1421_v13  ;;  %v1500_v54 = vmul.f32 %v6666_v31, %v5024_v22  ;;  %v6668_v42 = vld [vmem:[#allocation49_spill] sm:$0xff] }
 0x485   : > { %v1853_v63 = vadd.f32 %v1845_v11, %v1824_v49  ;;  %v1903_v58 = vmul.f32 %v6639_v33, %v5113_v37  ;;  %v1932_v3 = vmul.f32 %v6665_v51, %v5116_v39  ;;  %v2601_v14 = vmul.f32 %v6667_v10, %v5071_v56  ;;  %v6669_v11 = vld [vmem:[#allocation48_spill] sm:$0xff] }
 0x486   : > { %v2878_v24 = vadd.f32 %v2870_v47, %v2853_v38  ;;  %v2561_v0 = vadd.f32 %v2553_v61, %v2537_v60  ;;  %v1479_v59 = vadd.f32 %v1471_v17, %v1450_v46  ;;  %v1529_v32 = vmul.f32 %v6668_v42, %v5028_v27  ;;  %v6670_v47 = vld [vmem:[#allocation52_spill] sm:$0xff]  ;;  %v6671_v17 = vld [vmem:[#allocation46_spill] sm:$0xff] }
 0x487   : > { %v1882_v21 = vadd.f32 %v1874_v4, %v1853_v63  ;;  %v1961_v19 = vmul.f32 %v6667_v10, %v6651_v34  ;;  %v1989_v36 = vmul.f32 %v6669_v11, %v5152_v18  ;;  %v2625_v33 = vmul.f32 %v6669_v11, %v5081_v62  ;;  %v6672_v4 = vld [vmem:[#allocation51_spill] sm:$0xff]  ;;  %v5816_v63 = vld [vmem:[#allocation2 + $0x38] sm:$0xff]  ;;  %v5818_v42 = vld [vmem:[#allocation2 + $0xd0] sm:$0xff] }
 0x488   : > { %v2903_v9 = vadd.f32 %v2895_v23, %v2878_v24  ;;  %v2585_v13 = vadd.f32 %v2577_v26, %v2561_v0  ;;  %v1508_v49 = vadd.f32 %v1500_v54, %v1479_v59  ;;  %v1558_v60 = vmul.f32 %v6670_v47, %v5035_v35  ;;  %6673 = vst [vmem:[#allocation35_spill] sm:$0xff] %v5816_v63  ;;  %v5820_v23 = vld [vmem:[#allocation2 + $0x210] sm:$0xff] }
 0x489   : > { %v1911_v61 = vadd.f32 %v1903_v58, %v1882_v21  ;;  %v2017_v51 = vmul.f32 %v6671_v17, %v6587_v44  ;;  %v2045_v38 = vmul.f32 %v6672_v4, %v5158_v29  ;;  %v2649_v46 = vmul.f32 %v6672_v4, %v5087_v12  ;;  %6674 = vst [vmem:[#allocation41_spill] sm:$0xff] %v5818_v42  ;;  %v5832_v4 = vld [vmem:[#allocation2 + $0x350] sm:$0xff] }
 0x48a   : > { %v2928_v10 = vadd.f32 %v2920_v20, %v2903_v9  ;;  %v2609_v59 = vadd.f32 %v2601_v14, %v2585_v13  ;;  %v1537_v26 = vadd.f32 %v1529_v32, %v1508_v49  ;;  %v1587_v54 = vmul.f32 %v5042_v45, %v5816_v63  ;;  %v5830_v20 = vld [vmem:[#allocation2 + $0x178] sm:$0xff]  ;;  %6676 = vst [vmem:[#allocation45_spill] sm:$0xff] %v5832_v4 }
 0x48b   : > { %v1940_v58 = vadd.f32 %v1932_v3, %v1911_v61  ;;  %v2074_v24 = vmul.f32 %v5168_v50, %v5818_v42  ;;  %v2673_v0 = vmul.f32 %v5818_v42, %v5090_v15  ;;  %v2697_v21 = vmul.f32 %v5820_v23, %v5098_v25  ;;  %6675 = vst [vmem:[#allocation38_spill] sm:$0xff] %v5830_v20  ;;  %v5836_v3 = vld [vmem:[#allocation2 + $0x2b8] sm:$0xff] }
 0x48c   : > { %v2953_v9 = vadd.f32 %v2945_v30, %v2928_v10  ;;  %v2633_v14 = vadd.f32 %v2625_v33, %v2609_v59  ;;  %v1566_v32 = vadd.f32 %v1558_v60, %v1537_v26  ;;  %v1616_v13 = vmul.f32 %v5047_v41, %v5830_v20  ;;  %6677 = vst [vmem:[#allocation47_spill] sm:$0xff] %v5836_v3 }
 0x48d   : > { %v1969_v49 = vadd.f32 %v1961_v19, %v1940_v58  ;;  %v2721_v61 = vmul.f32 %v5832_v4, %v5103_v28  ;;  %v1645_v42 = vmul.f32 %v5050_v48, %v5836_v3  ;;  %v2322_v63 = vmul.f32 %v5820_v23, %v5012_v5 }
 0x48e   : > { %v2961_v30 = vadd.f32 %v5375_v6, %v2953_v9  ;;  %v2657_v10 = vadd.f32 %v2649_v46, %v2633_v14  ;;  %v1595_v33 = vadd.f32 %v1587_v54, %v1566_v32  ;;  %v2338_v60 = vmul.f32 %v5619_v55, %v5005_v1  ;;  %v6678_v54 = vld [vmem:[#allocation34_spill] sm:$0xff] }
 0x48f   : > { %v1997_v59 = vadd.f32 %v1989_v36, %v1969_v49  ;;  %v1674_v19 = vmul.f32 %v5619_v55, %v5055_v52  ;;  %v2362_v26 = vmul.f32 %v6653_v7, %v5008_v2  ;;  %v2386_v58 = vmul.f32 %v6657_v16, %v5017_v8  ;;  %v6679_v8 = vld [vmem:[#allocation59_spill] sm:$0xff] }
 0x490   : > { %v2969_v3 = vmax.f32 %v2961_v30, 0.0  ;;  %v2681_v20 = vadd.f32 %v2673_v0, %v2657_v10  ;;  %v1624_v17 = vadd.f32 %v1616_v13, %v1595_v33  ;;  %v2346_v47 = vadd.f32 %v2338_v60, %v2322_v63  ;;  %v6680_v63 = vld [vmem:[#allocation44_spill] sm:$0xff] }
 0x491   : > { %v2025_v9 = vadd.f32 %v2017_v51, %v1997_v59  ;;  %v2103_v46 = vmul.f32 %v6567_v40, %v5820_v23  ;;  %v2746_v36 = vmul.f32 %v6678_v54, %v5113_v37  ;;  %v1703_v55 = vmul.f32 %v6653_v7, %v5058_v53 }
 0x492   : > { %3745 = vmatmul.mubr.f32.gmra.mrb[2].mxu1 %v2969_v3  ;;  %v2705_v14 = vadd.f32 %v2697_v21, %v2681_v20  ;;  %v1653_v32 = vadd.f32 %v1645_v42, %v1624_v17  ;;  %v2370_v49 = vadd.f32 %v2362_v26, %v2346_v47  ;;  %v2410_v30 = vmul.f32 %v6679_v8, %v5024_v22  ;;  %v6681_v21 = vld [vmem:[#allocation40_spill] sm:$0xff]  ;;  %v6682_v17 = vld [vmem:[#allocation39_spill] sm:$0xff] }
 0x493   : > { %v2053_v0 = vadd.f32 %v2045_v38, %v2025_v9  ;;  %v2132_v51 = vmul.f32 %v6664_v57, %v5832_v4  ;;  %v2771_v13 = vmul.f32 %v6680_v63, %v5116_v39  ;;  %v1732_v10 = vmul.f32 %v6657_v16, %v5071_v56  ;;  %v6683_v38 = vld [vmem:[#allocation33_spill] sm:$0xff]  ;;  %v5885_v63 = vld [vmem:[#allocation2 + $0x120] sm:$0xff] }
 0x494   : > { %v2729_v33 = vadd.f32 %v2721_v61, %v2705_v14  ;;  %v1682_v60 = vadd.f32 %v1674_v19, %v1653_v32  ;;  %v2394_v7 = vadd.f32 %v2386_v58, %v2370_v49  ;;  %v2434_v42 = vmul.f32 %v6681_v21, %v5028_v27  ;;  %v6684_v19 = vld [vmem:[#allocation54_spill] sm:$0xff]  ;;  %v5883_v49 = vld [vmem:[#allocation2 + $0x88] sm:$0xff]  ;;  %6687 = vst [vmem:[#allocation57_spill] sm:$0xff] %v5885_v63 }
 0x495   : > { %v2082_v47 = vadd.f32 %v2074_v24, %v2053_v0  ;;  %v2796_v20 = vmul.f32 %v6682_v17, %v6651_v34  ;;  %v2821_v3 = vmul.f32 %v6683_v38, %v5152_v18  ;;  %v1760_v59 = vmul.f32 %v6679_v8, %v5081_v62  ;;  %v6685_v24 = vld [vmem:[#allocation55_spill] sm:$0xff]  ;;  %6686 = vst [vmem:[#allocation37_spill] sm:$0xff] %v5883_v49 }
 0x496   : > { %v2754_v26 = vadd.f32 %v2746_v36, %v2729_v33  ;;  %v1711_v9 = vadd.f32 %v1703_v55, %v1682_v60  ;;  %v2418_v54 = vadd.f32 %v2410_v30, %v2394_v7  ;;  %v2458_v16 = vmul.f32 %v5765_v43, %v5035_v35  ;;  %v5887_v55 = vld [vmem:[#allocation2 + $0x1c8] sm:$0xff] }
 0x497   : > { %v2111_v61 = vadd.f32 %v2103_v46, %v2082_v47  ;;  %v2846_v58 = vmul.f32 %v6684_v19, %v6587_v44  ;;  %v2871_v14 = vmul.f32 %v6685_v24, %v5158_v29  ;;  %v1788_v32 = vmul.f32 %v5765_v43, %v5087_v12  ;;  %6688 = vst [vmem:[#allocation58_spill] sm:$0xff] %v5887_v55  ;;  %v6692_v24 = vld [vmem:[#allocation52_spill] sm:$0xff] }
 0x498   : > { %v2779_v0 = vadd.f32 %v2771_v13, %v2754_v26  ;;  %v1740_v36 = vadd.f32 %v1732_v10, %v1711_v9  ;;  %v2442_v30 = vadd.f32 %v2434_v42, %v2418_v54  ;;  %v2482_v46 = vmul.f32 %v5883_v49, %v5042_v45  ;;  %v5897_v26 = vld [vmem:[#allocation2 + $0x308] sm:$0xff] }
 0x499   : > { %v2140_v33 = vadd.f32 %v2132_v51, %v2111_v61  ;;  %v2896_v60 = vmul.f32 %v5885_v63, %v5168_v50  ;;  %v1817_v7 = vmul.f32 %v5090_v15, %v5883_v49  ;;  %v1846_v47 = vmul.f32 %v5098_v25, %v5887_v55  ;;  %6689 = vst [vmem:[#allocation53_spill] sm:$0xff] %v5897_v26  ;;  %v5916_v49 = vld [vmem:[#allocation2 + $0x260] sm:$0xff] }
 0x49a   : > { %v2804_v13 = vadd.f32 %v2796_v20, %v2779_v0  ;;  %v1768_v17 = vadd.f32 %v1760_v59, %v1740_v36  ;;  %v2466_v10 = vadd.f32 %v2458_v16, %v2442_v30  ;;  %v2506_v42 = vmul.f32 %v5887_v55, %v5047_v41  ;;  %6693 = vst [vmem:[#allocation43_spill] sm:$0xff] %v5916_v49 }
 0x49b   : > { %v2154_v9 = vadd.f32 %v5375_v6, %v2140_v33  ;;  %v1875_v51 = vmul.f32 %v5103_v28, %v5897_v26  ;;  %v2530_v54 = vmul.f32 %v5897_v26, %v5050_v48  ;;  %v1394_v61 = vmul.f32 %v5887_v55, %v5012_v5  ;;  %v6690_v6 = vld [vmem:[#allocation49_spill] sm:$0xff]  ;;  %v6691_v33 = vld [vmem:[#allocation31_spill] sm:$0xff] }
 0x49c   : > { %v2829_v63 = vadd.f32 %v2821_v3, %v2804_v13  ;;  %v1796_v20 = vadd.f32 %v1788_v32, %v1768_v17  ;;  %v2490_v59 = vadd.f32 %v2482_v46, %v2466_v10  ;;  %v1414_v16 = vmul.f32 %v6666_v31, %v5005_v1  ;;  %v6694_v13 = vld [vmem:[#allocation46_spill] sm:$0xff]  ;;  %v6695_v10 = vld [vmem:[#allocation35_spill] sm:$0xff] }
 0x49d   : > { %v2162_v0 = vmax.f32 %v2154_v9, 0.0  ;;  %v2554_v36 = vmul.f32 %v6669_v11, %v5055_v52  ;;  %v1443_v30 = vmul.f32 %v6690_v6, %v5008_v2  ;;  %v1472_v19 = vmul.f32 %v6692_v24, %v6691_v33 }
 0x49e   : > { %v2854_v26 = vadd.f32 %v2846_v58, %v2829_v63  ;;  %v1825_v55 = vadd.f32 %v1817_v7, %v1796_v20  ;;  %v2514_v3 = vadd.f32 %v2506_v42, %v2490_v59  ;;  %v1422_v32 = vadd.f32 %v1414_v16, %v1394_v61  ;;  %v5926_v58 = vld [vmem:[#allocation2 + $0x3a0] sm:$0xff] }
 0x49f   : > { %3703 = vmatprep.mubr.f32.mxu0 %v2162_v0  ;;  %v2921_v31 = vmul.f32 %v5916_v49, %v6567_v40  ;;  %v1904_v46 = vmul.f32 %v6669_v11, %v5113_v37  ;;  %v2578_v17 = vmul.f32 %v6694_v13, %v5058_v53  ;;  %v1501_v9 = vmul.f32 %v6695_v10, %v5024_v22  ;;  %v6697_v11 = vld [vmem:[#allocation51_spill] sm:$0xff]  ;;  %v6698_v16 = vld [vmem:[#allocation38_spill] sm:$0xff] }
 0x4a0   : > { %v2879_v24 = vadd.f32 %v2871_v14, %v2854_v26  ;;  %6696 = vst [vmem:[#allocation42_spill] sm:$0xff] %v5926_v58  ;;  %v1854_v63 = vadd.f32 %v1846_v47, %v1825_v55  ;;  %v2538_v7 = vadd.f32 %v2530_v54, %v2514_v3  ;;  %v1451_v42 = vadd.f32 %v1443_v30, %v1422_v32  ;;  %v6699_v47 = vld [vmem:[#allocation41_spill] sm:$0xff]  ;;  %v6700_v30 = vld [vmem:[#allocation47_spill] sm:$0xff] }
 0x4a1   : > { %v2946_v61 = vmul.f32 %v5926_v58, %v6664_v57  ;;  %v1933_v20 = vmul.f32 %v6694_v13, %v5116_v39  ;;  %v2602_v59 = vmul.f32 %v6697_v11, %v5071_v56  ;;  %v1530_v0 = vmul.f32 %v6698_v16, %v5028_v27  ;;  %v5942_v56 = vld [vmem:[#allocation2 + $0x40] sm:$0xff] }
 0x4a2   : > { %v2904_v6 = vadd.f32 %v2896_v60, %v2879_v24  ;;  %v1883_v10 = vadd.f32 %v1875_v51, %v1854_v63  ;;  %v2562_v14 = vadd.f32 %v2554_v36, %v2538_v7  ;;  %v1480_v26 = vadd.f32 %v1472_v19, %v1451_v42  ;;  %6701 = vst [vmem:[#allocation36_spill] sm:$0xff] %v5942_v56 }
 0x4a3   : > { %v1962_v55 = vmul.f32 %v6697_v11, %v6651_v34  ;;  %v2626_v54 = vmul.f32 %v6699_v47, %v5081_v62  ;;  %v1559_v3 = vmul.f32 %v6700_v30, %v5035_v35  ;;  %v1990_v60 = vmul.f32 %v6699_v47, %v5152_v18 }
 0x4a4   : > { %v2929_v32 = vadd.f32 %v2921_v31, %v2904_v6  ;;  %v1912_v13 = vadd.f32 %v1904_v46, %v1883_v10  ;;  %v2586_v58 = vadd.f32 %v2578_v17, %v2562_v14  ;;  %v1509_v49 = vadd.f32 %v1501_v9, %v1480_v26  ;;  %v5952_v31 = vld [vmem:[#allocation2 + $0xd8] sm:$0xff]  ;;  %v5956_v9 = vld [vmem:[#allocation2 + $0x180] sm:$0xff] }
 0x4a5   : > { %v2018_v19 = vmul.f32 %v5820_v23, %v6587_v44  ;;  %v2650_v51 = vmul.f32 %v5832_v4, %v5087_v12  ;;  %v1588_v36 = vmul.f32 %v5042_v45, %v5942_v56  ;;  %6702 = vst [vmem:[#allocation50_spill] sm:$0xff] %v5952_v31  ;;  %v5954_v46 = vld [vmem:[#allocation2 + $0x218] sm:$0xff]  ;;  %6704 = vst [vmem:[#allocation48_spill] sm:$0xff] %v5956_v9  ;;  %v5972_v6 = vld [vmem:[#allocation2 + $0x2c0] sm:$0xff] }
 0x4a6   : > { %v2954_v24 = vadd.f32 %v2946_v61, %v2929_v32  ;;  %v1941_v63 = vadd.f32 %v1933_v20, %v1912_v13  ;;  %6703 = vst [vmem:[#allocation56_spill] sm:$0xff] %v5954_v46  ;;  %v2610_v17 = vadd.f32 %v2602_v59, %v2586_v58  ;;  %v1538_v10 = vadd.f32 %v1530_v0, %v1509_v49  ;;  %v5969_v20 = vld [vmem:[%s6577_s5] ss:$0 sm:$0xff] }
 0x4a7   : > { %v2046_v7 = vmul.f32 %v5832_v4, %v5158_v29  ;;  %v2075_v42 = vmul.f32 %v5168_v50, %v5952_v31  ;;  %v2674_v11 = vmul.f32 %v5952_v31, %v5090_v15  ;;  %v1617_v61 = vmul.f32 %v5047_v41, %v5956_v9  ;;  %6705 = vst [vmem:[#allocation34_spill] sm:$0xff] %v5972_v6 }
 0x4a8   : > { %v2962_v49 = vadd.f32 %v5969_v20, %v2954_v24  ;;  %v1970_v58 = vadd.f32 %v1962_v55, %v1941_v63  ;;  %v2634_v59 = vadd.f32 %v2626_v54, %v2610_v17  ;;  %v1567_v0 = vadd.f32 %v1559_v3, %v1538_v10  ;;  %v5982_v24 = vld [vmem:[#allocation2 + $0x358] sm:$0xff] }
 0x4a9   : > { %v2698_v14 = vmul.f32 %v5954_v46, %v5098_v25  ;;  %v1646_v26 = vmul.f32 %v5050_v48, %v5972_v6  ;;  %v2323_v32 = vmul.f32 %v5954_v46, %v5012_v5  ;;  %v2339_v13 = vmul.f32 %v6679_v8, %v5005_v1  ;;  %6706 = vst [vmem:[#allocation59_spill] sm:$0xff] %v5982_v24 }
 0x4aa   : > { %v2970_v31 = vmax.f32 %v2962_v49, 0.0  ;;  %v1998_v9 = vadd.f32 %v1990_v60, %v1970_v58  ;;  %v2658_v55 = vadd.f32 %v2650_v51, %v2634_v59  ;;  %v1596_v54 = vadd.f32 %v1588_v36, %v1567_v0  ;;  %v6707_v58 = vld [vmem:[#allocation37_spill] sm:$0xff] }
 0x4ab   : > { %v2722_v3 = vmul.f32 %v5982_v24, %v5103_v28  ;;  %v2347_v63 = vadd.f32 %v2339_v13, %v2323_v32  ;;  %v2363_v17 = vmul.f32 %v6681_v21, %v5008_v2  ;;  %v2387_v10 = vmul.f32 %v5765_v43, %v6691_v33 }
 0x4ac   : > { %3747 = vmatprep.mubr.f32.mxu1 %v2970_v31  ;;  %v2026_v6 = vadd.f32 %v2018_v19, %v1998_v9  ;;  %v2682_v4 = vadd.f32 %v2674_v11, %v2658_v55  ;;  %v1625_v56 = vadd.f32 %v1617_v61, %v1596_v54  ;;  %v1675_v60 = vmul.f32 %v6679_v8, %v5055_v52  ;;  %v6708_v8 = vld [vmem:[#allocation54_spill] sm:$0xff] }
 0x4ad   : > { %v2104_v51 = vmul.f32 %v6567_v40, %v5954_v46  ;;  %v2747_v36 = vmul.f32 %v6683_v38, %v5113_v37  ;;  %v2371_v49 = vadd.f32 %v2363_v17, %v2347_v63  ;;  %v2411_v59 = vmul.f32 %v6707_v58, %v5024_v22  ;;  %v6709_v61 = vld [vmem:[#allocation58_spill] sm:$0xff]  ;;  %v6710_v17 = vld [vmem:[#allocation32_spill] sm:$0xff] }
 0x4ae   : > { %v2054_v0 = vadd.f32 %v2046_v7, %v2026_v6  ;;  %v2706_v32 = vadd.f32 %v2698_v14, %v2682_v4  ;;  %v1654_v13 = vadd.f32 %v1646_v26, %v1625_v56  ;;  %v1704_v19 = vmul.f32 %v6681_v21, %v5058_v53  ;;  %v6711_v56 = vld [vmem:[#allocation55_spill] sm:$0xff]  ;;  %v6712_v21 = vld [vmem:[#allocation57_spill] sm:$0xff] }
 0x4af   : > { %v2133_v31 = vmul.f32 %v6664_v57, %v5982_v24  ;;  %v2772_v9 = vmul.f32 %v6708_v8, %v5116_v39  ;;  %v2395_v11 = vadd.f32 %v2387_v10, %v2371_v49  ;;  %v2435_v38 = vmul.f32 %v6709_v61, %v5028_v27  ;;  %v6713_v26 = vld [vmem:[#allocation53_spill] sm:$0xff] }
 0x4b0   : > { %v2083_v55 = vadd.f32 %v2075_v42, %v2054_v0  ;;  %v2730_v54 = vadd.f32 %v2722_v3, %v2706_v32  ;;  %v1683_v63 = vadd.f32 %v1675_v60, %v1654_v13  ;;  %v1733_v4 = vmul.f32 %v5765_v43, %v6710_v17  ;;  %v6016_v3 = vld [vmem:[#allocation2 + $0x90] sm:$0xff]  ;;  %v6715_v43 = vld [vmem:[#allocation43_spill] sm:$0xff]  ;;  %v6716_v0 = vld [vmem:[#allocation42_spill] sm:$0xff] }
 0x4b1   : > { %v2797_v7 = vmul.f32 %v6711_v56, %v6651_v34  ;;  %v2822_v6 = vmul.f32 %v6712_v21, %v5152_v18  ;;  %v2419_v14 = vadd.f32 %v2411_v59, %v2395_v11  ;;  %v2459_v8 = vmul.f32 %v6713_v26, %v5035_v35  ;;  %6714 = vst [vmem:[#allocation44_spill] sm:$0xff] %v6016_v3 }
 0x4b2   : > { %v2112_v10 = vadd.f32 %v2104_v51, %v2083_v55  ;;  %v2755_v49 = vadd.f32 %v2747_v36, %v2730_v54  ;;  %v1712_v24 = vadd.f32 %v1704_v19, %v1683_v63  ;;  %v1761_v42 = vmul.f32 %v6707_v58, %v5081_v62  ;;  %v6024_v51 = vld [vmem:[#allocation2 + $0x128] sm:$0xff]  ;;  %v6028_v55 = vld [vmem:[#allocation2 + $0x1d0] sm:$0xff] }
 0x4b3   : > { %v2847_v60 = vmul.f32 %v6715_v43, %v6587_v44  ;;  %v2872_v32 = vmul.f32 %v6716_v0, %v5158_v29  ;;  %v2443_v13 = vadd.f32 %v2435_v38, %v2419_v14  ;;  %v2483_v59 = vmul.f32 %v6016_v3, %v5042_v45  ;;  %6717 = vst [vmem:[#allocation40_spill] sm:$0xff] %v6024_v51 }
 0x4b4   : > { %v2141_v11 = vadd.f32 %v2133_v31, %v2112_v10  ;;  %v2780_v56 = vadd.f32 %v2772_v9, %v2755_v49  ;;  %v1741_v36 = vadd.f32 %v1733_v4, %v1712_v24  ;;  %v1789_v19 = vmul.f32 %v6713_v26, %v5087_v12  ;;  %6718 = vst [vmem:[#allocation39_spill] sm:$0xff] %v6028_v55  ;;  %v6039_v4 = vld [vmem:[#allocation2 + $0x310] sm:$0xff] }
 0x4b5   : > { %v2897_v54 = vmul.f32 %v6024_v51, %v5168_v50  ;;  %v1818_v63 = vmul.f32 %v5090_v15, %v6016_v3  ;;  %v2467_v38 = vadd.f32 %v2459_v8, %v2443_v13  ;;  %v2507_v14 = vmul.f32 %v6028_v55, %v5047_v41  ;;  %v6719_v8 = vld [vmem:[#allocation35_spill] sm:$0xff] }
 0x4b6   : > { %v2155_v31 = vadd.f32 %v5969_v20, %v2141_v11  ;;  %v2805_v9 = vadd.f32 %v2797_v7, %v2780_v56  ;;  %v1769_v10 = vadd.f32 %v1761_v42, %v1741_v36  ;;  %v1847_v24 = vmul.f32 %v5098_v25, %v6028_v55  ;;  %v6049_v42 = vld [vmem:[#allocation2 + $0x268] sm:$0xff] }
 0x4b7   : > { %v2491_v49 = vadd.f32 %v2483_v59, %v2467_v38  ;;  %v2531_v51 = vmul.f32 %v6039_v4, %v5050_v48  ;;  %v1395_v0 = vmul.f32 %v6028_v55, %v5012_v5  ;;  %v1415_v13 = vmul.f32 %v6719_v8, %v5005_v1  ;;  %v6722_v8 = vld [vmem:[#allocation45_spill] sm:$0xff] }
 0x4b8   : > { %v2163_v43 = vmax.f32 %v2155_v31, 0.0  ;;  %v2830_v3 = vadd.f32 %v2822_v6, %v2805_v9  ;;  %v1797_v11 = vadd.f32 %v1789_v19, %v1769_v10  ;;  %v1444_v7 = vmul.f32 %v6698_v16, %v5008_v2  ;;  %v6059_v16 = vld [vmem:[#allocation2 + $0x3a8] sm:$0xff] }
 0x4b9   : > { %v2515_v56 = vadd.f32 %v2507_v14, %v2491_v49  ;;  %v2555_v59 = vmul.f32 %v6699_v47, %v5055_v52  ;;  %v1423_v36 = vadd.f32 %v1415_v13, %v1395_v0  ;;  %v1473_v38 = vmul.f32 %v6700_v30, %v6691_v33  ;;  %6720 = vst [vmem:[#allocation33_spill] sm:$0xff] %v6059_v16  ;;  %v6721_v0 = vld [vmem:[#allocation36_spill] sm:$0xff] }
 0x4ba   : > { %3704 = vmatmul.mubr.f32.gmra.mrb[4].mxu0 %v2163_v43  ;;  %v2855_v55 = vadd.f32 %v2847_v60, %v2830_v3  ;;  %v2922_v31 = vmul.f32 %v6049_v42, %v6567_v40  ;;  %v1826_v6 = vadd.f32 %v1818_v63, %v1797_v11  ;;  %v1876_v19 = vmul.f32 %v5103_v28, %v6039_v4  ;;  %v6723_v11 = vld [vmem:[#allocation48_spill] sm:$0xff] }
 0x4bb   : > { %v2539_v9 = vadd.f32 %v2531_v51, %v2515_v56  ;;  %v2579_v14 = vmul.f32 %v5820_v23, %v5058_v53  ;;  %v1452_v10 = vadd.f32 %v1444_v7, %v1423_v36  ;;  %v1502_v49 = vmul.f32 %v6721_v0, %v5024_v22  ;;  %v6725_v0 = vld [vmem:[#allocation34_spill] sm:$0xff] }
 0x4bc   : > { %v2880_v30 = vadd.f32 %v2872_v32, %v2855_v55  ;;  %v2947_v3 = vmul.f32 %v6059_v16, %v6664_v57  ;;  %v1855_v43 = vadd.f32 %v1847_v24, %v1826_v6  ;;  %v1905_v60 = vmul.f32 %v6699_v47, %v5113_v37  ;;  %v1577_v24 = vld [vmem:[#allocation2 + $0x48] sm:$0xff]  ;;  %v6724_v47 = vld [vmem:[#allocation50_spill] sm:$0xff] }
 0x4bd   : > { %v2563_v63 = vadd.f32 %v2555_v59, %v2539_v9  ;;  %v2603_v13 = vmul.f32 %v6722_v8, %v6710_v17  ;;  %v1481_v51 = vadd.f32 %v1473_v38, %v1452_v10  ;;  %v1531_v56 = vmul.f32 %v6723_v11, %v5028_v27 }
 0x4be   : > { %v2905_v7 = vadd.f32 %v2897_v54, %v2880_v30  ;;  %v1884_v36 = vadd.f32 %v1876_v19, %v1855_v43  ;;  %v1934_v32 = vmul.f32 %v5820_v23, %v5116_v39  ;;  %v1963_v55 = vmul.f32 %v6722_v8, %v6651_v34  ;;  %v1606_v19 = vld [vmem:[#allocation2 + $0x188] sm:$0xff]  ;;  %v6085_v30 = vld [vmem:[#allocation2 + $0xe0] sm:$0xff] }
 0x4bf   : > { %v2587_v6 = vadd.f32 %v2579_v14, %v2563_v63  ;;  %v2627_v59 = vmul.f32 %v6724_v47, %v5081_v62  ;;  %v1510_v9 = vadd.f32 %v1502_v49, %v1481_v51  ;;  %v1560_v38 = vmul.f32 %v6725_v0, %v5035_v35  ;;  %v6726_v14 = vld [vmem:[#allocation59_spill] sm:$0xff] }
 0x4c0   : > { %v2930_v10 = vadd.f32 %v2922_v31, %v2905_v7  ;;  %v1913_v16 = vadd.f32 %v1905_v60, %v1884_v36  ;;  %v1991_v54 = vmul.f32 %v6724_v47, %v5152_v18  ;;  %v2019_v23 = vmul.f32 %v5954_v46, %v6587_v44  ;;  %v1635_v51 = vld [vmem:[#allocation2 + $0x2c8] sm:$0xff]  ;;  %v6092_v7 = vld [vmem:[#allocation2 + $0x220] sm:$0xff] }
 0x4c1   : > { %v2611_v43 = vadd.f32 %v2603_v13, %v2587_v6  ;;  %v2651_v63 = vmul.f32 %v6726_v14, %v5087_v12  ;;  %v1539_v8 = vadd.f32 %v1531_v56, %v1510_v9  ;;  %v1589_v49 = vmul.f32 %v5042_v45, %v1577_v24  ;;  %v6096_v0 = vld [vmem:[#allocation2 + $0x360] sm:$0xff] }
 0x4c2   : > { %v2955_v11 = vadd.f32 %v2947_v3, %v2930_v10  ;;  %v1942_v31 = vadd.f32 %v1934_v32, %v1913_v16  ;;  %v2047_v60 = vmul.f32 %v6726_v14, %v5158_v29  ;;  %v2675_v36 = vmul.f32 %v6085_v30, %v5090_v15 }
 0x4c3   : > { %v2635_v13 = vadd.f32 %v2627_v59, %v2611_v43  ;;  %v2699_v6 = vmul.f32 %v6092_v7, %v5098_v25  ;;  %v1568_v56 = vadd.f32 %v1560_v38, %v1539_v8  ;;  %v1618_v24 = vmul.f32 %v5047_v41, %v1606_v19 }
 0x4c4   : > { %v2963_v3 = vadd.f32 %v5969_v20, %v2955_v11  ;;  %v1971_v16 = vadd.f32 %v1963_v55, %v1942_v31  ;;  %v2723_v32 = vmul.f32 %v6096_v0, %v5103_v28  ;;  %v1647_v9 = vmul.f32 %v5050_v48, %v1635_v51 }
 0x4c5   : > { %v2659_v10 = vadd.f32 %v2651_v63, %v2635_v13  ;;  %v1597_v14 = vadd.f32 %v1589_v49, %v1568_v56  ;;  %v2324_v46 = vmul.f32 %v6092_v7, %v5012_v5  ;;  %v2340_v59 = vmul.f32 %v6707_v58, %v5005_v1 }
 0x4c6   : > { %v2971_v43 = vmax.f32 %v2963_v3, 0.0  ;;  %v1999_v38 = vadd.f32 %v1991_v54, %v1971_v16  ;;  %v1676_v19 = vmul.f32 %v6707_v58, %v5055_v52  ;;  %v2364_v55 = vmul.f32 %v6709_v61, %v5008_v2 }
 0x4c7   : > { %v2683_v8 = vadd.f32 %v2675_v36, %v2659_v10  ;;  %v1626_v11 = vadd.f32 %v1618_v24, %v1597_v14  ;;  %v2348_v31 = vadd.f32 %v2340_v59, %v2324_v46  ;;  %v2388_v63 = vmul.f32 %v6713_v26, %v6691_v33  ;;  %v6727_v14 = vld [vmem:[#allocation44_spill] sm:$0xff]  ;;  %v1807_v59 = vld [vmem:[#allocation2 + $0x98] sm:$0xff] }
 0x4c8   : > { %3748 = vmatmul.mubr.f32.gmra.mrb[4].mxu1 %v2971_v43  ;;  %v2027_v49 = vadd.f32 %v2019_v23, %v1999_v38  ;;  %v2076_v5 = vmul.f32 %v5168_v50, %v6085_v30  ;;  %v2748_v1 = vmul.f32 %v6712_v21, %v5113_v37  ;;  %v1705_v58 = vmul.f32 %v6709_v61, %v5058_v53  ;;  %v6728_v23 = vld [vmem:[#allocation43_spill] sm:$0xff] }
 0x4c9   : > { %v2707_v54 = vadd.f32 %v2699_v6, %v2683_v8  ;;  %v1655_v51 = vadd.f32 %v1647_v9, %v1626_v11  ;;  %v2372_v2 = vadd.f32 %v2364_v55, %v2348_v31  ;;  %v2412_v46 = vmul.f32 %v6727_v14, %v5024_v22  ;;  %v6729_v61 = vld [vmem:[#allocation39_spill] sm:$0xff]  ;;  %v1836_v11 = vld [vmem:[#allocation2 + $0x1d8] sm:$0xff] }
 0x4ca   : > { %v2055_v36 = vadd.f32 %v2047_v60, %v2027_v49  ;;  %v2105_v33 = vmul.f32 %v6567_v40, %v6092_v7  ;;  %v2773_v13 = vmul.f32 %v6728_v23, %v5116_v39  ;;  %v1734_v56 = vmul.f32 %v6713_v26, %v6710_v17  ;;  %v6730_v60 = vld [vmem:[#allocation42_spill] sm:$0xff] }
 0x4cb   : > { %v2731_v21 = vadd.f32 %v2723_v32, %v2707_v54  ;;  %v1684_v24 = vadd.f32 %v1676_v19, %v1655_v51  ;;  %v2396_v3 = vadd.f32 %v2388_v63, %v2372_v2  ;;  %v2436_v6 = vmul.f32 %v6729_v61, %v5028_v27  ;;  %v6731_v27 = vld [vmem:[#allocation40_spill] sm:$0xff] }
 0x4cc   : > { %v2084_v16 = vadd.f32 %v2076_v5, %v2055_v36  ;;  %v2134_v22 = vmul.f32 %v6664_v57, %v6096_v0  ;;  %v2798_v9 = vmul.f32 %v6730_v60, %v6651_v34  ;;  %v1762_v10 = vmul.f32 %v6727_v14, %v5081_v62  ;;  %v6732_v36 = vld [vmem:[#allocation33_spill] sm:$0xff] }
 0x4cd   : > { %v2756_v43 = vadd.f32 %v2748_v1, %v2731_v21  ;;  %v1713_v38 = vadd.f32 %v1705_v58, %v1684_v24  ;;  %v2420_v26 = vadd.f32 %v2412_v46, %v2396_v3  ;;  %v2460_v32 = vmul.f32 %v6039_v4, %v5035_v35  ;;  %v1865_v35 = vld [vmem:[#allocation2 + $0x318] sm:$0xff] }
 0x4ce   : > { %v2113_v19 = vadd.f32 %v2105_v33, %v2084_v16  ;;  %v2823_v55 = vmul.f32 %v6731_v27, %v5152_v18  ;;  %v1790_v8 = vmul.f32 %v6039_v4, %v5087_v12  ;;  %v2484_v5 = vmul.f32 %v1807_v59, %v5042_v45  ;;  %v2915_v16 = vld [vmem:[#allocation2 + $0x270] sm:$0xff] }
 0x4cf   : > { %v2781_v31 = vadd.f32 %v2773_v13, %v2756_v43  ;;  %v1742_v63 = vadd.f32 %v1734_v56, %v1713_v38  ;;  %v2444_v49 = vadd.f32 %v2436_v6, %v2420_v26  ;;  %v2848_v1 = vmul.f32 %v6049_v42, %v6587_v44  ;;  %v6152_v13 = vld [vmem:[#allocation2 + $0x130] sm:$0xff] }
 0x4d0   : > { %v2142_v54 = vadd.f32 %v2134_v22, %v2113_v19  ;;  %v1819_v58 = vmul.f32 %v5090_v15, %v1807_v59  ;;  %v2508_v46 = vmul.f32 %v1836_v11, %v5047_v41  ;;  %v2873_v33 = vmul.f32 %v6732_v36, %v5158_v29  ;;  %v2940_v43 = vld [vmem:[#allocation2 + $0x3b0] sm:$0xff] }
 0x4d1   : > { %v2806_v51 = vadd.f32 %v2798_v9, %v2781_v31  ;;  %v1770_v2 = vadd.f32 %v1762_v10, %v1742_v63  ;;  %v2468_v14 = vadd.f32 %v2460_v32, %v2444_v49  ;;  %v1848_v23 = vmul.f32 %v5098_v25, %v1836_v11  ;;  %v6733_v32 = vld [vmem:[#allocation56_spill] sm:$0xff]  ;;  %v6734_v63 = vld [vmem:[#allocation59_spill] sm:$0xff] }
 0x4d2   : > { %v2156_v4 = vadd.f32 %v5969_v20, %v2142_v54  ;;  %v2532_v24 = vmul.f32 %v1865_v35, %v5050_v48  ;;  %v2898_v61 = vmul.f32 %v6152_v13, %v5168_v50  ;;  %v1877_v41 = vmul.f32 %v5103_v28, %v1865_v35  ;;  %v2065_v35 = vld [vmem:[#allocation2 + $0xe8] sm:$0xff] }
 0x4d3   : > { %v2831_v45 = vadd.f32 %v2823_v55, %v2806_v51  ;;  %v1798_v56 = vadd.f32 %v1790_v8, %v1770_v2  ;;  %v2492_v21 = vadd.f32 %v2484_v5, %v2468_v14  ;;  %v2556_v9 = vmul.f32 %v6724_v47, %v5055_v52 }
 0x4d4   : > { %v2164_v3 = vmax.f32 %v2156_v4, 0.0  ;;  %v2923_v10 = vmul.f32 %v2915_v16, %v6567_v40  ;;  %v1906_v59 = vmul.f32 %v6724_v47, %v5113_v37  ;;  %v2580_v19 = vmul.f32 %v6733_v32, %v5058_v53  ;;  %v2094_v4 = vld [vmem:[#allocation2 + $0x228] sm:$0xff] }
 0x4d5   : > { %v2856_v6 = vadd.f32 %v2848_v1, %v2831_v45  ;;  %v1827_v22 = vadd.f32 %v1819_v58, %v1798_v56  ;;  %v2516_v60 = vadd.f32 %v2508_v46, %v2492_v21  ;;  %v2948_v55 = vmul.f32 %v2940_v43, %v6664_v57  ;;  %v2123_v56 = vld [vmem:[#allocation2 + $0x368] sm:$0xff] }
 0x4d6   : > { %3706 = vmatprep.mubr.f32.mxu0 %v2164_v3  ;;  %v1935_v8 = vmul.f32 %v6733_v32, %v5116_v39  ;;  %v2604_v49 = vmul.f32 %v6734_v63, %v6710_v17  ;;  %v1964_v47 = vmul.f32 %v6734_v63, %v6651_v34  ;;  %v2628_v53 = vmul.f32 %v6085_v30, %v5081_v62 }
 0x4d7   : > { %v2881_v48 = vadd.f32 %v2873_v33, %v2856_v6  ;;  %v1856_v38 = vadd.f32 %v1848_v23, %v1827_v22  ;;  %v2540_v26 = vadd.f32 %v2532_v24, %v2516_v60  ;;  %v1992_v58 = vmul.f32 %v6085_v30, %v5152_v18 }
 0x4d8   : > { %v2652_v46 = vmul.f32 %v6096_v0, %v5087_v12  ;;  %v2020_v17 = vmul.f32 %v6092_v7, %v6587_v44  ;;  %v2676_v62 = vmul.f32 %v2065_v35, %v5090_v15  ;;  %v2048_v30 = vmul.f32 %v6096_v0, %v5158_v29 }
 0x4d9   : > { %v2906_v11 = vadd.f32 %v2898_v61, %v2881_v48  ;;  %v1885_v52 = vadd.f32 %v1877_v41, %v1856_v38  ;;  %v2564_v31 = vadd.f32 %v2556_v9, %v2540_v26  ;;  %v2700_v61 = vmul.f32 %v2094_v4, %v5098_v25 }
 0x4da   : > { %v2077_v7 = vmul.f32 %v5168_v50, %v2065_v35  ;;  %v2724_v6 = vmul.f32 %v2123_v56, %v5103_v28  ;;  %v2106_v60 = vmul.f32 %v6567_v40, %v2094_v4  ;;  %v2749_v0 = vmul.f32 %v6731_v27, %v5113_v37 }
 0x4db   : > { %v2931_v5 = vadd.f32 %v2923_v10, %v2906_v11  ;;  %v1914_v54 = vadd.f32 %v1906_v59, %v1885_v52  ;;  %v2588_v1 = vadd.f32 %v2580_v19, %v2564_v31  ;;  %v2135_v10 = vmul.f32 %v6664_v57, %v2123_v56 }
 0x4dc   : > { %v2774_v25 = vmul.f32 %v6049_v42, %v5116_v39  ;;  %v2799_v26 = vmul.f32 %v6732_v36, %v6651_v34  ;;  %v2824_v19 = vmul.f32 %v6152_v13, %v5152_v18  ;;  %v2849_v27 = vmul.f32 %v2915_v16, %v6587_v44  ;;  %v2916_v42 = vld [vmem:[#allocation2 + $0x278] sm:$0xff] }
 0x4dd   : > { %v2956_v51 = vadd.f32 %v2948_v55, %v2931_v5  ;;  %v1943_v2 = vadd.f32 %v1935_v8, %v1914_v54  ;;  %v2612_v14 = vadd.f32 %v2604_v49, %v2588_v1  ;;  %v2891_v8 = vld [vmem:[#allocation2 + $0x138] sm:$0xff]  ;;  %v2874_v39 = vmul.f32 %v2940_v43, %v5158_v29 }
 0x4de   : > { %v2899_v34 = vmul.f32 %v2891_v8, %v5168_v50  ;;  %v2941_v36 = vld [vmem:[#allocation2 + $0x3b8] sm:$0xff]  ;;  %v2924_v18 = vmul.f32 %v2916_v42, %v6567_v40  ;;  %v6207_v50 = vld [vmem:[%s6735_s23] ss:$0 sm:$0xff] }
 0x4df   : > { %v2964_v33 = vadd.f32 %v5969_v20, %v2956_v51  ;;  %v1972_v23 = vadd.f32 %v1964_v47, %v1943_v2  ;;  %v2636_v45 = vadd.f32 %v2628_v53, %v2612_v14  ;;  %v2949_v49 = vmul.f32 %v2941_v36, %v6664_v57  ;;  %v2167_v47 = vld [vmem:[%s4684_s22 + $0x8] sm:$0xff]  ;;  %v2166_v57 = vld [vmem:[%s4684_s22] sm:$0xff] }
 0x4e0   : > { %v3318_v51 = vld [vmem:[%s4684_s22 + $0x48] sm:$0xff] }
 0x4e1   : > { %v2972_v21 = vmax.f32 %v2964_v33, 0.0  ;;  %v2000_v24 = vadd.f32 %v1992_v58, %v1972_v23  ;;  %v2660_v3 = vadd.f32 %v2652_v46, %v2636_v45  ;;  %v3317_v46 = vld [vmem:[%s4684_s22 + $0x40] sm:$0xff] }
 0x4e3   : > { %3750 = vmatprep.mubr.f32.mxu1 %v2972_v21  ;;  %v2028_v12 = vadd.f32 %v2020_v17, %v2000_v24  ;;  %v2684_v41 = vadd.f32 %v2676_v62, %v2660_v3  ;;  %v2168_v24 = vld [vmem:[%s4684_s22 + $0x10] sm:$0xff] }
 0x4e5   : > { %v2056_v22 = vadd.f32 %v2048_v30, %v2028_v12  ;;  %v2708_v15 = vadd.f32 %v2700_v61, %v2684_v41  ;;  %v2169_v30 = vld [vmem:[%s4684_s22 + $0x18] sm:$0xff] }
 0x4e7   : > { %v2085_v9 = vadd.f32 %v2077_v7, %v2056_v22  ;;  %v2732_v59 = vadd.f32 %v2724_v6, %v2708_v15  ;;  %v3320_v22 = vld [vmem:[%s4684_s22 + $0x58] sm:$0xff] }
 0x4e9   : > { %v2114_v48 = vadd.f32 %v2106_v60, %v2085_v9  ;;  %v2757_v38 = vadd.f32 %v2749_v0, %v2732_v59  ;;  %v3319_v0 = vld [vmem:[%s4684_s22 + $0x50] sm:$0xff] }
 0x4eb   : > { %v2143_v28 = vadd.f32 %v2135_v10, %v2114_v48  ;;  %v2782_v32 = vadd.f32 %v2774_v25, %v2757_v38 }
 0x4ed   : > { %v2157_v55 = vadd.f32 %v5969_v20, %v2143_v28  ;;  %v2807_v37 = vadd.f32 %v2799_v26, %v2782_v32  ;;  %v2171_v26 = vld [vmem:[%s4684_s22 + $0x28] sm:$0xff] }
 0x4ef   : > { %v2165_v11 = vmax.f32 %v2157_v55, 0.0  ;;  %v2832_v52 = vadd.f32 %v2824_v19, %v2807_v37  ;;  %v2170_v19 = vld [vmem:[%s4684_s22 + $0x20] sm:$0xff] }
 0x4f1   : > { %3707 = vmatmul.mubr.f32.gmra.mrb[6].mxu0 %v2165_v11  ;;  %v2857_v31 = vadd.f32 %v2849_v27, %v2832_v52 }
 0x4f3   : > { %v2882_v63 = vadd.f32 %v2874_v39, %v2857_v31  ;;  %v3322_v39 = vld [vmem:[%s4684_s22 + $0x68] sm:$0xff] }
 0x4f5   : > { %v2907_v13 = vadd.f32 %v2899_v34, %v2882_v63  ;;  %v3321_v34 = vld [vmem:[%s4684_s22 + $0x60] sm:$0xff] }
 0x4f7   : > { %v2932_v44 = vadd.f32 %v2924_v18, %v2907_v13 }
 0x4f9   : > { %v2957_v16 = vadd.f32 %v2949_v49, %v2932_v44 }
 0x4fb   : > { %v2965_v29 = vadd.f32 %v5969_v20, %v2957_v16  ;;  %v2173_v16 = vld [vmem:[%s4684_s22 + $0x38] sm:$0xff] }
 0x4fd   : > { %v2973_v43 = vmax.f32 %v2965_v29, 0.0 }
 0x4ff   : > { %3751 = vmatmul.mubr.f32.gmra.mrb[6].mxu1 %v2973_v43 }
 0x520   : > { %v3699_v40 = vpop.f32.mrb[0].mxu0 }
 0x521   : > { %v2252_v5 = vadd.f32 %v3699_v40, %v6207_v50  ;;  %v2246_v54 = vpop.f32.mrb[1].mxu0 }
 0x522   : > { %v2247_v1 = vadd.f32 %v6207_v50, %v2246_v54 }
 0x523   : > { %v2286_v53 = vadd.f32 %v2252_v5, %v2167_v47  ;;  %v2172_v47 = vld [vmem:[%s4684_s22 + $0x30] sm:$0xff] }
 0x524   : > { %v2285_v20 = vadd.f32 %v2247_v1, %v2166_v57 }
 0x525   : > { %v2294_v58 = vmax.f32 %v2286_v53, 0.0 }
 0x526   : > { %v2293_v35 = vmax.f32 %v2285_v20, 0.0  ;;  %v3324_v20 = vld [vmem:[%s4684_s22 + $0x78] sm:$0xff] }
 0x527   : > { %2302 = vst [vmem:[%s4876_s20 + $0x8] sm:$0xff] %v2294_v58 }
 0x528   : > { %2301 = vst [vmem:[%s4876_s20] sm:$0xff] %v2293_v35 }
 0x52b   : > { %v3743_v2 = vpop.f32.mrb[0].mxu1 }
 0x52c   : > { %v3054_v14 = vadd.f32 %v3743_v2, %v6207_v50  ;;  %v3048_v17 = vpop.f32.mrb[1].mxu1 }
 0x52d   : > { %v3049_v4 = vadd.f32 %v6207_v50, %v3048_v17 }
 0x52e   : > { %v3088_v33 = vadd.f32 %v3318_v51, %v3054_v14  ;;  %v3323_v51 = vld [vmem:[%s4684_s22 + $0x70] sm:$0xff]  ;;  %s3113_s22 = scalar_lea.sflag [#allocation7], %s4678_s16 }
 0x52f   : > { %v3087_v23 = vadd.f32 %v3317_v46, %v3049_v4 }
 0x530   : > { %v3096_v45 = vmax.f32 %v3088_v33, 0.0 }
 0x531   : > { %v3095_v62 = vmax.f32 %v3087_v23, 0.0 }
 0x532   : > { %3326 = vst [vmem:[%s4876_s20 + $0x48] sm:$0xff] %v3096_v45 }
 0x533   : > { %3325 = vst [vmem:[%s4876_s20 + $0x40] sm:$0xff] %v3095_v62 }
 0x557   : > { %v3702_v56 = vpop.f32.mrb[2].mxu0 }
 0x558   : > { %v2262_v21 = vadd.f32 %v3702_v56, %v6207_v50  ;;  %v2256_v3 = vpop.f32.mrb[3].mxu0 }
 0x559   : > { %v2257_v61 = vadd.f32 %v6207_v50, %v2256_v3 }
 0x55a   : > { %v2288_v12 = vadd.f32 %v2262_v21, %v2169_v30 }
 0x55b   : > { %v2287_v7 = vadd.f32 %v2257_v61, %v2168_v24 }
 0x55c   : > { %v2296_v41 = vmax.f32 %v2288_v12, 0.0 }
 0x55d   : > { %v2295_v6 = vmax.f32 %v2287_v7, 0.0 }
 0x55e   : > { %2304 = vst [vmem:[%s4876_s20 + $0x18] sm:$0xff] %v2296_v41 }
 0x55f   : > { %2303 = vst [vmem:[%s4876_s20 + $0x10] sm:$0xff] %v2295_v6 }
 0x565   : > { %v3746_v60 = vpop.f32.mrb[2].mxu1 }
 0x566   : > { %v3064_v15 = vadd.f32 %v3746_v60, %v6207_v50  ;;  %v3058_v9 = vpop.f32.mrb[3].mxu1 }
 0x567   : > { %v3059_v10 = vadd.f32 %v6207_v50, %v3058_v9 }
 0x568   : > { %v3090_v59 = vadd.f32 %v3320_v22, %v3064_v15 }
 0x569   : > { %v3089_v25 = vadd.f32 %v3319_v0, %v3059_v10 }
 0x56a   : > { %v3098_v48 = vmax.f32 %v3090_v59, 0.0 }
 0x56b   : > { %v3097_v38 = vmax.f32 %v3089_v25, 0.0 }
 0x56c   : > { %3328 = vst [vmem:[%s4876_s20 + $0x58] sm:$0xff] %v3098_v48 }
 0x56d   : > { %3327 = vst [vmem:[%s4876_s20 + $0x50] sm:$0xff] %v3097_v38 }
 0x58d   : > { %v3705_v28 = vpop.f32.mrb[4].mxu0 }
 0x58e   : > { %v2272_v32 = vadd.f32 %v3705_v28, %v6207_v50  ;;  %v2266_v55 = vpop.f32.mrb[5].mxu0 }
 0x58f   : > { %v2267_v37 = vadd.f32 %v6207_v50, %v2266_v55 }
 0x590   : > { %v2290_v27 = vadd.f32 %v2272_v32, %v2171_v26 }
 0x591   : > { %v2289_v8 = vadd.f32 %v2267_v37, %v2170_v19 }
 0x592   : > { %v2298_v11 = vmax.f32 %v2290_v27, 0.0 }
 0x593   : > { %v2297_v52 = vmax.f32 %v2289_v8, 0.0 }
 0x594   : > { %2306 = vst [vmem:[%s4876_s20 + $0x28] sm:$0xff] %v2298_v11 }
 0x595   : > { %2305 = vst [vmem:[%s4876_s20 + $0x20] sm:$0xff] %v2297_v52 }
 0x59b   : > { %v3749_v42 = vpop.f32.mrb[4].mxu1 }
 0x59c   : > { %v3074_v31 = vadd.f32 %v3749_v42, %v6207_v50  ;;  %v3068_v36 = vpop.f32.mrb[5].mxu1 }
 0x59d   : > { %v3069_v63 = vadd.f32 %v6207_v50, %v3068_v36 }
 0x59e   : > { %v3092_v18 = vadd.f32 %v3322_v39, %v3074_v31 }
 0x59f   : > { %v3091_v13 = vadd.f32 %v3321_v34, %v3069_v63 }
 0x5a0   : > { %v3100_v49 = vmax.f32 %v3092_v18, 0.0 }
 0x5a1   : > { %v3099_v44 = vmax.f32 %v3091_v13, 0.0 }
 0x5a2   : > { %3330 = vst [vmem:[%s4876_s20 + $0x68] sm:$0xff] %v3100_v49 }
 0x5a3   : > { %3329 = vst [vmem:[%s4876_s20 + $0x60] sm:$0xff] %v3099_v44 }
 0x5c4   : > { %v3708_v29 = vpop.f32.mrb[6].mxu0 }
 0x5c5   : > { %v2282_v43 = vadd.f32 %v3708_v29, %v6207_v50  ;;  %v2276_v40 = vpop.f32.mrb[7].mxu0 }
 0x5c6   : > { %v2277_v5 = vadd.f32 %v6207_v50, %v2276_v40 }
 0x5c7   : > { %v2292_v57 = vadd.f32 %v2282_v43, %v2173_v16 }
 0x5c8   : > { %v2291_v54 = vadd.f32 %v2277_v5, %v2172_v47 }
 0x5c9   : > { %v2300_v1 = vmax.f32 %v2292_v57, 0.0 }
 0x5ca   : > { %v2299_v53 = vmax.f32 %v2291_v54, 0.0 }
 0x5cb   : > { %2308 = vst [vmem:[%s4876_s20 + $0x38] sm:$0xff] %v2300_v1 }
 0x5cc   : > { %2307 = vst [vmem:[%s4876_s20 + $0x30] sm:$0xff] %v2299_v53 }
 0x5d2   : > { %v3752_v58 = vpop.f32.mrb[6].mxu1 }
 0x5d3   : > { %v3084_v35 = vadd.f32 %v3752_v58, %v6207_v50  ;;  %v3078_v2 = vpop.f32.mrb[7].mxu1 }
 0x5d4   : > { %v3079_v14 = vadd.f32 %v6207_v50, %v3078_v2 }
 0x5d5   : > { %v3094_v46 = vadd.f32 %v3324_v20, %v3084_v35 }
 0x5d6   : > { %v3093_v17 = vadd.f32 %v3323_v51, %v3079_v14 }
 0x5d7   : > { %v3102_v4 = vmax.f32 %v3094_v46, 0.0 }
 0x5d8   : > { %v3101_v33 = vmax.f32 %v3093_v17, 0.0 }
 0x5d9   : > { %3332 = vst [vmem:[%s4876_s20 + $0x78] sm:$0xff] %v3102_v4 }
 0x5da   : > { %3331 = vst [vmem:[%s4876_s20 + $0x70] sm:$0xff] %v3101_v33 }
 0x5db   : > { %4288 = shalt.err (!%p4285_p2)
}
 0x5dc   : > { %s4289_s20 = scalar_lea.hbm %s6261_s17, 2048  ;;  %s4293_s10 = scalar_lea.hbm %s6736_s6, 8192 }
 0x5dd   : > { %p4290_p5 = scmp.ne.s32.totalorder %s6261_s17, %s4289_s20  ;;  %p4294_p6 = scmp.lt.u32.totalorder %s6261_s17, %s6736_s6 }
 0x5de   : > { %p4295_p13 = scmp.lt.u32.totalorder %s4293_s10, %s4289_s20  ;;  %p4297_p9 = scmp.lt.u32.totalorder %s4289_s20, %s6261_s17 }
 0x5df   : > { %p4291_p0 = pnand %p4290_p5, %p6737_p4 }
 0x5e0   : > { %p4296_p1 = por %p4295_p13, %p4294_p6 }
 0x5e1   : > { %p4292_p8 = pneg %p4291_p0 }
 0x5e2   : > { %p4298_p10 = por %p4297_p9, %p4296_p1 }
 0x5e4   : > { %p4299_p11 = pnand %p4298_p10, %p4292_p8 }
 0x5e6   : > { %4302 = shalt.err (!%p4299_p11)
}
 0x5e7   : > { %s4401_s23 = smov 128   ;;  %s4402_s21 = smov 8  }
 0x5e8   : > { %3995 = dma.vmem_to_hbm [thread:$0]  (%p6737_p4), %s6263_s18, 2048, %s6261_s17, %s3113_s22, %s4401_s23, %s4401_s23, %s4402_s21  }
 0x5e9 PF: > { %s6738_s4 = sld [smem:[#allocation26_spill]]  ;;  %s6739_s15 = sld [smem:[#allocation28_spill]] }
 0x5ea   : > { %p4024_p3 = scmp.ge.s32.totalorder %s4385_s12, 2 }
 0x5ef   : > { %s3144_s27 = sand.u32 1, %s6738_s4   ;;  %p6740_p7 = scmp.ne.s32.totalorder %s6739_s15, 0 }
 0x5f0   : > { %s3145_s30 = scalar_lea.sflag [#allocation7], %s3144_s27 }
 0x5f1   : > { %p4012_p12 = pnand %p4024_p3, %p6740_p7 }
 0x5f3   : > { %4352 = dma.done.wait (!%p4012_p12), %s3145_s30, 2048  }
 0x5f4   : > { %4354 = vsyncadd (!%p4012_p12), %s3145_s30, 4294965248  ;;  %s26_s12 = sadd.s32 1, %s4385_s12   ;;  %s6741_s30 = sld [smem:[#allocation27_spill]] }
 0x5f5   : > { %p23_p2 = scmp.ge.s32.totalorder %s26_s12, 6   ;;  %s6742_s10 = sld [smem:[#allocation29_spill]] }
 0x5f6   : > { %s6743_s8 = sld [smem:[#allocation30_spill]]  ;;  %s6744_s27 = smov %s4361_s28 }
 0x5f7   : > { %s6745_s28 = smov %s4365_s29  ;;  %s6746_s29 = smov %s4627_s26 }
 0x5f8   : > { %s6747_s9 = smov %s4381_s11  ;;  %25 = sbr.rel (!%p23_p2) target bundleno = 17 (0x11), region = 190 }
 0x5fc   : > { %s6748_s11 = smov %s6743_s8 }
 0x5ff   :  { %3150 = vsyncpa [#allocation6], 1 }
 0x600   :  { %3152 = vsyncpa [#allocation6 + $0x1], 1 }
 0x601   :  { %3153 = vsyncpa [#allocation9], 1 }
 0x602   :  { %3154 = vsyncpa [#allocation12], 1 }
 0x603   :  { %3155 = vsyncpa [#allocation7], 1 }
 0x604   :  { %3157 = vsyncpa [#allocation7 + $0x1], 1 }
 0x605   :  { %3158 = vsyncmov [#allocation4] }
 0x608   :  { %s3159_s16 = vpop.sfrf %3158 }
 0x609   :  { %p3340_p4 = scmp.ne.s32.totalorder %s3159_s16, 0 }
 0x60b   :  { %3163 = shalt.err (%p3340_p4)  }
 0x60c   :  { %3165 = vsyncmov [#allocation4 + $0x1] }
 0x60f   :  { %s3166_s26 = vpop.sfrf %3165 }
 0x610   :  { %p3341_p5 = scmp.ne.s32.totalorder %s3166_s26, 0 }
 0x612   :  { %3170 = shalt.err (%p3341_p5)  }

</bundles_post_ra>
